<compile_context>
chip_gen: v7x
topology: tpu7x:2x2x1
jax: 0.10.0
libtpu: 0.0.40
codegen_flags: <defaults>
</compile_context>

<pallas_src>
import numpy as np
import jax
import jax.numpy as jnp
from jax import lax
from jax.experimental import pallas as pl
from jax.experimental.pallas import tpu as pltpu

LEAKY_SLOPE = 0.01   # InPlaceABNSync default activation: leaky_relu, slope 0.01
BN_EPS = 1e-5
IM2COL_MAX_C = 256   # below this, a single K=9*C GEMM beats nine K=C taps


# ----------------------------- Pallas kernel -----------------------------

def _bottleneck_kernel(xp_ref, w_ref, scale_ref, bmap_ref, o_ref):
    """3x3 conv over the raw C feature channels + BN scale + prior bias map + leaky ReLU.

    xp_ref:    (1, H+2, W+2, C)             bf16 zero-padded image (resident, single-buffered)
    w_ref:     (9*C, Coutp) or (9, C, Coutp) bf16 conv taps (no BN scale folded in)
    scale_ref: (1, Coutp)                    f32 BN scale (applied post-accumulation in f32)
    bmap_ref:  (TM*W, Coutp)                 f32 priors' conv contribution * scale + bias
    o_ref:     (1, TM*W, Coutp)              f32 output rows for this (batch, row-tile)
    """
    r = pl.program_id(1)
    Wp = xp_ref.shape[2]
    C = xp_ref.shape[3]
    W = Wp - 2
    TMW, Coutp = o_ref.shape[1], o_ref.shape[2]
    TM = TMW // W

    row0 = pl.multiple_of(r * TM, TM)
    xt = xp_ref[0, pl.ds(row0, TM + 2), :, :]              # (TM+2, W+2, C) bf16 slab

    if len(w_ref.shape) == 2:
        # Small-C path: one im2col GEMM with K = 9*C.  Single MXU pass, accumulator
        # produced once (no 9x read-modify-write over a big f32 acc).
        cols = [xt[dy:dy + TM, dx:dx + W, :] for dy in range(3) for dx in range(3)]
        slab = jnp.concatenate(cols, axis=-1).reshape(TMW, 9 * C)
        acc = jnp.dot(slab, w_ref[...], preferred_element_type=jnp.float32)
    else:
        # Large-C path: only 3 column-shift relayout copies (one per dx); the per-dy
        # row slices below are leading-dim views, so 9 taps -> 3 copies, not 9.
        acc = jnp.zeros((TMW, Coutp), jnp.float32)
        for dx in range(3):
            xs = xt[:, dx:dx + W, :]                       # (TM+2, W, C) relayout copy
            for dy in range(3):
                patch = xs[dy:dy + TM].reshape(TMW, C)     # leading-dim slice: free view
                acc = acc + jnp.dot(patch, w_ref[dy * 3 + dx],
                                    preferred_element_type=jnp.float32)

    y = acc * scale_ref[...] + bmap_ref[...]               # BN scale + prior bias, f32
    y = jnp.where(y > 0, y, LEAKY_SLOPE * y)               # leaky relu (VPU filler)
    # f32 store kept for downstream precision; switch o_ref dtype to bf16 if the
    # consumer tolerates it (halves store traffic, biggest win on v5e).
    o_ref[0] = y.astype(o_ref.dtype)                       # lane-dense store, no reshape


# ----------------------------- tiling / budgets -----------------------------

def _vmem_limit_bytes():
    """~75% of the physical per-TC VMEM: 48 MiB on v7x (64 MiB), 96 MiB on v5e/v6e
    (128 MiB).  Leaves headroom for compiler-internal scratch and pipeline buffers."""
    cap = None
    try:
        cap = getattr(pltpu.get_tpu_info(), "vmem_capacity_bytes", None)
    except Exception:
        cap = None
    if not cap:
        cap = 64 * 1024 * 1024          # conservative fallback = v7x physical per-TC
    return (int(cap) * 3) // 4


def _pick_row_tile(H, W, B, coutp, vmem_budget):
    """Row tile that (a) divides H, (b) keeps TM*W sublane-aligned, (c) keeps the
    r-varying (double-buffered) bmap/out blocks within a fraction of the VMEM budget,
    preferring MXU-aligned TM*W (multiple of 256 for v6e/v7x, 128 for v5e) and
    B*R >= 2 so both v7x TensorCores get work even at batch 1."""
    # TODO(synk): masked tail tiles (grid=pl.cdiv(H, tm) + bounded slices) for spatial
    # sizes with no friendly divisor (e.g. 97x97); divisor-based selection only here.
    best = None
    for tm in range(1, H + 1):
        if H % tm:
            continue
        tmw = tm * W
        if (tmw % 8) and tm != H:       # (8,128) rule unless the block is the full dim
            continue
        r = H // tm
        tile_bytes = 2 * 2 * tmw * coutp * 4      # bmap + out, f32, double-buffered
        fits = tile_bytes <= max(vmem_budget // 4, 1)
        feeds_two_cores = (B * r) >= 2
        mxu = 2 if tmw % 256 == 0 else (1 if tmw % 128 == 0 else 0)
        size_pref = -abs(tmw - 512)               # prefer TM*W around 256-512
        score = (fits, feeds_two_cores, mxu, size_pref, tm)
        if best is None or score > best[0]:
            best = (score, tm)
    return best[1]


# ----------------------------- pallas_call builder -----------------------------

def _build_call(B, C, H, W, tm, coutp, w_shape, vmem_bytes, cost, single_buffer_resident):
    R = H // tm
    resident_kw = {}
    if single_buffer_resident:
        # index maps of these operands don't vary with r -> no point double-buffering.
        resident_kw = dict(pipeline_mode=pl.Buffered(1))
    if len(w_shape) == 2:
        w_index = lambda b, r: (0, 0)
    else:
        w_index = lambda b, r: (0, 0, 0)
    # TODO(synk): for production shapes where (H+2)*(W+2)*C*2B exceeds ~20-24 MB (v7x),
    # switch the image to memory_space=pl.ANY and DMA a (tm+2, W+2, C) halo row window
    # per grid step with pltpu.make_async_copy instead of keeping it resident.
    return pl.pallas_call(
        _bottleneck_kernel,
        out_shape=jax.ShapeDtypeStruct((B, H * W, coutp), jnp.float32),
        grid=(B, R),
        in_specs=[
            pl.BlockSpec((1, H + 2, W + 2, C), lambda b, r: (b, 0, 0, 0), **resident_kw),
            pl.BlockSpec(tuple(w_shape), w_index, **resident_kw),
            pl.BlockSpec((1, coutp), lambda b, r: (0, 0), **resident_kw),
            pl.BlockSpec((tm * W, coutp), lambda b, r: (r, 0)),
        ],
        out_specs=pl.BlockSpec((1, tm * W, coutp), lambda b, r: (b, r, 0)),
        compiler_params=pltpu.CompilerParams(
            dimension_semantics=("parallel", "parallel"),
            vmem_limit_bytes=vmem_bytes,
        ),
        cost_estimate=cost,
    )


def bottleneck_conv(xp_bf16, w, scale, bmap, H, W, tm, coutp, vmem_bytes):
    """xp_bf16: (B,H+2,W+2,C) bf16; w: (9*C,Coutp) or (9,C,Coutp) bf16;
    scale: (1,Coutp) f32; bmap: (H*W,Coutp) f32."""
    B = xp_bf16.shape[0]
    C = xp_bf16.shape[3]
    cost = pl.CostEstimate(
        flops=int(2 * B * H * W * 9 * C * coutp),
        transcendentals=0,
        bytes_accessed=int(xp_bf16.size * 2 + w.size * 2 + scale.size * 4
                           + B * bmap.size * 4 + B * H * W * coutp * 4),
    )
    try:
        call = _build_call(B, C, H, W, tm, coutp, w.shape, vmem_bytes, cost, True)
        return call(xp_bf16, w, scale, bmap)
    except Exception:
        # Fallback: identical kernel, default (double) buffering on resident inputs.
        call = _build_call(B, C, H, W, tm, coutp, w.shape, vmem_bytes, cost, False)
        return call(xp_bf16, w, scale, bmap)


# ---------------------- bilinear (align_corners=True) operator ----------------------

def _interp_matrix(out_size, in_size):
    m = np.zeros((out_size, in_size), np.float32)
    if in_size == 1:
        m[:, 0] = 1.0
        return m
    if out_size == 1:                       # degenerate: align_corners picks src=0
        m[0, 0] = 1.0
        return m
    scale = (in_size - 1) / (out_size - 1)
    for o in range(out_size):
        src = o * scale
        i0 = min(int(np.floor(src)), in_size - 1)
        i1 = min(i0 + 1, in_size - 1)
        frac = src - i0
        m[o, i0] += 1.0 - frac
        m[o, i1] += frac
    return m


def _upsample_operator(H, W, s):
    ry = _interp_matrix(H, s)                       # (H, s)
    cx = _interp_matrix(W, s)                       # (W, s)
    M = np.einsum('hi,wj->hwij', ry, cx).reshape(H * W, s * s)
    return jnp.asarray(M)


# ----------------------------- the module -----------------------------

class PSPModuleV3Pallas:
    def __init__(self, key, features, out_features=512, sizes=(1, 2, 3, 6), dropout=0.1):
        self.features = features
        self.out_features = out_features
        self.sizes = tuple(sizes)
        self.dropout = dropout          # identity at inference
        n = len(self.sizes)

        keys = iter(jax.random.split(key, 8 * n + 8))
        nk = lambda: next(keys)

        # learnable contexts: (1, C, s, s), like torch.randn
        self.contexts = [jax.random.normal(nk(), (1, features, s, s), jnp.float32)
                         for s in self.sizes]

        # per-scale 1x1 conv + folded eval-mode BN
        self.stage_w, self.stage_scale, self.stage_bias = [], [], []
        for _ in self.sizes:
            w = jax.random.normal(nk(), (features, out_features), jnp.float32) / np.sqrt(features)
            gamma = 1.0 + 0.1 * jax.random.normal(nk(), (out_features,), jnp.float32)
            beta = 0.1 * jax.random.normal(nk(), (out_features,), jnp.float32)
            mean = 0.1 * jax.random.normal(nk(), (out_features,), jnp.float32)
            var = jax.random.uniform(nk(), (out_features,), jnp.float32, 0.5, 1.5)
            scale = gamma / jnp.sqrt(var + BN_EPS)
            self.stage_w.append(w)
            self.stage_scale.append(scale[None, :])
            self.stage_bias.append((beta - mean * scale)[None, :])

        # stage outputs depend only on parameters -> precompute at __init__ (f32).
        self.stage_out = []
        for i, s in enumerate(self.sizes):
            ctx2d = jnp.transpose(self.contexts[i][0], (1, 2, 0)).reshape(s * s, features)
            y = ctx2d @ self.stage_w[i]
            y = y * self.stage_scale[i][0] + self.stage_bias[i][0]
            y = jnp.where(y > 0, y, LEAKY_SLOPE * y)
            self.stage_out.append(y)                       # (s*s, F)

        # bottleneck 3x3 conv (no bias) + eval-mode BN; full HWIO weight kept for reference.
        cin = features + n * out_features
        self.bottle_w_full = (jax.random.normal(nk(), (3, 3, cin, out_features), jnp.float32)
                              / np.sqrt(9 * cin))
        gamma = 1.0 + 0.1 * jax.random.normal(nk(), (out_features,), jnp.float32)
        beta = 0.1 * jax.random.normal(nk(), (out_features,), jnp.float32)
        mean = 0.1 * jax.random.normal(nk(), (out_features,), jnp.float32)
        var = jax.random.uniform(nk(), (out_features,), jnp.float32, 0.5, 1.5)
        scale = gamma / jnp.sqrt(var + BN_EPS)
        self.bottle_scale = scale[None, :]
        self.bottle_bias = (beta - mean * scale)[None, :]

        # --- kernel-side parameters: x-only taps (bf16, unscaled), Cout padded to 128 ---
        self.coutp = max(128, ((out_features + 127) // 128) * 128)
        wx = self.bottle_w_full[:, :, :features, :]                              # (3,3,C,F)
        wx = jnp.pad(wx, ((0, 0), (0, 0), (0, 0), (0, self.coutp - out_features)))
        if features <= IM2COL_MAX_C:
            # im2col layout: K index = (ky*3+kx)*C + c, matching the in-kernel concat order.
            self.wx = wx.reshape(9 * features, self.coutp).astype(jnp.bfloat16)
        else:
            self.wx = wx.reshape(9, features, self.coutp).astype(jnp.bfloat16)
        # BN scale applied in f32 post-accumulation (padded channels -> zero).
        self.scale_pad = jnp.pad(self.bottle_scale,
                                 ((0, 0), (0, self.coutp - out_features)))       # (1,Coutp)

        self._vmem_bytes = _vmem_limit_bytes()
        # cache keyed on (H, W) only — fine for pure inference with fixed parameters.
        self._bmap_cache = {}

    def _get_bias_map(self, H, W):
        """Constant per-pixel contribution of the pyramid priors to the bottleneck output:
        conv3x3(priors, W_priors)*bn_scale + bn_bias, computed once per (H, W)."""
        key = (H, W)
        if key not in self._bmap_cache:
            ups = []
            for i, s in enumerate(self.sizes):
                M = _upsample_operator(H, W, s)                          # (H*W, s*s)
                ups.append((M @ self.stage_out[i]).reshape(H, W, self.out_features))
            P = jnp.concatenate(ups, axis=-1)                            # (H, W, n*F)
            wp = self.bottle_w_full[:, :, self.features:, :]             # (3, 3, n*F, F)
            conv_p = lax.conv_general_dilated(
                P[None], wp, (1, 1), ((1, 1), (1, 1)),
                dimension_numbers=('NHWC', 'HWIO', 'NHWC'))[0]           # (H, W, F)
            bmap = conv_p * self.bottle_scale[0] + self.bottle_bias[0]
            bmap = jnp.pad(bmap, ((0, 0), (0, 0), (0, self.coutp - self.out_features)))
            self._bmap_cache[key] = bmap.reshape(H * W, self.coutp)
        return self._bmap_cache[key]

    def __call__(self, feats_nchw):
        B, C, H, W = feats_nchw.shape
        assert C == self.features
        bmap = self._get_bias_map(H, W)                                   # cached constant
        tm = _pick_row_tile(H, W, B, self.coutp, self._vmem_bytes)
        x = jnp.transpose(feats_nchw, (0, 2, 3, 1)).astype(jnp.bfloat16)  # NHWC bf16
        # TODO(synk): fold the halo pad into the kernel (zero-fill edges in VMEM) to drop
        # this extra HBM pass over (B,H+2,W+2,C) at production channel counts.
        xp = jnp.pad(x, ((0, 0), (1, 1), (1, 1), (0, 0)))
        out = bottleneck_conv(xp, self.wx, self.scale_pad, bmap, H, W, tm,
                              self.coutp, self._vmem_bytes)               # (B,H*W,Coutp) f32
        out = out.reshape(B, H, W, self.coutp)[..., :self.out_features]
        # TODO(synk): nn.Dropout2d(0.1) is train-mode-only stochastic channel drop; identity here.
        return jnp.transpose(out, (0, 3, 1, 2))                           # back to NCHW


# ----------------------------- pure-JAX reference -----------------------------

def reference_forward(module, feats_nchw):
    B, C, H, W = feats_nchw.shape
    x = jnp.transpose(feats_nchw, (0, 2, 3, 1))
    priors = [x]
    for i, s in enumerate(module.sizes):
        ctx2d = jnp.transpose(module.contexts[i][0], (1, 2, 0)).reshape(s * s, C)
        y = ctx2d @ module.stage_w[i]
        y = y * module.stage_scale[i][0] + module.stage_bias[i][0]
        y = jnp.where(y > 0, y, LEAKY_SLOPE * y)
        M = _upsample_operator(H, W, s)
        up = (M @ y).reshape(1, H, W, module.out_features)
        priors.append(jnp.broadcast_to(up, (B, H, W, module.out_features)))
    cat = jnp.concatenate(priors, axis=-1)
    conv = lax.conv_general_dilated(cat, module.bottle_w_full, (1, 1), ((1, 1), (1, 1)),
                                    dimension_numbers=('NHWC', 'HWIO', 'NHWC'))
    y = conv * module.bottle_scale[0] + module.bottle_bias[0]
    y = jnp.where(y > 0, y, LEAKY_SLOPE * y)
    return jnp.transpose(y, (0, 3, 1, 2))


# ----------------------------- main -----------------------------

if __name__ == "__main__":
    B, C, H, W = 2, 4, 16, 16      # small demo shapes: batch=2, features=4, spatial=16
    F_OUT = 32
    key = jax.random.PRNGKey(0)
    k_feats, k_params = jax.random.split(key)

    feats = jax.random.normal(k_feats, (B, C, H, W), dtype=jnp.float32)   # NCHW input

    module = PSPModuleV3Pallas(k_params, features=C, out_features=F_OUT, sizes=(1, 2, 3, 6))
    out = jax.block_until_ready(module(feats))
    assert out.shape == (B, F_OUT, H, W), out.shape

    ref = jax.block_until_ready(reference_forward(module, feats))
    max_err = float(jnp.max(jnp.abs(out - ref)))
    assert max_err < 5e-2, f"max abs err too large: {max_err}"

    print("KERNEL_OK")
</pallas_src>

<mosaic_0001>
module attributes {stable_mosaic.version = 11 : i64} {
  func.func @_bottleneck_kernel(%arg0: i32, %arg1: i32, %arg2: memref<1x18x18x4xbf16, #tpu.memory_space<vmem>>, %arg3: memref<36x128xbf16, #tpu.memory_space<vmem>>, %arg4: memref<1x128xf32, #tpu.memory_space<vmem>>, %arg5: memref<256x128xf32, #tpu.memory_space<vmem>>, %arg6: memref<1x256x128xf32, #tpu.memory_space<vmem>>) attributes {dimension_semantics = [#tpu.dimension_semantics<parallel>, #tpu.dimension_semantics<parallel>], iteration_bounds = array<i64: 2, 1>, scalar_prefetch = 0 : i64, scratch_operands = 0 : i64, tpu.core_type = #tpu.core_type<tc>, window_params = [{pipeline_mode = #tpu.pipeline_mode<synchronous>, transform_indices = @transform_0, window_bounds = array<i64: 1, 18, 18, 4>}, {pipeline_mode = #tpu.pipeline_mode<synchronous>, transform_indices = @transform_1, window_bounds = array<i64: 36, 128>}, {pipeline_mode = #tpu.pipeline_mode<synchronous>, transform_indices = @transform_2, window_bounds = array<i64: 1, 128>}, {transform_indices = @transform_3, window_bounds = array<i64: 256, 128>}, {transform_indices = @transform_4, window_bounds = array<i64: 1, 256, 128>}]} {
    %c16_i32 = arith.constant 16 : i32
    %0 = arith.muli %arg1, %c16_i32 : i32
    %1 = tpu.assume_multiple %0, 16 : i32
    %c0 = arith.constant 0 : index
    %2 = arith.index_cast %1 : i32 to index
    %c0_0 = arith.constant 0 : index
    %c0_1 = arith.constant 0 : index
    %3 = vector.load %arg2[%c0, %2, %c0_0, %c0_1] : memref<1x18x18x4xbf16, #tpu.memory_space<vmem>>, vector<1x18x18x4xbf16>
    %4 = vector.shape_cast %3 : vector<1x18x18x4xbf16> to vector<18x18x4xbf16>
    %5 = vector.extract_strided_slice %4 {offsets = [0, 0, 0], sizes = [16, 16, 4], strides = [1, 1, 1]} : vector<18x18x4xbf16> to vector<16x16x4xbf16>
    %6 = vector.extract_strided_slice %4 {offsets = [0, 1, 0], sizes = [16, 16, 4], strides = [1, 1, 1]} : vector<18x18x4xbf16> to vector<16x16x4xbf16>
    %7 = vector.extract_strided_slice %4 {offsets = [0, 2, 0], sizes = [16, 16, 4], strides = [1, 1, 1]} : vector<18x18x4xbf16> to vector<16x16x4xbf16>
    %8 = vector.extract_strided_slice %4 {offsets = [1, 0, 0], sizes = [16, 16, 4], strides = [1, 1, 1]} : vector<18x18x4xbf16> to vector<16x16x4xbf16>
    %9 = vector.extract_strided_slice %4 {offsets = [1, 1, 0], sizes = [16, 16, 4], strides = [1, 1, 1]} : vector<18x18x4xbf16> to vector<16x16x4xbf16>
    %10 = vector.extract_strided_slice %4 {offsets = [1, 2, 0], sizes = [16, 16, 4], strides = [1, 1, 1]} : vector<18x18x4xbf16> to vector<16x16x4xbf16>
    %11 = vector.extract_strided_slice %4 {offsets = [2, 0, 0], sizes = [16, 16, 4], strides = [1, 1, 1]} : vector<18x18x4xbf16> to vector<16x16x4xbf16>
    %12 = vector.extract_strided_slice %4 {offsets = [2, 1, 0], sizes = [16, 16, 4], strides = [1, 1, 1]} : vector<18x18x4xbf16> to vector<16x16x4xbf16>
    %13 = vector.extract_strided_slice %4 {offsets = [2, 2, 0], sizes = [16, 16, 4], strides = [1, 1, 1]} : vector<18x18x4xbf16> to vector<16x16x4xbf16>
    %14 = tpu.concatenate %5, %6, %7, %8, %9, %10, %11, %12, %13 in 2 : vector<16x16x4xbf16>, vector<16x16x4xbf16>, vector<16x16x4xbf16>, vector<16x16x4xbf16>, vector<16x16x4xbf16>, vector<16x16x4xbf16>, vector<16x16x4xbf16>, vector<16x16x4xbf16>, vector<16x16x4xbf16> -> vector<16x16x36xbf16>
    %15 = vector.shape_cast %14 : vector<16x16x36xbf16> to vector<256x36xbf16>
    %c0_2 = arith.constant 0 : index
    %c0_3 = arith.constant 0 : index
    %16 = vector.load %arg3[%c0_2, %c0_3] : memref<36x128xbf16, #tpu.memory_space<vmem>>, vector<36x128xbf16>
    %cst = arith.constant dense<0.000000e+00> : vector<256x128xf32>
    %17 = tpu.matmul %15, %16, %cst {dimension_numbers = #tpu.dot_dimension_numbers<[1], [0], [0], [1], [0, 0, 1, 1], [], []>} : vector<256x36xbf16>, vector<36x128xbf16>, vector<256x128xf32> -> vector<256x128xf32>
    %c0_4 = arith.constant 0 : index
    %c0_5 = arith.constant 0 : index
    %18 = vector.load %arg4[%c0_4, %c0_5] : memref<1x128xf32, #tpu.memory_space<vmem>>, vector<1x128xf32>
    %19 = vector.broadcast %18 : vector<1x128xf32> to vector<256x128xf32>
    %20 = arith.mulf %17, %19 : vector<256x128xf32>
    %c0_6 = arith.constant 0 : index
    %c0_7 = arith.constant 0 : index
    %21 = vector.load %arg5[%c0_6, %c0_7] : memref<256x128xf32, #tpu.memory_space<vmem>>, vector<256x128xf32>
    %22 = arith.addf %20, %21 : vector<256x128xf32>
    %cst_8 = arith.constant 0.000000e+00 : f32
    %23 = vector.broadcast %cst_8 : f32 to vector<256x128xf32>
    %24 = arith.cmpf ogt, %22, %23 : vector<256x128xf32>
    %cst_9 = arith.constant 0.00999999977 : f32
    %25 = vector.broadcast %cst_9 : f32 to vector<256x128xf32>
    %26 = arith.mulf %25, %22 : vector<256x128xf32>
    %27 = arith.select %24, %22, %26 : vector<256x128xi1>, vector<256x128xf32>
    %c0_10 = arith.constant 0 : index
    %c0_11 = arith.constant 0 : index
    %c0_12 = arith.constant 0 : index
    %28 = vector.load %arg6[%c0_10, %c0_11, %c0_12] : memref<1x256x128xf32, #tpu.memory_space<vmem>>, vector<1x256x128xf32>
    %29 = vector.shape_cast %28 : vector<1x256x128xf32> to vector<256x128xf32>
    %30 = vector.shape_cast %27 : vector<256x128xf32> to vector<1x256x128xf32>
    tpu.vector_store %arg6[%c0_10, %c0_11, %c0_12], %30 {strides = array<i32>} : memref<1x256x128xf32, #tpu.memory_space<vmem>>, vector<1x256x128xf32>,
    return
  }
  func.func @transform_0(%arg0: i32, %arg1: i32) -> (i32, i32, i32, i32) {
    %c0_i32 = arith.constant 0 : i32
    %c0_i32_0 = arith.constant 0 : i32
    %c0_i32_1 = arith.constant 0 : i32
    %c0_i32_2 = arith.constant 0 : i32
    return %arg0, %c0_i32, %c0_i32_0, %c0_i32_1 : i32, i32, i32, i32
  }
  func.func @transform_1(%arg0: i32, %arg1: i32) -> (i32, i32) {
    %c0_i32 = arith.constant 0 : i32
    %c0_i32_0 = arith.constant 0 : i32
    %c0_i32_1 = arith.constant 0 : i32
    return %c0_i32, %c0_i32_0 : i32, i32
  }
  func.func @transform_2(%arg0: i32, %arg1: i32) -> (i32, i32) {
    %c0_i32 = arith.constant 0 : i32
    %c0_i32_0 = arith.constant 0 : i32
    %c0_i32_1 = arith.constant 0 : i32
    return %c0_i32, %c0_i32_0 : i32, i32
  }
  func.func @transform_3(%arg0: i32, %arg1: i32) -> (i32, i32) {
    %c0_i32 = arith.constant 0 : i32
    %c0_i32_0 = arith.constant 0 : i32
    return %arg1, %c0_i32 : i32, i32
  }
  func.func @transform_4(%arg0: i32, %arg1: i32) -> (i32, i32, i32) {
    %c0_i32 = arith.constant 0 : i32
    %c0_i32_0 = arith.constant 0 : i32
    return %arg0, %arg1, %c0_i32 : i32, i32, i32
  }
}

module attributes {stable_mosaic.version = 11 : i64} {
  func.func @_bottleneck_kernel(%arg0: i32, %arg1: i32, %arg2: memref<1x18x18x4xbf16, #tpu.memory_space<vmem>>, %arg3: memref<36x128xbf16, #tpu.memory_space<vmem>>, %arg4: memref<1x128xf32, #tpu.memory_space<vmem>>, %arg5: memref<256x128xf32, #tpu.memory_space<vmem>>, %arg6: memref<1x256x128xf32, #tpu.memory_space<vmem>>) attributes {dimension_semantics = [#tpu.dimension_semantics<parallel>, #tpu.dimension_semantics<parallel>], iteration_bounds = array<i64: 2, 1>, scalar_prefetch = 0 : i64, scratch_operands = 0 : i64, tpu.core_type = #tpu.core_type<tc>, window_params = [{transform_indices = @transform_0, window_bounds = array<i64: 1, 18, 18, 4>}, {pipeline_mode = #tpu.pipeline_mode<synchronous>, transform_indices = @transform_1, window_bounds = array<i64: 36, 128>}, {pipeline_mode = #tpu.pipeline_mode<synchronous>, transform_indices = @transform_2, window_bounds = array<i64: 1, 128>}, {transform_indices = @transform_3, window_bounds = array<i64: 256, 128>}, {transform_indices = @transform_4, window_bounds = array<i64: 1, 256, 128>}]} {
    %c16_i32 = arith.constant 16 : i32
    %0 = arith.muli %arg1, %c16_i32 : i32
    %1 = tpu.assume_multiple %0, 16 : i32
    %c0 = arith.constant 0 : index
    %2 = arith.index_cast %1 : i32 to index
    %c0_0 = arith.constant 0 : index
    %c0_1 = arith.constant 0 : index
    %3 = vector.load %arg2[%c0, %2, %c0_0, %c0_1] : memref<1x18x18x4xbf16, #tpu.memory_space<vmem>>, vector<1x18x18x4xbf16>
    %4 = vector.shape_cast %3 : vector<1x18x18x4xbf16> to vector<18x18x4xbf16>
    %5 = vector.extract_strided_slice %4 {offsets = [0, 0, 0], sizes = [16, 16, 4], strides = [1, 1, 1]} : vector<18x18x4xbf16> to vector<16x16x4xbf16>
    %6 = vector.extract_strided_slice %4 {offsets = [0, 1, 0], sizes = [16, 16, 4], strides = [1, 1, 1]} : vector<18x18x4xbf16> to vector<16x16x4xbf16>
    %7 = vector.extract_strided_slice %4 {offsets = [0, 2, 0], sizes = [16, 16, 4], strides = [1, 1, 1]} : vector<18x18x4xbf16> to vector<16x16x4xbf16>
    %8 = vector.extract_strided_slice %4 {offsets = [1, 0, 0], sizes = [16, 16, 4], strides = [1, 1, 1]} : vector<18x18x4xbf16> to vector<16x16x4xbf16>
    %9 = vector.extract_strided_slice %4 {offsets = [1, 1, 0], sizes = [16, 16, 4], strides = [1, 1, 1]} : vector<18x18x4xbf16> to vector<16x16x4xbf16>
    %10 = vector.extract_strided_slice %4 {offsets = [1, 2, 0], sizes = [16, 16, 4], strides = [1, 1, 1]} : vector<18x18x4xbf16> to vector<16x16x4xbf16>
    %11 = vector.extract_strided_slice %4 {offsets = [2, 0, 0], sizes = [16, 16, 4], strides = [1, 1, 1]} : vector<18x18x4xbf16> to vector<16x16x4xbf16>
    %12 = vector.extract_strided_slice %4 {offsets = [2, 1, 0], sizes = [16, 16, 4], strides = [1, 1, 1]} : vector<18x18x4xbf16> to vector<16x16x4xbf16>
    %13 = vector.extract_strided_slice %4 {offsets = [2, 2, 0], sizes = [16, 16, 4], strides = [1, 1, 1]} : vector<18x18x4xbf16> to vector<16x16x4xbf16>
    %14 = tpu.concatenate %5, %6, %7, %8, %9, %10, %11, %12, %13 in 2 : vector<16x16x4xbf16>, vector<16x16x4xbf16>, vector<16x16x4xbf16>, vector<16x16x4xbf16>, vector<16x16x4xbf16>, vector<16x16x4xbf16>, vector<16x16x4xbf16>, vector<16x16x4xbf16>, vector<16x16x4xbf16> -> vector<16x16x36xbf16>
    %15 = vector.shape_cast %14 : vector<16x16x36xbf16> to vector<256x36xbf16>
    %c0_2 = arith.constant 0 : index
    %c0_3 = arith.constant 0 : index
    %16 = vector.load %arg3[%c0_2, %c0_3] : memref<36x128xbf16, #tpu.memory_space<vmem>>, vector<36x128xbf16>
    %cst = arith.constant dense<0.000000e+00> : vector<256x128xf32>
    %17 = tpu.matmul %15, %16, %cst {dimension_numbers = #tpu.dot_dimension_numbers<[1], [0], [0], [1], [0, 0, 1, 1], [], []>} : vector<256x36xbf16>, vector<36x128xbf16>, vector<256x128xf32> -> vector<256x128xf32>
    %c0_4 = arith.constant 0 : index
    %c0_5 = arith.constant 0 : index
    %18 = vector.load %arg4[%c0_4, %c0_5] : memref<1x128xf32, #tpu.memory_space<vmem>>, vector<1x128xf32>
    %19 = vector.broadcast %18 : vector<1x128xf32> to vector<256x128xf32>
    %20 = arith.mulf %17, %19 : vector<256x128xf32>
    %c0_6 = arith.constant 0 : index
    %c0_7 = arith.constant 0 : index
    %21 = vector.load %arg5[%c0_6, %c0_7] : memref<256x128xf32, #tpu.memory_space<vmem>>, vector<256x128xf32>
    %22 = arith.addf %20, %21 : vector<256x128xf32>
    %cst_8 = arith.constant 0.000000e+00 : f32
    %23 = vector.broadcast %cst_8 : f32 to vector<256x128xf32>
    %24 = arith.cmpf ogt, %22, %23 : vector<256x128xf32>
    %cst_9 = arith.constant 0.00999999977 : f32
    %25 = vector.broadcast %cst_9 : f32 to vector<256x128xf32>
    %26 = arith.mulf %25, %22 : vector<256x128xf32>
    %27 = arith.select %24, %22, %26 : vector<256x128xi1>, vector<256x128xf32>
    %c0_10 = arith.constant 0 : index
    %c0_11 = arith.constant 0 : index
    %c0_12 = arith.constant 0 : index
    %28 = vector.load %arg6[%c0_10, %c0_11, %c0_12] : memref<1x256x128xf32, #tpu.memory_space<vmem>>, vector<1x256x128xf32>
    %29 = vector.shape_cast %28 : vector<1x256x128xf32> to vector<256x128xf32>
    %30 = vector.shape_cast %27 : vector<256x128xf32> to vector<1x256x128xf32>
    tpu.vector_store %arg6[%c0_10, %c0_11, %c0_12], %30 {strides = array<i32>} : memref<1x256x128xf32, #tpu.memory_space<vmem>>, vector<1x256x128xf32>,
    return
  }
  func.func @transform_0(%arg0: i32, %arg1: i32) -> (i32, i32, i32, i32) {
    %c0_i32 = arith.constant 0 : i32
    %c0_i32_0 = arith.constant 0 : i32
    %c0_i32_1 = arith.constant 0 : i32
    %c0_i32_2 = arith.constant 0 : i32
    return %arg0, %c0_i32, %c0_i32_0, %c0_i32_1 : i32, i32, i32, i32
  }
  func.func @transform_1(%arg0: i32, %arg1: i32) -> (i32, i32) {
    %c0_i32 = arith.constant 0 : i32
    %c0_i32_0 = arith.constant 0 : i32
    %c0_i32_1 = arith.constant 0 : i32
    return %c0_i32, %c0_i32_0 : i32, i32
  }
  func.func @transform_2(%arg0: i32, %arg1: i32) -> (i32, i32) {
    %c0_i32 = arith.constant 0 : i32
    %c0_i32_0 = arith.constant 0 : i32
    %c0_i32_1 = arith.constant 0 : i32
    return %c0_i32, %c0_i32_0 : i32, i32
  }
  func.func @transform_3(%arg0: i32, %arg1: i32) -> (i32, i32) {
    %c0_i32 = arith.constant 0 : i32
    %c0_i32_0 = arith.constant 0 : i32
    return %arg1, %c0_i32 : i32, i32
  }
  func.func @transform_4(%arg0: i32, %arg1: i32) -> (i32, i32, i32) {
    %c0_i32 = arith.constant 0 : i32
    %c0_i32_0 = arith.constant 0 : i32
    return %arg0, %arg1, %c0_i32 : i32, i32, i32
  }
}

</mosaic_0001>

<bundles_post_ra>
// kernel: tpu_custom_call.1
= control target key start
LH: loop header
LB: loop body
LE: loop exit
PB: predicated region body
PF: predicated region fallthrough
CT: control target
= control target key end

     0   :  { %9 = vsyncpa [#allocation3], 0  ;;  %s3094_s0 = inlined_call_operand.vmem [shape: bf16[2,18,18,4], index: 0, kind: input, shape index: {}]   ;;  %s3095_s1 = inlined_call_operand.vmem [shape: bf16[36,128], index: 1, kind: input, shape index: {}]   ;;  %s3096_s2 = inlined_call_operand.vmem [shape: f32[1,128], index: 2, kind: input, shape index: {}]   ;;  %s3097_s3 = inlined_call_operand.vmem [shape: f32[256,128], index: 3, kind: input, shape index: {}]   ;;  %s3098_s4 = inlined_call_operand.hbm [shape: f32[2,256,128], index: 4, kind: output, shape index: {}]  }
   0x1   :  { %11 = vsyncpa [#allocation3 + $0x1], 0  ;;  %s2140_s15 = smov 0   ;;  %s2142_s16 = smov 0  }
   0x2   :  { %s2144_s17 = smov 0   ;;  %s2146_s18 = smov 0  }
   0x3   :  { %s2148_s19 = smov 0   ;;  %s2150_s20 = smov 0  }
   0x4 LB: > { %s1786_s21 = sadd.s32 4294967295, %s2103_s20   ;;  %s1787_s22 = sadd.s32 4294967294, %s2103_s20   ;;  %s2103_s20 = sphi %s2150_s20, %s17_s20   ;;  %s2099_s19 = sphi %s2148_s19, %s3105_s19   ;;  %s2095_s18 = sphi %s2146_s18, %s3104_s18   ;;  %s2091_s17 = sphi %s2144_s17, %s3103_s17   ;;  %s2087_s16 = sphi %s2142_s16, %s3102_s16   ;;  %s2083_s15 = sphi %s2140_s15, %s3101_s15  }
   0x5   : > { %s29_s23 = sadd.s32 1, %s2099_s19  ;;  %s132_s24 = sadd.s32 1, %s2091_s17 }
   0x6   : > { %p31_p0 = scmp.ge.s32.totalorder %s29_s23, 2  ;;  %p142_p1 = scmp.ne.s32.totalorder %s2091_s17, %s2087_s16 }
   0x7   : > { %p143_p2 = scmp.eq.s32.totalorder %s1786_s21, 1  ;;  %p148_p3 = scmp.ne.s32.totalorder %s2087_s16, %s2083_s15 }
   0x8   : > { %s3107_s23 = smov (%p31_p0, %s29_s23), 0  ;;  %p149_p5 = scmp.eq.s32.totalorder %s1787_s22, 1 }
   0x9   : > { %p2180_p4 = por %p143_p2, %p142_p1  ;;  %s127_s26 = ssub.s32 %s2099_s19, %s3107_s23 }
   0xa   : > { %p1790_p6 = scmp.ge.s32.totalorder %s2103_s20, 1  ;;  %p130_p7 = scmp.eq.s32.totalorder %s127_s26, 0 }
   0xb   : > { %p2187_p8 = por %p149_p5, %p148_p3  ;;  %p190_p9 = scmp.lt.s32.totalorder %s2103_s20, 3 }
   0xc   : > { %s2193_s28 = scalar_select %p130_p7, %s2091_s17, %s132_s24  }
   0xd   : > { %p191_p10 = pnand %p1790_p6, %p190_p9 }
   0xe   : > { %p221_p11 = scmp.lt.s32.totalorder (!%p191_p10), %s2095_s18, 1  ;;  %vm645_vm0 = vcmask (!%p191_p10), 1046528   ;;  %s2105_s8 = smov (!%p191_p10), 12   ;;  %vm420_vm1 = vsmask.f32 (!%p191_p10), 7424  ;;  %vm1281_vm2 = vcmask (!%p191_p10), 1041408  }
   0xf   : > { %194 = sbr.rel (%p191_p10) target bundleno = 638 (0x27e), region = 36  ;;  %s2106_s9 = smov (!%p191_p10), 8   ;;  %vm964_vm3 = vcmask (!%p191_p10), 31744   ;;  %vm997_vm4 = vcmask (!%p191_p10), 64512   ;;  %vm1063_vm5 = vcmask (!%p191_p10), 130048   ;;  %vm1030_vm6 = vcmask (!%p191_p10), 97280  }
  0x10   : > { %s2107_s10 = smov (!%p191_p10), 4   ;;  %s2108_s11 = smov (!%p191_p10), 16   ;;  %vm1096_vm7 = vcmask (!%p191_p10), 162816   ;;  %vm1129_vm8 = vcmask (!%p191_p10), 195584   ;;  %vm1162_vm9 = vcmask (!%p191_p10), 228352   ;;  %vm1195_vm10 = vcmask (!%p191_p10), 261120  }
  0x11   : > { %s2109_s12 = smov (!%p191_p10), 20   ;;  %s2110_s13 = smov (!%p191_p10), 24   ;;  %vm1248_vm11 = vcmask (!%p191_p10), 293888  }
  0x12   : > { %s2111_s26 = smov (!%p191_p10), 28   ;;  %s2112_s5 = smov (!%p191_p10), 32  }
  0x13   : > { %s2113_s22 = smov (!%p191_p10), [#allocation2]  }
  0x14   : > { %s2029_s24 = sshll.u32 (!%p191_p10), %s2113_s22, 4  ;;  %s2030_s24 = int_to_ptr.vmem [resolvable:$false] %s2029_s24 }
  0x16   : > { %s222_s29 = scalar_select %p221_p11, %s2095_s18, 1 }
  0x18   : > { %s1920_s30 = smul.u32 216, %s222_s29 }
  0x1a   : > { %s2200_s7 = scalar_lea.vmem %s3094_s0, %s1920_s30 }
  0x1b   : > { %v2203_v0 = vld [vmem:[%s2200_s7 + $0x6c] sm:$0xff]   ;;  %v2213_v2 = vld [vmem:[%s2200_s7 + $0x60] sm:$0xff]   ;;  %v1988_v3 = vld [vmem:[%s2200_s7 + $0x68] ss:$0 sps:$4 sm:$0x11]  }
  0x1c   : > { %v2206_v1 = vld [vmem:[%s2200_s7 + $0xc] sm:$0xff]   ;;  %747 = vrot.lane.b32.xlu1 %v2203_v0, %s2105_s8  ;;  %v2217_v4 = vld [vmem:[%s2200_s7] sm:$0xff]   ;;  %v673_v5 = vrot.slane %v2203_v0, 1  ;;  %v670_v6 = vrot.slane %v2213_v2, 1  ;;  %v671_v7 = vrot.slane %v1988_v3, 1  ;;  %v530_v26 = vshrl.u32 %v2203_v0, 16 }
  0x1d   : > { %731 = vrot.lane.b32.xlu0 %v2206_v1, %s2105_s8  ;;  %v1990_v8 = vld [vmem:[%s2200_s7 + $0x8] ss:$0 sps:$4 sm:$0x11]   ;;  %v649_v9 = vrot.slane %v2206_v1, 1  ;;  %v646_v10 = vrot.slane %v2217_v4, 1  ;;  %v434_v16 = vshrl.u32 %v2206_v1, 16 }
  0x1e   : > { %v1991_v11 = vld [vmem:[%s2200_s7 + $0x74] ss:$0 sps:$4 sm:$0x11]   ;;  %v2226_v12 = vsel %vm645_vm0, %v670_v6, %v671_v7  ;;  %v647_v13 = vrot.slane %v1990_v8, 1  ;;  %v436_v17 = vshll.u32 %v2206_v1, 16  ;;  %v422_v18 = vshrl.u32 %v2217_v4, 16 }
  0x1f   : > { %v1992_v14 = vld [vmem:[%s2200_s7 + $0x14] ss:$0 sps:$4 sm:$0x11]   ;;  %v674_v15 = vrot.slane %v1991_v11, 1  ;;  %v424_v22 = vshll.u32 %v2217_v4, 16  ;;  %v429_v25 = vshll.u32 %v1990_v8, 16 }
  0x20   : > { %710 = vrot.lane.b32.xlu1 %v2226_v12, %s2106_s9  ;;  %v648_v19 = vsel %vm645_vm0, %v646_v10, %v647_v13  ;;  %v650_v20 = vrot.slane %v1992_v14, 1  ;;  %v441_v21 = vshll.u32 %v1992_v14, 16  ;;  %v438_v24 = vrot.slane %v436_v17, 1  ;;  %v2248_v39 = vld [vmem:[%s2200_s7 + $0x78] sm:$0xff]   ;;  %v2296_v10 = vld [vmem:[%s2200_s7 + $0x84] sm:$0xff]  }
  0x21   : > { %694 = vrot.lane.b32.xlu0 %v648_v19, %s2106_s9  ;;  %v2238_v23 = vsel %vm645_vm0, %v673_v5, %v674_v15  ;;  %v426_v29 = vrot.slane %v424_v22, 1  ;;  %v532_v30 = vshll.u32 %v2203_v0, 16  ;;  %v431_v32 = vrot.slane %v429_v25, 1  ;;  %v2254_v46 = vld [vmem:[%s2200_s7 + $0x18] sm:$0xff]   ;;  %v2306_v14 = vld [vmem:[%s2200_s7 + $0x24] sm:$0xff]  }
  0x22   : > { %v651_v27 = vsel %vm645_vm0, %v649_v9, %v650_v20  ;;  %v443_v28 = vrot.slane %v441_v21, 1  ;;  %v439_v31 = vor.u32 %v438_v24, %v434_v16  ;;  %v537_v33 = vshll.u32 %v1991_v11, 16  ;;  %v1995_v47 = vld [vmem:[%s2200_s7 + $0x80] ss:$0 sps:$4 sm:$0x11]  }
  0x23   : > { %v518_v34 = vshrl.u32 %v2213_v2, 16  ;;  %v427_v35 = vor.u32 %v426_v29, %v422_v18  ;;  %v534_v36 = vrot.slane %v532_v30, 1  ;;  %v520_v37 = vshll.u32 %v2213_v2, 16  ;;  %v1996_v52 = vld [vmem:[%s2200_s7 + $0x20] ss:$0 sps:$4 sm:$0x11]  }
  0x24   : > { %712 = vrot.lane.b32.xlu1 %v2238_v23, %s2106_s9  ;;  %v525_v38 = vshll.u32 %v1988_v3, 16  ;;  %v444_v40 = vsel %vm420_vm1, %v439_v31, %v443_v28  ;;  %v539_v41 = vrot.slane %v537_v33, 1  ;;  %v544_v50 = vshll.u32 %v2248_v39, 16  ;;  %v1999_v15 = vld [vmem:[%s2200_s7 + $0x8c] ss:$0 sps:$4 sm:$0x11]  }
  0x25   : > { %696 = vrot.lane.b32.xlu0 %v651_v27, %s2106_s9  ;;  %v432_v42 = vsel %vm420_vm1, %v427_v35, %v431_v32  ;;  %v535_v43 = vor.u32 %v534_v36, %v530_v26  ;;  %v522_v44 = vrot.slane %v520_v37, 1  ;;  %v448_v53 = vshll.u32 %v2254_v46, 16  ;;  %v2000_v18 = vld [vmem:[%s2200_s7 + $0x2c] ss:$0 sps:$4 sm:$0x11]   ;;  %v2013_v22 = vld [vmem:[%s3095_s1] sm:$0xff]  }
  0x26   : > { %v527_v45 = vrot.slane %v525_v38, 1  ;;  %v542_v54 = vshrl.u32 %v2248_v39, 16  ;;  %v546_v55 = vrot.slane %v544_v50, 1  ;;  %v549_v56 = vshll.u32 %v1995_v47, 16  ;;  %1874 = vmatprep.subr.bf16.mxu0 %v2013_v22  ;;  %1912 = vmatprep.subr.bf16.mxu1 %v2013_v22 }
  0x27   : > { %v2259_v48 = vsel %vm420_vm1, %v535_v43, %v539_v41  ;;  %v523_v49 = vor.u32 %v522_v44, %v518_v34  ;;  %v446_v57 = vshrl.u32 %v2254_v46, 16  ;;  %v450_v58 = vrot.slane %v448_v53, 1  ;;  %1875 = vmatpush3.bf16.msra.mxu0 %v2013_v22  ;;  %1915 = vmatpush3.bf16.msra.mxu1 %v2013_v22  ;;  %v2017_v32 = vld [vmem:[%s3095_s1 + $0x10] ss:$0 sps:$4 sm:$0x33]  }
  0x28   : > { %615 = vrot.lane.b32.xlu1 %v444_v40, %s2107_s10  ;;  %v453_v59 = vshll.u32 %v1996_v52, 16  ;;  %v547_v60 = vor.u32 %v546_v55, %v542_v54  ;;  %v551_v61 = vrot.slane %v549_v56, 1  ;;  %v676_v6 = vrot.slane %v2248_v39, 1  ;;  %v2362_v43 = vld [vmem:[%s2200_s7 + $0x90] sm:$0xff]  }
  0x29   : > { %613 = vrot.lane.b32.xlu0 %v432_v42, %s2107_s10  ;;  %v2264_v51 = vsel %vm420_vm1, %v523_v49, %v527_v45  ;;  %v451_v62 = vor.u32 %v450_v58, %v446_v57  ;;  %v677_v7 = vrot.slane %v1995_v47, 1  ;;  %v652_v8 = vrot.slane %v2254_v46, 1  ;;  %v2367_v44 = vld [vmem:[%s2200_s7 + $0x30] sm:$0xff]   ;;  %v2003_v45 = vld [vmem:[%s2200_s7 + $0x98] ss:$0 sps:$4 sm:$0x11]  }
  0x2a   : > { %v455_v63 = vrot.slane %v453_v59, 1  ;;  %v2281_v3 = vsel %vm420_vm1, %v547_v60, %v551_v61  ;;  %v653_v9 = vrot.slane %v1996_v52, 1  ;;  %v556_v16 = vshll.u32 %v2296_v10, 16  ;;  %v2004_v49 = vld [vmem:[%s2200_s7 + $0x38] ss:$0 sps:$4 sm:$0x11]  }
  0x2b   : > { %v2299_v11 = vsel %vm645_vm0, %v676_v6, %v677_v7  ;;  %v554_v17 = vshrl.u32 %v2296_v10, 16  ;;  %v561_v19 = vshll.u32 %v1999_v15, 16  ;;  %v460_v20 = vshll.u32 %v2306_v14, 16 }
  0x2c   : > { %631 = vrot.lane.b32.xlu1 %v2259_v48, %s2107_s10  ;;  %v2285_v5 = vsel %vm420_vm1, %v451_v62, %v455_v63  ;;  %v2303_v13 = vsel %vm645_vm0, %v652_v8, %v653_v9  ;;  %v558_v21 = vrot.slane %v556_v16, 1  ;;  %v458_v24 = vshrl.u32 %v2306_v14, 16  ;;  %v2396_v9 = vld [vmem:[%s2200_s7 + $0x9c] sm:$0xff]  }
  0x2d   : > { %629 = vrot.lane.b32.xlu0 %v2264_v51, %s2107_s10  ;;  %v462_v25 = vrot.slane %v460_v20, 1  ;;  %v465_v26 = vshll.u32 %v2000_v18, 16  ;;  %v563_v29 = vrot.slane %v561_v19, 1  ;;  %v1283_v34 = vsel %vm1281_vm2, %v2017_v32, 0 }
  0x2e   : > { %v559_v28 = vor.u32 %v558_v21, %v554_v17  ;;  %v679_v36 = vrot.slane %v2296_v10, 1  ;;  %v680_v37 = vrot.slane %v1999_v15, 1  ;;  %v655_v38 = vrot.slane %v2306_v14, 1  ;;  %v2007_v15 = vld [vmem:[%s2200_s7 + $0xa4] ss:$0 sps:$4 sm:$0x11]  }
  0x2f   : > { %v463_v30 = vor.u32 %v462_v25, %v458_v24  ;;  %v467_v31 = vrot.slane %v465_v26, 1  ;;  %v568_v47 = vshll.u32 %v2362_v43, 16  ;;  %v472_v50 = vshll.u32 %v2367_v44, 16  ;;  %v2008_v17 = vld [vmem:[%s2200_s7 + $0x44] ss:$0 sps:$4 sm:$0x11]  }
  0x30   : > { %749 = vrot.lane.b32.xlu1 %v2248_v39, %s2105_s8  ;;  %v564_v33 = vsel %vm420_vm1, %v559_v28, %v563_v29  ;;  %v681_v41 = vsel %vm645_vm0, %v679_v36, %v680_v37  ;;  %v566_v52 = vshrl.u32 %v2362_v43, 16  ;;  %v573_v54 = vshll.u32 %v2003_v45, 16 }
  0x31   : > { %733 = vrot.lane.b32.xlu0 %v2254_v46, %s2105_s8  ;;  %v468_v35 = vsel %vm420_vm1, %v463_v30, %v467_v31  ;;  %v570_v53 = vrot.slane %v568_v47, 1  ;;  %v470_v55 = vshrl.u32 %v2367_v44, 16  ;;  %v474_v56 = vrot.slane %v472_v50, 1 }
  0x32   : > { %v477_v57 = vshll.u32 %v2004_v49, 16  ;;  %v575_v59 = vrot.slane %v573_v54, 1  ;;  %v658_v6 = vrot.slane %v2367_v44, 1  ;;  %v659_v7 = vrot.slane %v2004_v49, 1 }
  0x33   : > { %v571_v58 = vor.u32 %v570_v53, %v566_v52  ;;  %v475_v60 = vor.u32 %v474_v56, %v470_v55  ;;  %v580_v16 = vshll.u32 %v2396_v9, 16  ;;  %v578_v19 = vshrl.u32 %v2396_v9, 16  ;;  %v2462_v56 = vld [vmem:[%s2200_s7 + $0xa8] sm:$0xff]  }
  0x34   : > { %794 = vrot.lane.b32.xlu1 %v2259_v48, %s2108_s11  ;;  %v479_v61 = vrot.slane %v477_v57, 1  ;;  %v585_v21 = vshll.u32 %v2007_v15, 16  ;;  %v489_v25 = vshll.u32 %v2008_v17, 16  ;;  %v685_v36 = vrot.slane %v2396_v9, 1 }
  0x35   : > { %778 = vrot.lane.b32.xlu0 %v444_v40, %s2108_s11  ;;  %v656_v40 = vrot.slane %v2000_v18, 1  ;;  %v576_v62 = vsel %vm420_vm1, %v571_v58, %v575_v59  ;;  %v582_v20 = vrot.slane %v580_v16, 1  ;;  %v686_v37 = vrot.slane %v2007_v15, 1  ;;  %v2468_v58 = vld [vmem:[%s2200_s7 + $0x48] sm:$0xff]  }
  0x36   : > { %v480_v63 = vsel %vm420_vm1, %v475_v60, %v479_v61  ;;  %v491_v29 = vrot.slane %v489_v25, 1  ;;  %v2011_v60 = vld [vmem:[%s2200_s7 + $0xb0] ss:$0 sps:$4 sm:$0x11]   ;;  %v592_v61 = vshll.u32 %v2462_v56, 16  ;;  %v494_v15 = vshrl.u32 %v2468_v58, 16 }
  0x37   : > { %v657_v42 = vsel %vm645_vm0, %v655_v38, %v656_v40  ;;  %v583_v26 = vor.u32 %v582_v20, %v578_v19 }
  0x38   : > { %796 = vrot.lane.b32.xlu1 %v2281_v3, %s2108_s11 }
  0x39   : > { %780 = vrot.lane.b32.xlu0 %v2285_v5, %s2108_s11 }
  0x3c   : > { %829 = vrot.lane.b32.xlu1 %v2238_v23, %s2109_s12 }
  0x3d   : > { %813 = vrot.lane.b32.xlu0 %v651_v27, %s2109_s12  ;;  %v2014_v27 = vld [vmem:[%s3095_s1 + $0x8] sm:$0xff]  }
  0x3e   : > { %1876 = vmatprep.subr.bf16.mxu0 %v2014_v27  ;;  %1913 = vmatprep.subr.bf16.mxu1 %v2014_v27 }
  0x3f   : > { %1877 = vmatpush3.bf16.msra.mxu0 %v2014_v27  ;;  %1916 = vmatpush3.bf16.msra.mxu1 %v2014_v27  ;;  %v587_v27 = vrot.slane %v585_v21, 1 }
  0x40   : > { %831 = vrot.lane.b32.xlu1 %v2299_v11, %s2109_s12  ;;  %1918 = vmatprep.subr.msk.bf16.mxu0 %vm1281_vm2, %v2017_v32 }
  0x41   : > { %815 = vrot.lane.b32.xlu0 %v2303_v13, %s2109_s12  ;;  %1919 = vmatprep.subr.msk.bf16.mxu1 %vm1281_vm2, %v2017_v32  ;;  %v588_v31 = vsel %vm420_vm1, %v583_v26, %v587_v27 }
  0x43   : > { %1879 = vmatpush3.bf16.msra.mxu0 %v1283_v34  ;;  %1917 = vmatpush3.bf16.msra.mxu1 %v1283_v34 }
  0x44   : > { %866 = vrot.lane.b32.xlu1 %v2248_v39, %s2110_s13 }
  0x45   : > { %850 = vrot.lane.b32.xlu0 %v2254_v46, %s2110_s13 }
  0x48   : > { %868 = vrot.lane.b32.xlu1 %v2296_v10, %s2110_s13 }
  0x49   : > { %852 = vrot.lane.b32.xlu0 %v2306_v14, %s2110_s13 }
  0x4c   : > { %913 = vrot.lane.b32.xlu1 %v2281_v3, %s2111_s26 }
  0x4d   : > { %897 = vrot.lane.b32.xlu0 %v2285_v5, %s2111_s26 }
  0x50   : > { %915 = vrot.lane.b32.xlu1 %v564_v33, %s2111_s26 }
  0x51   : > { %899 = vrot.lane.b32.xlu0 %v468_v35, %s2111_s26 }
  0x54   : > { %948 = vrot.lane.b32.xlu1 %v2299_v11, %s2112_s5 }
  0x55   : > { %932 = vrot.lane.b32.xlu0 %v2303_v13, %s2112_s5 }
  0x58   : > { %633 = vrot.lane.b32.xlu1 %v2281_v3, %s2107_s10  ;;  %v682_v3 = vrot.slane %v2362_v43, 1 }
  0x59   : > { %617 = vrot.lane.b32.xlu0 %v2285_v5, %s2107_s10  ;;  %v683_v5 = vrot.slane %v2003_v45, 1  ;;  %v687_v45 = vsel %vm645_vm0, %v685_v36, %v686_v37  ;;  %v688_v36 = vrot.slane %v2462_v56, 1  ;;  %v689_v37 = vrot.slane %v2011_v60, 1 }
  0x5b   : > { %v684_v8 = vsel %vm645_vm0, %v682_v3, %v683_v5  ;;  %v496_v3 = vshll.u32 %v2468_v58, 16 }
  0x5c   : > { %950 = vrot.lane.b32.xlu1 %v681_v41, %s2112_s5 }
  0x5d   : > { %934 = vrot.lane.b32.xlu0 %v657_v42, %s2112_s5  ;;  %v498_v16 = vrot.slane %v496_v3, 1  ;;  %v2524_v3 = vld [vmem:[%s2200_s7 + $0xb4] sm:$0xff]  }
  0x60   : > { %635 = vrot.lane.b32.xlu1 %v564_v33, %s2107_s10 }
  0x61   : > { %619 = vrot.lane.b32.xlu0 %v468_v35, %s2107_s10 }
  0x64   : > { %714 = vrot.lane.b32.xlu1 %v2299_v11, %s2106_s9  ;;  %v660_v11 = vsel %vm645_vm0, %v658_v6, %v659_v7  ;;  %v590_v6 = vshrl.u32 %v2462_v56, 16  ;;  %v594_v7 = vrot.slane %v592_v61, 1 }
  0x65   : > { %698 = vrot.lane.b32.xlu0 %v2303_v13, %s2106_s9  ;;  %v2401_v13 = vld [vmem:[%s2200_s7 + $0x3c] sm:$0xff]  }
  0x66   : > { %v484_v18 = vshll.u32 %v2401_v13, 16  ;;  %v482_v22 = vshrl.u32 %v2401_v13, 16  ;;  %v661_v40 = vrot.slane %v2401_v13, 1  ;;  %v595_v19 = vor.u32 %v594_v7, %v590_v6 }
  0x68   : > { %716 = vrot.lane.b32.xlu1 %v681_v41, %s2106_s9  ;;  %v486_v24 = vrot.slane %v484_v18, 1 }
  0x69   : > { %700 = vrot.lane.b32.xlu0 %v657_v42, %s2106_s9 }
  0x6a   : > { %v487_v28 = vor.u32 %v486_v24, %v482_v22  ;;  %v499_v22 = vor.u32 %v498_v16, %v494_v15 }
  0x6c   : > { %751 = vrot.lane.b32.xlu1 %v2296_v10, %s2105_s8 }
  0x6d   : > { %735 = vrot.lane.b32.xlu0 %v2306_v14, %s2105_s8 }
  0x70   : > { %753 = vrot.lane.b32.xlu1 %v2362_v43, %s2105_s8 }
  0x71   : > { %737 = vrot.lane.b32.xlu0 %v2367_v44, %s2105_s8 }
  0x74   : > { %798 = vrot.lane.b32.xlu1 %v564_v33, %s2108_s11  ;;  %v492_v33 = vsel %vm420_vm1, %v487_v28, %v491_v29 }
  0x75   : > { %782 = vrot.lane.b32.xlu0 %v468_v35, %s2108_s11 }
  0x78   : > { %800 = vrot.lane.b32.xlu1 %v576_v62, %s2108_s11 }
  0x79   : > { %784 = vrot.lane.b32.xlu0 %v480_v63, %s2108_s11 }
  0x7c   : > { %833 = vrot.lane.b32.xlu1 %v681_v41, %s2109_s12  ;;  %v662_v41 = vrot.slane %v2008_v17, 1 }
  0x7d   : > { %817 = vrot.lane.b32.xlu0 %v657_v42, %s2109_s12 }
  0x7e   : > { %v2447_v49 = vsel %vm645_vm0, %v661_v40, %v662_v41 }
  0x80   : > { %835 = vrot.lane.b32.xlu1 %v684_v8, %s2109_s12 }
  0x81   : > { %819 = vrot.lane.b32.xlu0 %v660_v11, %s2109_s12 }
  0x84   : > { %870 = vrot.lane.b32.xlu1 %v2362_v43, %s2110_s13 }
  0x85   : > { %854 = vrot.lane.b32.xlu0 %v2367_v44, %s2110_s13 }
  0x88   : > { %872 = vrot.lane.b32.xlu1 %v2396_v9, %s2110_s13 }
  0x89   : > { %856 = vrot.lane.b32.xlu0 %v2401_v13, %s2110_s13 }
  0x8c   : > { %917 = vrot.lane.b32.xlu1 %v576_v62, %s2111_s26 }
  0x8d   : > { %901 = vrot.lane.b32.xlu0 %v480_v63, %s2111_s26 }
  0x8e   : > { %v2420_v30 = vpop.permute.xlu1 %747 }
  0x8f   : > { %v2424_v32 = vpop.permute.xlu0 %731 }
  0x90   : > { %919 = vrot.lane.b32.xlu1 %v588_v31, %s2111_s26 }
  0x91   : > { %903 = vrot.lane.b32.xlu0 %v492_v33, %s2111_s26 }
  0x92   : > { %v2429_v34 = vpop.permute.xlu1 %710 }
  0x93   : > { %v2431_v35 = vpop.permute.xlu0 %694 }
  0x94   : > { %952 = vrot.lane.b32.xlu1 %v684_v8, %s2112_s5 }
  0x95   : > { %936 = vrot.lane.b32.xlu0 %v660_v11, %s2112_s5 }
  0x96   : > { %v2436_v38 = vpop.permute.xlu1 %712 }
  0x97   : > { %v2439_v42 = vpop.permute.xlu0 %696 }
  0x98   : > { %637 = vrot.lane.b32.xlu1 %v576_v62, %s2107_s10 }
  0x99   : > { %621 = vrot.lane.b32.xlu0 %v480_v63, %s2107_s10  ;;  %v2012_v63 = vld [vmem:[%s2200_s7 + $0x50] ss:$0 sps:$4 sm:$0x11]  }
  0x9a   : > { %v2444_v47 = vpop.permute.xlu1 %615  ;;  %v501_v17 = vshll.u32 %v2012_v63, 16  ;;  %v665_v40 = vrot.slane %v2012_v63, 1 }
  0x9b   : > { %v614_v50 = vpop.permute.xlu0 %613 }
  0x9c   : > { %954 = vrot.lane.b32.xlu1 %v687_v45, %s2112_s5  ;;  %v503_v24 = vrot.slane %v501_v17, 1  ;;  %v966_v6 = vsel %vm964_vm3, %v2217_v4, %v614_v50 }
  0x9d   : > { %938 = vrot.lane.b32.xlu0 %v2447_v49, %s2112_s5  ;;  %v999_v4 = vsel %vm997_vm4, %v966_v6, %v2431_v35  ;;  %v2553_v35 = vld [vmem:[%s2200_s7 + $0x5c] ss:$0 sps:$4 sm:$0x11]  }
  0x9e   : > { %v2452_v52 = vpop.permute.xlu1 %631  ;;  %v2505_v28 = vsel %vm420_vm1, %v499_v22, %v503_v24  ;;  %v602_v22 = vshrl.u32 %v2524_v3, 16 }
  0x9f   : > { %v630_v53 = vpop.permute.xlu0 %629 }
  0xa0   : > { %639 = vrot.lane.b32.xlu1 %v588_v31, %s2107_s10  ;;  %v982_v41 = vsel %vm964_vm3, %v2213_v2, %v630_v53 }
  0xa1   : > { %623 = vrot.lane.b32.xlu0 %v492_v33, %s2107_s10  ;;  %v1015_v53 = vsel %vm997_vm4, %v982_v41, %v2429_v34  ;;  %v604_v34 = vshll.u32 %v2524_v3, 16 }
  0xa2   : > { %v2456_v54 = vpop.permute.xlu1 %749  ;;  %v1048_v50 = vsel %vm1030_vm6, %v1015_v53, %v2420_v30  ;;  %v513_v53 = vshll.u32 %v2553_v35, 16 }
  0xa3   : > { %v2458_v55 = vpop.permute.xlu0 %733 }
  0xa4   : > { %718 = vrot.lane.b32.xlu1 %v684_v8, %s2106_s9  ;;  %v597_v8 = vshll.u32 %v2011_v60, 16  ;;  %v2521_v60 = vsel %vm645_vm0, %v688_v36, %v689_v37  ;;  %v606_v36 = vrot.slane %v604_v34, 1 }
  0xa5   : > { %702 = vrot.lane.b32.xlu0 %v660_v11, %s2106_s9 }
  0xa6   : > { %v2465_v57 = vpop.permute.xlu1 %794  ;;  %v599_v20 = vrot.slane %v597_v8, 1 }
  0xa7   : > { %v2470_v59 = vpop.permute.xlu0 %778  ;;  %v1081_v16 = vsel %vm1063_vm5, %v1048_v50, %v2465_v57 }
  0xa8   : > { %720 = vrot.lane.b32.xlu1 %v687_v45, %s2106_s9  ;;  %v2501_v26 = vsel %vm420_vm1, %v595_v19, %v599_v20  ;;  %v1032_v19 = vsel %vm1030_vm6, %v999_v4, %v2424_v32  ;;  %v984_v32 = vsel %vm964_vm3, %v2203_v0, %v2452_v52  ;;  %v968_v0 = vsel %vm964_vm3, %v2206_v1, %v2444_v47 }
  0xa9   : > { %704 = vrot.lane.b32.xlu0 %v2447_v49, %s2106_s9  ;;  %v1065_v57 = vsel %vm1063_vm5, %v1032_v19, %v2470_v59  ;;  %v607_v4 = vor.u32 %v606_v36, %v602_v22  ;;  %v1001_v47 = vsel %vm997_vm4, %v968_v0, %v2439_v42 }
  0xaa   : > { %v2477_v62 = vpop.permute.xlu1 %796 }
  0xab   : > { %v2481_v5 = vpop.permute.xlu0 %780 }
  0xac   : > { %755 = vrot.lane.b32.xlu1 %v2396_v9, %s2105_s8 }
  0xad   : > { %739 = vrot.lane.b32.xlu0 %v2401_v13, %s2105_s8 }
  0xae   : > { %v830_v11 = vpop.permute.xlu1 %829 }
  0xaf   : > { %v2489_v18 = vpop.permute.xlu0 %813  ;;  %v1114_v20 = vsel %vm1096_vm7, %v1081_v16, %v830_v11  ;;  %v515_v16 = vrot.slane %v513_v53, 1  ;;  %v2020_v53 = vld [vmem:[%s2200_s7 + $0xc0] sm:$0xff]  }
  0xb0   : > { %757 = vrot.lane.b32.xlu1 %v2462_v56, %s2105_s8  ;;  %v1098_v11 = vsel %vm1096_vm7, %v1065_v57, %v2489_v18 }
  0xb1   : > { %741 = vrot.lane.b32.xlu0 %v2468_v58, %s2105_s8 }
  0xb2   : > { %v2495_v21 = vpop.permute.xlu1 %831 }
  0xb3   : > { %v2497_v25 = vpop.permute.xlu0 %815 }
  0xb4   : > { %802 = vrot.lane.b32.xlu1 %v588_v31, %s2108_s11 }
  0xb5   : > { %786 = vrot.lane.b32.xlu0 %v492_v33, %s2108_s11  ;;  %v664_v33 = vrot.slane %v2468_v58, 1 }
  0xb6   : > { %v867_v27 = vpop.permute.xlu1 %866 }
  0xb7   : > { %v851_v29 = vpop.permute.xlu0 %850  ;;  %v2533_v7 = vsel %vm645_vm0, %v664_v33, %v665_v40  ;;  %v1147_v24 = vsel %vm1129_vm8, %v1114_v20, %v867_v27 }
  0xb8   : > { %804 = vrot.lane.b32.xlu1 %v2501_v26, %s2108_s11  ;;  %v1131_v27 = vsel %vm1129_vm8, %v1098_v11, %v851_v29  ;;  %v1017_v29 = vsel %vm997_vm4, %v984_v32, %v2436_v38 }
  0xb9   : > { %788 = vrot.lane.b32.xlu0 %v2505_v28, %s2108_s11  ;;  %v1050_v50 = vsel %vm1030_vm6, %v1017_v29, %v2456_v54  ;;  %v769_v29 = vshll.u32 %v2020_v53, 16 }
  0xba   : > { %v2512_v31 = vpop.permute.xlu1 %868  ;;  %v1083_v38 = vsel %vm1063_vm5, %v1050_v50, %v2477_v62 }
  0xbb   : > { %v2517_v61 = vpop.permute.xlu0 %852  ;;  %v1116_v54 = vsel %vm1096_vm7, %v1083_v38, %v2495_v21 }
  0xbc   : > { %837 = vrot.lane.b32.xlu1 %v687_v45, %s2109_s12  ;;  %v2536_v45 = vld [vmem:[%s2200_s7 + $0x54] sm:$0xff]   ;;  %v1149_v42 = vsel %vm1129_vm8, %v1116_v54, %v2512_v31 }
  0xbd   : > { %821 = vrot.lane.b32.xlu0 %v2447_v49, %s2109_s12  ;;  %v2543_v49 = vld [vmem:[%s2200_s7 + $0xbc] ss:$0 sps:$4 sm:$0x11]   ;;  %v508_v17 = vshll.u32 %v2536_v45, 16  ;;  %v506_v59 = vshrl.u32 %v2536_v45, 16  ;;  %v667_v11 = vrot.slane %v2536_v45, 1 }
  0xbe   : > { %v914_v63 = vpop.permute.xlu1 %913  ;;  %v609_v37 = vshll.u32 %v2543_v49, 16 }
  0xbf   : > { %v898_v8 = vpop.permute.xlu0 %897  ;;  %v1180_v33 = vsel %vm1162_vm9, %v1147_v24, %v914_v63  ;;  %v510_v6 = vrot.slane %v508_v17, 1  ;;  %v1034_v17 = vsel %vm1030_vm6, %v1001_v47, %v2458_v55 }
  0xc0   : > { %839 = vrot.lane.b32.xlu1 %v2521_v60, %s2109_s12  ;;  %v1164_v52 = vsel %vm1162_vm9, %v1131_v27, %v898_v8  ;;  %v611_v34 = vrot.slane %v609_v37, 1  ;;  %v1067_v20 = vsel %vm1063_vm5, %v1034_v17, %v2481_v5  ;;  %v692_v37 = vrot.slane %v2543_v49, 1 }
  0xc1   : > { %823 = vrot.lane.b32.xlu0 %v2533_v7, %s2109_s12  ;;  %v511_v8 = vor.u32 %v510_v6, %v506_v59  ;;  %v1100_v22 = vsel %vm1096_vm7, %v1067_v20, %v2497_v25 }
  0xc2   : > { %v916_v15 = vpop.permute.xlu1 %915  ;;  %v612_v62 = vsel %vm420_vm1, %v607_v4, %v611_v34  ;;  %v1133_v57 = vsel %vm1129_vm8, %v1100_v22, %v2517_v61  ;;  %v771_v34 = vrot.slane %v769_v29, 1  ;;  %v810_v22 = vrot.slane %v2020_v53, 1 }
  0xc3   : > { %v900_v30 = vpop.permute.xlu0 %899  ;;  %v1182_v55 = vsel %vm1162_vm9, %v1149_v42, %v916_v15  ;;  %v516_v5 = vsel %vm420_vm1, %v511_v8, %v515_v16 }
  0xc4   : > { %874 = vrot.lane.b32.xlu1 %v2462_v56, %s2110_s13  ;;  %v1166_v31 = vsel %vm1162_vm9, %v1133_v57, %v900_v30  ;;  %v691_v30 = vrot.slane %v2524_v3, 1 }
  0xc5   : > { %858 = vrot.lane.b32.xlu0 %v2468_v58, %s2110_s13 }
  0xc6   : > { %v949_v40 = vpop.permute.xlu1 %948  ;;  %v693_v59 = vsel %vm645_vm0, %v691_v30, %v692_v37  ;;  %v2703_v30 = vld [vmem:[%s2200_s7 + $0xd4] ss:$0 sps:$4 sm:$0x11]  }
  0xc7   : > { %v1213_v41 = vsel %vm1195_vm10, %v1180_v33, %v949_v40  ;;  %v933_v18 = vpop.permute.xlu0 %932  ;;  %v668_v33 = vrot.slane %v2553_v35, 1 }
  0xc8   : > { %876 = vrot.lane.b32.xlu1 %v2524_v3, %s2110_s13  ;;  %1896 = vmatprep.mubr.msk.bf16.mxu1 %vm1248_vm11, %v1213_v41  ;;  %v1197_v63 = vsel %vm1195_vm10, %v1164_v52, %v933_v18  ;;  %v2021_v18 = vld [vmem:[%s2200_s7 + $0xc8] ss:$0 sps:$4 sm:$0x11]  }
  0xc9   : > { %860 = vrot.lane.b32.xlu0 %v2536_v45, %s2110_s13  ;;  %1880 = vmatprep.mubr.msk.bf16.mxu0 %vm1248_vm11, %v1197_v63  ;;  %v669_v27 = vsel %vm645_vm0, %v667_v11, %v668_v33  ;;  %v774_v50 = vshll.u32 %v2021_v18, 16 }
  0xca   : > { %v2593_v1 = vpop.permute.xlu1 %633 }
  0xcb   : > { %v2603_v19 = vpop.permute.xlu0 %617  ;;  %v776_v8 = vrot.slane %v774_v50, 1 }
  0xcc   : > { %921 = vrot.lane.b32.xlu1 %v2501_v26, %s2111_s26  ;;  %v970_v11 = vsel %vm964_vm3, %v2254_v46, %v2603_v19 }
  0xcd   : > { %905 = vrot.lane.b32.xlu0 %v2505_v28, %s2111_s26 }
  0xce   : > { %v951_v21 = vpop.permute.xlu1 %950 }
  0xcf   : > { %v1215_v24 = vsel %vm1195_vm10, %v1182_v55, %v951_v21  ;;  %v935_v36 = vpop.permute.xlu0 %934  ;;  %v811_v55 = vrot.slane %v2021_v18, 1 }
  0xd0   : > { %923 = vrot.lane.b32.xlu1 %v612_v62, %s2111_s26  ;;  %1897 = vmatmul.mubr.msk.bf16.vlgmr.msra.gmra.mrb[0].mxu1 %vm1248_vm11, %v1215_v24  ;;  %v1199_v25 = vsel %vm1195_vm10, %v1166_v31, %v935_v36  ;;  %v2693_v24 = vld [vmem:[%s2200_s7 + $0xcc] sm:$0xff]   ;;  %v986_v31 = vsel %vm964_vm3, %v2248_v39, %v2593_v1 }
  0xd1   : > { %907 = vrot.lane.b32.xlu0 %v516_v5, %s2111_s26  ;;  %1881 = vmatmul.mubr.msk.bf16.vlgmr.msra.gmra.mrb[0].mxu0 %vm1248_vm11, %v1199_v25  ;;  %v888_v37 = vshll.u32 %v2693_v24, 16  ;;  %v886_v46 = vshrl.u32 %v2693_v24, 16 }
  0xd2   : > { %v2627_v15 = vpop.permute.xlu1 %635 }
  0xd3   : > { %v2629_v61 = vpop.permute.xlu0 %619  ;;  %v890_v29 = vrot.slane %v888_v37, 1 }
  0xd4   : > { %956 = vrot.lane.b32.xlu1 %v2521_v60, %s2112_s5 }
  0xd5   : > { %940 = vrot.lane.b32.xlu0 %v2533_v7, %s2112_s5 }
  0xd6   : > { %v715_v32 = vpop.permute.xlu1 %714 }
  0xd7   : > { %v2639_v40 = vpop.permute.xlu0 %698  ;;  %v1019_v25 = vsel %vm997_vm4, %v986_v31, %v715_v32 }
  0xd8   : > { %641 = vrot.lane.b32.xlu1 %v2501_v26, %s2107_s10  ;;  %v1003_v1 = vsel %vm997_vm4, %v970_v11, %v2639_v40 }
  0xd9   : > { %625 = vrot.lane.b32.xlu0 %v2505_v28, %s2107_s10 }
  0xda   : > { %v2646_v49 = vpop.permute.xlu1 %716 }
  0xdb   : > { %v2649_v41 = vpop.permute.xlu0 %700 }
  0xdc   : > { %958 = vrot.lane.b32.xlu1 %v693_v59, %s2112_s5 }
  0xdd   : > { %942 = vrot.lane.b32.xlu0 %v669_v27, %s2112_s5 }
  0xde   : > { %v752_v35 = vpop.permute.xlu1 %751 }
  0xdf   : > { %v736_v6 = vpop.permute.xlu0 %735  ;;  %v1052_v33 = vsel %vm1030_vm6, %v1019_v25, %v752_v35  ;;  %v930_v25 = vrot.slane %v2703_v30, 1 }
  0xe0   : > { %643 = vrot.lane.b32.xlu1 %v612_v62, %s2107_s10  ;;  %v1036_v32 = vsel %vm1030_vm6, %v1003_v1, %v736_v6 }
  0xe1   : > { %627 = vrot.lane.b32.xlu0 %v516_v5, %s2107_s10 }
  0xe2   : > { %v2655_v26 = vpop.permute.xlu1 %753 }
  0xe3   : > { %v2657_v28 = vpop.permute.xlu0 %737 }
  0xe4   : > { %722 = vrot.lane.b32.xlu1 %v2521_v60, %s2106_s9  ;;  %v767_v60 = vshrl.u32 %v2020_v53, 16 }
  0xe5   : > { %706 = vrot.lane.b32.xlu0 %v2533_v7, %s2106_s9 }
  0xe6   : > { %v799_v0 = vpop.permute.xlu1 %798  ;;  %v772_v38 = vor.u32 %v771_v34, %v767_v60  ;;  %v893_v60 = vshll.u32 %v2703_v30, 16 }
  0xe7   : > { %v783_v52 = vpop.permute.xlu0 %782 }
  0xe8   : > { %724 = vrot.lane.b32.xlu1 %v693_v59, %s2106_s9  ;;  %v777_v54 = vsel %vm420_vm1, %v772_v38, %v776_v8  ;;  %v1069_v19 = vsel %vm1063_vm5, %v1036_v32, %v783_v52  ;;  %v988_v52 = vsel %vm964_vm3, %v2296_v10, %v2627_v15  ;;  %v891_v38 = vor.u32 %v890_v29, %v886_v46  ;;  %v2024_v15 = vld [vmem:[%s2200_s7 + $0x6c] sm:$0xff]   ;;  %s1854_s7 = sshll.u32 %s2095_s18, 12 }
  0xe9   : > { %708 = vrot.lane.b32.xlu0 %v669_v27, %s2106_s9  ;;  %v895_v8 = vrot.slane %v893_v60, 1 }
  0xea   : > { %v2667_v63 = vpop.permute.xlu1 %800 }
  0xeb   : > { %v2669_v4 = vpop.permute.xlu0 %784  ;;  %v896_v31 = vsel %vm420_vm1, %v891_v38, %v895_v8 }
  0xec   : > { %759 = vrot.lane.b32.xlu1 %v2524_v3, %s2105_s8 }
  0xed   : > { %743 = vrot.lane.b32.xlu0 %v2536_v45, %s2105_s8 }
  0xee   : > { %v834_v7 = vpop.permute.xlu1 %833 }
  0xef   : > { %v818_v47 = vpop.permute.xlu0 %817 }
  0xf0   : > { %761 = vrot.lane.b32.xlu1 %v2020_v53, %s2105_s8  ;;  %v1102_v40 = vsel %vm1096_vm7, %v1069_v19, %v818_v47 }
  0xf1   : > { %745 = vrot.lane.b32.xlu0 %v2213_v2, %s2105_s8  ;;  %s218_s8 = sand.u32 1, %s2087_s16  }
  0xf2   : > { %v2678_v16 = vpop.permute.xlu1 %835  ;;  %s2878_s14 = sshll.u32 %s218_s8, 8  ;;  %s3047_s18 = scalar_lea.sflag [#allocation3], %s218_s8 }
  0xf3   : > { %v2680_v17 = vpop.permute.xlu0 %819 }
  0xf4   : > { %806 = vrot.lane.b32.xlu1 %v612_v62, %s2108_s11  ;;  %v2690_v62 = vsel %vm645_vm0, %v810_v22, %v811_v55 }
  0xf5   : > { %790 = vrot.lane.b32.xlu0 %v516_v5, %s2108_s11 }
  0xf6   : > { %v871_v20 = vpop.permute.xlu1 %870 }
  0xf7   : > { %v855_v42 = vpop.permute.xlu0 %854 }
  0xf8   : > { %808 = vrot.lane.b32.xlu1 %v777_v54, %s2108_s11 }
  0xf9   : > { %792 = vrot.lane.b32.xlu0 %v2264_v51, %s2108_s11  ;;  %s2902_s11 = scalar_lea.vmem [#allocation2], %s2878_s14  ;;  %s3039_s14 = scalar_lea.hbm %s3098_s4, %s1854_s7 }
  0xfa   : > { %v873_v21 = vpop.permute.xlu1 %872  ;;  %s1693_s10 = sshll.u32 %s2902_s11, 4  ;;  %s3042_s10 = int_to_ptr.vmem [resolvable:$true] %s1693_s10 }
  0xfb   : > { %v857_v57 = vpop.permute.xlu0 %856  ;;  %s2025_s21 = scalar_lea.vmem %s3042_s10, 4096  ;;  %p2032_p1 = scmp.lt.s32.totalorder %s3042_s10, %s2030_s24 }
  0xfc   : > { %841 = vrot.lane.b32.xlu1 %v693_v59, %s2109_s12  ;;  %v1085_v59 = vsel %vm1063_vm5, %v1052_v33, %v799_v0  ;;  %p2026_p12 = scmp.ne.s32.totalorder %s3042_s10, %s2025_s21 }
  0xfd   : > { %825 = vrot.lane.b32.xlu0 %v669_v27, %s2109_s12  ;;  %v1118_v27 = vsel %vm1096_vm7, %v1085_v59, %v834_v7 }
  0xfe   : > { %v918_v5 = vpop.permute.xlu1 %917  ;;  %v1151_v35 = vsel %vm1129_vm8, %v1118_v27, %v871_v20  ;;  %v972_v20 = vsel %vm964_vm3, %v2306_v14, %v2629_v61  ;;  %p2027_p13 = pnand %p2026_p12, %p2180_p4 }
  0xff   : > { %v902_v36 = vpop.permute.xlu0 %901  ;;  %v1184_v0 = vsel %vm1162_vm9, %v1151_v35, %v918_v5 }
 0x100   : > { %843 = vrot.lane.b32.xlu1 %v2690_v62, %s2109_s12  ;;  %p2028_p0 = pneg %p2027_p13 }
 0x101   : > { %827 = vrot.lane.b32.xlu0 %v2226_v12, %s2109_s12 }
 0x102   : > { %v920_v39 = vpop.permute.xlu1 %919 }
 0x103   : > { %v904_v18 = vpop.permute.xlu0 %903 }
 0x104   : > { %878 = vrot.lane.b32.xlu1 %v2020_v53, %s2110_s13  ;;  %v1135_v53 = vsel %vm1129_vm8, %v1102_v40, %v855_v42 }
 0x105   : > { %862 = vrot.lane.b32.xlu0 %v2213_v2, %s2110_s13  ;;  %v1168_v50 = vsel %vm1162_vm9, %v1135_v53, %v902_v36  ;;  %v1021_v2 = vsel %vm997_vm4, %v988_v52, %v2646_v49  ;;  %v1005_v49 = vsel %vm997_vm4, %v972_v20, %v2649_v41 }
 0x106   : > { %v953_v6 = vpop.permute.xlu1 %952  ;;  %v1054_v10 = vsel %vm1030_vm6, %v1021_v2, %v2655_v26  ;;  %v1038_v55 = vsel %vm1030_vm6, %v1005_v49, %v2657_v28 }
 0x107   : > { %v1217_v34 = vsel %vm1195_vm10, %v1184_v0, %v953_v6  ;;  %v937_v7 = vpop.permute.xlu0 %936  ;;  %v1087_v22 = vsel %vm1063_vm5, %v1054_v10, %v2667_v63  ;;  %v1071_v26 = vsel %vm1063_vm5, %v1038_v55, %v2669_v4 }
 0x108   : > { %880 = vrot.lane.b32.xlu1 %v2693_v24, %s2110_s13  ;;  %1900 = vmatprep.mubr.msk.bf16.mxu1 %vm1248_vm11, %v1217_v34  ;;  %v1201_v47 = vsel %vm1195_vm10, %v1168_v50, %v937_v7  ;;  %v1120_v14 = vsel %vm1096_vm7, %v1087_v22, %v2678_v16  ;;  %v1104_v41 = vsel %vm1096_vm7, %v1071_v26, %v2680_v17  ;;  %v929_v17 = vrot.slane %v2693_v24, 1 }
 0x109   : > { %864 = vrot.lane.b32.xlu0 %v2024_v15, %s2110_s13  ;;  %1884 = vmatprep.mubr.msk.bf16.mxu0 %vm1248_vm11, %v1201_v47  ;;  %v1153_v5 = vsel %vm1129_vm8, %v1120_v14, %v873_v21  ;;  %v1137_v16 = vsel %vm1129_vm8, %v1104_v41, %v857_v57 }
 0x10a   : > { %v638_v42 = vpop.permute.xlu1 %637  ;;  %v1186_v63 = vsel %vm1162_vm9, %v1153_v5, %v920_v39  ;;  %v1170_v36 = vsel %vm1162_vm9, %v1137_v16, %v904_v18  ;;  %v931_v37 = vsel %vm645_vm0, %v929_v17, %v930_v25 }
 0x10b   : > { %v622_v61 = vpop.permute.xlu0 %621 }
 0x10c   : > { %925 = vrot.lane.b32.xlu1 %v777_v54, %s2111_s26  ;;  %v974_v52 = vsel %vm964_vm3, %v2367_v44, %v622_v61 }
 0x10d   : > { %909 = vrot.lane.b32.xlu0 %v2264_v51, %s2111_s26 }
 0x10e   : > { %v955_v28 = vpop.permute.xlu1 %954 }
 0x10f   : > { %v1219_v54 = vsel %vm1195_vm10, %v1186_v63, %v955_v28  ;;  %v939_v4 = vpop.permute.xlu0 %938 }
 0x110   : > { %927 = vrot.lane.b32.xlu1 %v896_v31, %s2111_s26  ;;  %1901 = vmatmul.mubr.msk.bf16.gmra.mrb[4].mxu1 %vm1248_vm11, %v1219_v54  ;;  %v1203_v21 = vsel %vm1195_vm10, %v1170_v36, %v939_v4 }
 0x111   : > { %911 = vrot.lane.b32.xlu0 %v2259_v48, %s2111_s26  ;;  %1885 = vmatmul.mubr.msk.bf16.gmra.mrb[4].mxu0 %vm1248_vm11, %v1203_v21  ;;  %s2031_s26 = scalar_lea.vmem %s2030_s24, 8192 }
 0x112   : > { %v640_v51 = vpop.permute.xlu1 %639  ;;  %p2033_p2 = scmp.lt.s32.totalorder %s2031_s26, %s2025_s21 }
 0x113   : > { %v624_v57 = vpop.permute.xlu0 %623  ;;  %v992_v55 = vsel %vm964_vm3, %v2396_v9, %v640_v51 }
 0x114   : > { %960 = vrot.lane.b32.xlu1 %v2690_v62, %s2112_s5  ;;  %v976_v31 = vsel %vm964_vm3, %v2401_v13, %v624_v57  ;;  %p2034_p3 = por %p2033_p2, %p2032_p1 }
 0x115   : > { %944 = vrot.lane.b32.xlu0 %v2226_v12, %s2112_s5 }
 0x116   : > { %v719_v11 = vpop.permute.xlu1 %718  ;;  %p2035_p5 = pnand %p2034_p3, %p2028_p0 }
 0x117   : > { %v703_v33 = vpop.permute.xlu0 %702 }
 0x118   : > { %962 = vrot.lane.b32.xlu1 %v931_v37, %s2112_s5  ;;  %v1007_v2 = vsel %vm997_vm4, %v974_v52, %v703_v33 }
 0x119   : > { %946 = vrot.lane.b32.xlu0 %v2238_v23, %s2112_s5  ;;  %v990_v23 = vsel %vm964_vm3, %v2362_v43, %v638_v42 }
 0x11a   : > { %v721_v48 = vpop.permute.xlu1 %720  ;;  %v1023_v34 = vsel %vm997_vm4, %v990_v23, %v719_v11 }
 0x11b   : > { %v705_v24 = vpop.permute.xlu0 %704  ;;  %v1025_v26 = vsel %vm997_vm4, %v992_v55, %v721_v48 }
 0x11c   : > { %v1009_v28 = vsel %vm997_vm4, %v976_v31, %v705_v24 }
 0x11e   : > { %v756_v30 = vpop.permute.xlu1 %755 }
 0x11f   : > { %v740_v39 = vpop.permute.xlu0 %739  ;;  %v1056_v50 = vsel %vm1030_vm6, %v1023_v34, %v756_v30 }
 0x120   : > { %v1040_v38 = vsel %vm1030_vm6, %v1007_v2, %v740_v39 }
 0x122   : > { %v758_v1 = vpop.permute.xlu1 %757 }
 0x123   : > { %v742_v59 = vpop.permute.xlu0 %741  ;;  %v1058_v41 = vsel %vm1030_vm6, %v1025_v26, %v758_v1 }
 0x124   : > { %v1042_v16 = vsel %vm1030_vm6, %v1009_v28, %v742_v59 }
 0x126   : > { %v803_v32 = vpop.permute.xlu1 %802 }
 0x127   : > { %v787_v62 = vpop.permute.xlu0 %786  ;;  %v1089_v47 = vsel %vm1063_vm5, %v1056_v50, %v803_v32 }
 0x128   : > { %v1073_v43 = vsel %vm1063_vm5, %v1040_v38, %v787_v62 }
 0x12a   : > { %v805_v27 = vpop.permute.xlu1 %804 }
 0x12b   : > { %v789_v18 = vpop.permute.xlu0 %788  ;;  %v1091_v9 = vsel %vm1063_vm5, %v1058_v41, %v805_v27 }
 0x12c   : > { %v1075_v4 = vsel %vm1063_vm5, %v1042_v16, %v789_v18 }
 0x12e   : > { %v838_v46 = vpop.permute.xlu1 %837 }
 0x12f   : > { %v822_v19 = vpop.permute.xlu0 %821  ;;  %v1122_v8 = vsel %vm1096_vm7, %v1089_v47, %v838_v46 }
 0x130   : > { %v1106_v15 = vsel %vm1096_vm7, %v1073_v43, %v822_v19 }
 0x132   : > { %v840_v12 = vpop.permute.xlu1 %839 }
 0x133   : > { %v824_v35 = vpop.permute.xlu0 %823  ;;  %v1124_v54 = vsel %vm1096_vm7, %v1091_v9, %v840_v12 }
 0x134   : > { %v1108_v13 = vsel %vm1096_vm7, %v1075_v4, %v824_v35 }
 0x136   : > { %v875_v29 = vpop.permute.xlu1 %874 }
 0x137   : > { %v859_v60 = vpop.permute.xlu0 %858  ;;  %v1155_v10 = vsel %vm1129_vm8, %v1122_v8, %v875_v29 }
 0x138   : > { %v1139_v49 = vsel %vm1129_vm8, %v1106_v15, %v859_v60 }
 0x13a   : > { %v877_v40 = vpop.permute.xlu1 %876 }
 0x13b   : > { %v861_v0 = vpop.permute.xlu0 %860  ;;  %v1157_v21 = vsel %vm1129_vm8, %v1124_v54, %v877_v40 }
 0x13c   : > { %v1141_v51 = vsel %vm1129_vm8, %v1108_v13, %v861_v0 }
 0x13e   : > { %v922_v6 = vpop.permute.xlu1 %921 }
 0x13f   : > { %v906_v53 = vpop.permute.xlu0 %905  ;;  %v1188_v44 = vsel %vm1162_vm9, %v1155_v10, %v922_v6 }
 0x140   : > { %v1172_v14 = vsel %vm1162_vm9, %v1139_v49, %v906_v53 }
 0x142   : > { %v924_v7 = vpop.permute.xlu1 %923 }
 0x143   : > { %v908_v20 = vpop.permute.xlu0 %907  ;;  %v1190_v17 = vsel %vm1162_vm9, %v1157_v21, %v924_v7 }
 0x144   : > { %v1174_v37 = vsel %vm1162_vm9, %v1141_v51, %v908_v20 }
 0x146   : > { %v957_v42 = vpop.permute.xlu1 %956 }
 0x147   : > { %v1221_v22 = vsel %vm1195_vm10, %v1188_v44, %v957_v42  ;;  %v941_v61 = vpop.permute.xlu0 %940 }
 0x148   : > { %1904 = vmatprep.mubr.msk.bf16.mxu1 %vm1248_vm11, %v1221_v22  ;;  %v1205_v5 = vsel %vm1195_vm10, %v1172_v14, %v941_v61 }
 0x149   : > { %1888 = vmatprep.mubr.msk.bf16.mxu0 %vm1248_vm11, %v1205_v5 }
 0x14a   : > { %v642_v63 = vpop.permute.xlu1 %641 }
 0x14b   : > { %v626_v36 = vpop.permute.xlu0 %625  ;;  %v994_v50 = vsel %vm964_vm3, %v2462_v56, %v642_v63 }
 0x14c   : > { %v978_v47 = vsel %vm964_vm3, %v2468_v58, %v626_v36 }
 0x14e   : > { %v959_v25 = vpop.permute.xlu1 %958 }
 0x14f   : > { %v1223_v57 = vsel %vm1195_vm10, %v1190_v17, %v959_v25  ;;  %v943_v11 = vpop.permute.xlu0 %942 }
 0x150   : > { %1905 = vmatmul.mubr.msk.bf16.gmra.mrb[8].mxu1 %vm1248_vm11, %v1223_v57  ;;  %v1207_v33 = vsel %vm1195_vm10, %v1174_v37, %v943_v11  ;;  %v2866_v11 = vld [vmem:[%s3096_s2] ss:$0 sm:$0xff] }
 0x151   : > { %1889 = vmatmul.mubr.msk.bf16.gmra.mrb[8].mxu0 %vm1248_vm11, %v1207_v33 }
 0x152   : > { %v644_v48 = vpop.permute.xlu1 %643 }
 0x153   : > { %v628_v24 = vpop.permute.xlu0 %627  ;;  %v996_v10 = vsel %vm964_vm3, %v2524_v3, %v644_v48  ;;  %v1503_v48 = vld [vmem:[%s3097_s3 + $0x90] sm:$0xff] }
 0x154   : > { %v980_v22 = vsel %vm964_vm3, %v2536_v45, %v628_v24 }
 0x156   : > { %v723_v30 = vpop.permute.xlu1 %722 }
 0x157   : > { %v707_v39 = vpop.permute.xlu0 %706  ;;  %v1027_v2 = vsel %vm997_vm4, %v994_v50, %v723_v30 }
 0x158   : > { %v1011_v20 = vsel %vm997_vm4, %v978_v47, %v707_v39  ;;  %v1501_v39 = vld [vmem:[%s3097_s3 + $0x80] sm:$0xff] }
 0x15a   : > { %v725_v1 = vpop.permute.xlu1 %724 }
 0x15b   : > { %v709_v59 = vpop.permute.xlu0 %708  ;;  %v1029_v42 = vsel %vm997_vm4, %v996_v10, %v725_v1 }
 0x15c   : > { %v1013_v26 = vsel %vm997_vm4, %v980_v22, %v709_v59  ;;  %v1487_v59 = vld [vmem:[%s3097_s3 + $0x10] sm:$0xff] }
 0x15e   : > { %v760_v32 = vpop.permute.xlu1 %759 }
 0x15f   : > { %v744_v62 = vpop.permute.xlu0 %743  ;;  %v1060_v38 = vsel %vm1030_vm6, %v1027_v2, %v760_v32 }
 0x160   : > { %v1044_v15 = vsel %vm1030_vm6, %v1011_v20, %v744_v62 }
 0x162   : > { %v762_v27 = vpop.permute.xlu1 %761 }
 0x163   : > { %v746_v18 = vpop.permute.xlu0 %745  ;;  %v1062_v55 = vsel %vm1030_vm6, %v1029_v42, %v762_v27 }
 0x164   : > { %v1046_v63 = vsel %vm1030_vm6, %v1013_v26, %v746_v18 }
 0x166   : > { %v807_v46 = vpop.permute.xlu1 %806 }
 0x167   : > { %v791_v19 = vpop.permute.xlu0 %790  ;;  %v1093_v43 = vsel %vm1063_vm5, %v1060_v38, %v807_v46 }
 0x168   : > { %v1077_v49 = vsel %vm1063_vm5, %v1044_v15, %v791_v19  ;;  %v1485_v19 = vld [vmem:[%s3097_s3] sm:$0xff] }
 0x16a   : > { %v809_v12 = vpop.permute.xlu1 %808 }
 0x16b   : > { %v793_v35 = vpop.permute.xlu0 %792  ;;  %v1095_v5 = vsel %vm1063_vm5, %v1062_v55, %v809_v12 }
 0x16c   : > { %v1079_v16 = vsel %vm1063_vm5, %v1046_v63, %v793_v35  ;;  %v1504_v35 = vld [vmem:[%s3097_s3 + $0x98] sm:$0xff] }
 0x16e   : > { %v842_v29 = vpop.permute.xlu1 %841 }
 0x16f   : > { %v826_v60 = vpop.permute.xlu0 %825  ;;  %v1126_v56 = vsel %vm1096_vm7, %v1093_v43, %v842_v29  ;;  %v1502_v43 = vld [vmem:[%s3097_s3 + $0x88] sm:$0xff] }
 0x170   : > { %v1110_v14 = vsel %vm1096_vm7, %v1077_v49, %v826_v60  ;;  %v1486_v49 = vld [vmem:[%s3097_s3 + $0x8] sm:$0xff] }
 0x172   : > { %v844_v40 = vpop.permute.xlu1 %843 }
 0x173   : > { %v828_v0 = vpop.permute.xlu0 %827  ;;  %v1128_v28 = vsel %vm1096_vm7, %v1095_v5, %v844_v40 }
 0x174   : > { %v1112_v4 = vsel %vm1096_vm7, %v1079_v16, %v828_v0  ;;  %v1505_v16 = vld [vmem:[%s3097_s3 + $0xa0] sm:$0xff] }
 0x176   : > { %v879_v6 = vpop.permute.xlu1 %878 }
 0x177   : > { %v863_v23 = vpop.permute.xlu0 %862  ;;  %v1159_v58 = vsel %vm1129_vm8, %v1126_v56, %v879_v6  ;;  %v1488_v6 = vld [vmem:[%s3097_s3 + $0x18] sm:$0xff] }
 0x178   : > { %v1143_v31 = vsel %vm1129_vm8, %v1110_v14, %v863_v23 }
 0x17a   : > { %v881_v53 = vpop.permute.xlu1 %880 }
 0x17b   : > { %v865_v34 = vpop.permute.xlu0 %864  ;;  %v1161_v54 = vsel %vm1129_vm8, %v1128_v28, %v881_v53  ;;  %v1507_v28 = vld [vmem:[%s3097_s3 + $0xb0] sm:$0xff] }
 0x17c   : > { %v1145_v17 = vsel %vm1129_vm8, %v1112_v4, %v865_v34 }
 0x17e   : > { %v926_v52 = vpop.permute.xlu1 %925 }
 0x17f   : > { %v910_v7 = vpop.permute.xlu0 %909  ;;  %v1192_v3 = vsel %vm1162_vm9, %v1159_v58, %v926_v52 }
 0x180   : > { %v1176_v45 = vsel %vm1162_vm9, %v1143_v31, %v910_v7 }
 0x182   : > { %v928_v8 = vpop.permute.xlu1 %927 }
 0x183   : > { %v912_v44 = vpop.permute.xlu0 %911  ;;  %v1194_v21 = vsel %vm1162_vm9, %v1161_v54, %v928_v8 }
 0x184   : > { %v1178_v51 = vsel %vm1162_vm9, %v1145_v17, %v912_v44 }
 0x186   : > { %v961_v61 = vpop.permute.xlu1 %960 }
 0x187   : > { %v1225_v41 = vsel %vm1195_vm10, %v1192_v3, %v961_v61  ;;  %v945_v9 = vpop.permute.xlu0 %944 }
 0x188   : > { %1908 = vmatprep.mubr.msk.bf16.mxu1 %vm1248_vm11, %v1225_v41  ;;  %v1209_v36 = vsel %vm1195_vm10, %v1176_v45, %v945_v9 }
 0x189   : > { %1892 = vmatprep.mubr.msk.bf16.mxu0 %vm1248_vm11, %v1209_v36  ;;  %v1491_v36 = vld [vmem:[%s3097_s3 + $0x30] sm:$0xff] }
 0x18a   : > { %v963_v13 = vpop.permute.xlu1 %962 }
 0x18b   : > { %v1227_v25 = vsel %vm1195_vm10, %v1194_v21, %v963_v13  ;;  %v947_v57 = vpop.permute.xlu0 %946 }
 0x18c   : > { %1909 = vmatmul.mubr.msk.bf16.gmra.mrb[12].mxu1 %vm1248_vm11, %v1227_v25  ;;  %v1211_v37 = vsel %vm1195_vm10, %v1178_v51, %v947_v57  ;;  %v1489_v51 = vld [vmem:[%s3097_s3 + $0x20] sm:$0xff] }
 0x18d   : > { %1893 = vmatmul.mubr.msk.bf16.gmra.mrb[12].mxu0 %vm1248_vm11, %v1211_v37  ;;  %v1508_v37 = vld [vmem:[%s3097_s3 + $0xb8] sm:$0xff] }
 0x1a3   : > { %v1898_v33 = vpop.f32.mrb[0].mxu1 }
 0x1a4   : > { %v1471_v24 = vmul.f32 %v1898_v33, %v2866_v11  ;;  %v1383_v30 = vpop.f32.mrb[1].mxu1  ;;  %v1882_v1 = vpop.f32.mrb[0].mxu0 }
 0x1a5   : > { %v1469_v32 = vmul.f32 %v2866_v11, %v1383_v30  ;;  %v1899_v62 = vpop.f32.mrb[2].mxu1  ;;  %v1455_v27 = vmul.f32 %v1882_v1, %v2866_v11  ;;  %v1319_v46 = vpop.f32.mrb[1].mxu0 }
 0x1a6   : > { %v1535_v18 = vadd.f32 %v1503_v48, %v1471_v24  ;;  %v1472_v12 = vmul.f32 %v1899_v62, %v2866_v11  ;;  %v1386_v29 = vpop.f32.mrb[3].mxu1  ;;  %v1453_v60 = vmul.f32 %v2866_v11, %v1319_v46  ;;  %v1883_v0 = vpop.f32.mrb[2].mxu0 }
 0x1a7   : > { %v1533_v40 = vadd.f32 %v1501_v39, %v1469_v32  ;;  %v1470_v23 = vmul.f32 %v2866_v11, %v1386_v29  ;;  %v1519_v53 = vadd.f32 %v1487_v59, %v1455_v27  ;;  %v1456_v52 = vmul.f32 %v1883_v0, %v2866_v11  ;;  %v1322_v50 = vpop.f32.mrb[3].mxu0  ;;  %v1492_v39 = vld [vmem:[%s3097_s3 + $0x38] sm:$0xff] }
 0x1a8   : > { %vm1567_vm12 = vcmp.gt.f32.partialorder %v1535_v18, 0.0  ;;  %v1599_v34 = vmul.f32 0.01, %v1535_v18  ;;  %v1517_v7 = vadd.f32 %v1485_v19, %v1453_v60  ;;  %v1536_v47 = vadd.f32 %v1504_v35, %v1472_v12  ;;  %v1506_v60 = vld [vmem:[%s3097_s3 + $0xa8] sm:$0xff] }
 0x1a9   : > { %vm1565_vm13 = vcmp.gt.f32.partialorder %v1533_v40, 0.0  ;;  %v1597_v2 = vmul.f32 0.01, %v1533_v40  ;;  %vm1551_vm14 = vcmp.gt.f32.partialorder %v1519_v53, 0.0  ;;  %v1583_v38 = vmul.f32 0.01, %v1519_v53 }
 0x1aa   : > { %v1631_v8 = vsel %vm1567_vm12, %v1535_v18, %v1599_v34  ;;  %v1520_v20 = vadd.f32 %v1488_v6, %v1456_v52  ;;  %vm1549_vm15 = vcmp.gt.f32.partialorder %v1517_v7, 0.0  ;;  %v1581_v10 = vmul.f32 0.01, %v1517_v7  ;;  %v1490_v34 = vld [vmem:[%s3097_s3 + $0x28] sm:$0xff] }
 0x1ab   : > { %1663 = vst [vmem:[%s2902_s11 + $0x90] sm:$0xff] %v1631_v8  ;;  %v1629_v15 = vsel %vm1565_vm13, %v1533_v40, %v1597_v2  ;;  %vm1568_vm0 = vcmp.gt.f32.partialorder %v1536_v47, 0.0  ;;  %v1615_v56 = vsel %vm1551_vm14, %v1519_v53, %v1583_v38  ;;  %v1600_v42 = vmul.f32 0.01, %v1536_v47 }
 0x1ac   : > { %1661 = vst [vmem:[%s2902_s11 + $0x80] sm:$0xff] %v1629_v15  ;;  %vm1552_vm1 = vcmp.gt.f32.partialorder %v1520_v20, 0.0  ;;  %v1584_v44 = vmul.f32 0.01, %v1520_v20  ;;  %1647 = vst [vmem:[%s2902_s11 + $0x10] sm:$0xff] %v1615_v56  ;;  %v1613_v58 = vsel %vm1549_vm15, %v1517_v7, %v1581_v10  ;;  %v1454_v22 = vmul.f32 %v2866_v11, %v1322_v50  ;;  %v1511_v56 = vld [vmem:[%s3097_s3 + $0xd0] sm:$0xff] }
 0x1ad   : > { %v1534_v55 = vadd.f32 %v1502_v43, %v1470_v23  ;;  %1645 = vst [vmem:[%s2902_s11] sm:$0xff] %v1613_v58  ;;  %v1632_v3 = vsel %vm1568_vm0, %v1536_v47, %v1600_v42 }
 0x1ae   : > { %v1616_v14 = vsel %vm1552_vm1, %v1520_v20, %v1584_v44  ;;  %1664 = vst [vmem:[%s2902_s11 + $0x98] sm:$0xff] %v1632_v3  ;;  %v1518_v61 = vadd.f32 %v1486_v49, %v1454_v22  ;;  %v1509_v49 = vld [vmem:[%s3097_s3 + $0xc0] sm:$0xff]  ;;  %v1495_v22 = vld [vmem:[%s3097_s3 + $0x50] sm:$0xff] }
 0x1af   : > { %1648 = vst [vmem:[%s2902_s11 + $0x18] sm:$0xff] %v1616_v14  ;;  %vm1566_vm2 = vcmp.gt.f32.partialorder %v1534_v55, 0.0  ;;  %v1598_v26 = vmul.f32 0.01, %v1534_v55 }
 0x1b0   : > { %vm1550_vm3 = vcmp.gt.f32.partialorder %v1518_v61, 0.0  ;;  %v1582_v5 = vmul.f32 0.01, %v1518_v61 }
 0x1b1   : > { %v1630_v31 = vsel %vm1566_vm2, %v1534_v55, %v1598_v26 }
 0x1b2   : > { %1662 = vst [vmem:[%s2902_s11 + $0x88] sm:$0xff] %v1630_v31  ;;  %v1614_v41 = vsel %vm1550_vm3, %v1518_v61, %v1582_v5  ;;  %v1493_v5 = vld [vmem:[%s3097_s3 + $0x40] sm:$0xff] }
 0x1b3   : > { %1646 = vst [vmem:[%s2902_s11 + $0x8] sm:$0xff] %v1614_v41  ;;  %v1512_v41 = vld [vmem:[%s3097_s3 + $0xd8] sm:$0xff] }
 0x1e3   : > { %v1902_v63 = vpop.f32.mrb[4].mxu1 }
 0x1e4   : > { %v1475_v45 = vmul.f32 %v1902_v63, %v2866_v11  ;;  %v1399_v9 = vpop.f32.mrb[5].mxu1  ;;  %v1886_v54 = vpop.f32.mrb[4].mxu0 }
 0x1e5   : > { %v1473_v4 = vmul.f32 %v2866_v11, %v1399_v9  ;;  %v1903_v21 = vpop.f32.mrb[6].mxu1  ;;  %v1459_v13 = vmul.f32 %v1886_v54, %v2866_v11  ;;  %v1335_v25 = vpop.f32.mrb[5].mxu0 }
 0x1e6   : > { %v1539_v17 = vadd.f32 %v1507_v28, %v1475_v45  ;;  %v1476_v57 = vmul.f32 %v1903_v21, %v2866_v11  ;;  %v1402_v33 = vpop.f32.mrb[7].mxu1  ;;  %v1457_v48 = vmul.f32 %v2866_v11, %v1335_v25  ;;  %v1887_v30 = vpop.f32.mrb[6].mxu0 }
 0x1e7   : > { %v1537_v24 = vadd.f32 %v1505_v16, %v1473_v4  ;;  %v1474_v1 = vmul.f32 %v2866_v11, %v1402_v33  ;;  %v1523_v59 = vadd.f32 %v1491_v36, %v1459_v13  ;;  %v1460_v62 = vmul.f32 %v1887_v30, %v2866_v11  ;;  %v1338_v27 = vpop.f32.mrb[7].mxu0  ;;  %v1496_v16 = vld [vmem:[%s3097_s3 + $0x58] sm:$0xff] }
 0x1e8   : > { %vm1571_vm4 = vcmp.gt.f32.partialorder %v1539_v17, 0.0  ;;  %v1603_v32 = vmul.f32 0.01, %v1539_v17  ;;  %v1521_v18 = vadd.f32 %v1489_v51, %v1457_v48  ;;  %v1540_v19 = vadd.f32 %v1508_v37, %v1476_v57  ;;  %v1510_v48 = vld [vmem:[%s3097_s3 + $0xc8] sm:$0xff] }
 0x1e9   : > { %vm1569_vm5 = vcmp.gt.f32.partialorder %v1537_v24, 0.0  ;;  %v1601_v46 = vmul.f32 0.01, %v1537_v24  ;;  %vm1555_vm6 = vcmp.gt.f32.partialorder %v1523_v59, 0.0  ;;  %v1587_v12 = vmul.f32 0.01, %v1523_v59 }
 0x1ea   : > { %v1635_v35 = vsel %vm1571_vm4, %v1539_v17, %v1603_v32  ;;  %v1524_v29 = vadd.f32 %v1492_v39, %v1460_v62  ;;  %vm1553_vm7 = vcmp.gt.f32.partialorder %v1521_v18, 0.0  ;;  %v1585_v40 = vmul.f32 0.01, %v1521_v18  ;;  %v1494_v32 = vld [vmem:[%s3097_s3 + $0x48] sm:$0xff] }
 0x1eb   : > { %1667 = vst [vmem:[%s2902_s11 + $0xb0] sm:$0xff] %v1635_v35  ;;  %v1633_v0 = vsel %vm1569_vm5, %v1537_v24, %v1601_v46  ;;  %vm1572_vm8 = vcmp.gt.f32.partialorder %v1540_v19, 0.0  ;;  %v1619_v6 = vsel %vm1555_vm6, %v1523_v59, %v1587_v12  ;;  %v1604_v53 = vmul.f32 0.01, %v1540_v19 }
 0x1ec   : > { %1665 = vst [vmem:[%s2902_s11 + $0xa0] sm:$0xff] %v1633_v0  ;;  %vm1556_vm9 = vcmp.gt.f32.partialorder %v1524_v29, 0.0  ;;  %v1588_v23 = vmul.f32 0.01, %v1524_v29  ;;  %1651 = vst [vmem:[%s2902_s11 + $0x30] sm:$0xff] %v1619_v6  ;;  %v1617_v52 = vsel %vm1553_vm7, %v1521_v18, %v1585_v40  ;;  %v1458_v50 = vmul.f32 %v2866_v11, %v1338_v27  ;;  %v1515_v6 = vld [vmem:[%s3097_s3 + $0xf0] sm:$0xff] }
 0x1ed   : > { %v1538_v7 = vadd.f32 %v1506_v60, %v1474_v1  ;;  %1649 = vst [vmem:[%s2902_s11 + $0x20] sm:$0xff] %v1617_v52  ;;  %v1636_v47 = vsel %vm1572_vm8, %v1540_v19, %v1604_v53 }
 0x1ee   : > { %v1620_v2 = vsel %vm1556_vm9, %v1524_v29, %v1588_v23  ;;  %1668 = vst [vmem:[%s2902_s11 + $0xb8] sm:$0xff] %v1636_v47  ;;  %v1522_v38 = vadd.f32 %v1490_v34, %v1458_v50  ;;  %v1513_v34 = vld [vmem:[%s3097_s3 + $0xe0] sm:$0xff]  ;;  %v1499_v50 = vld [vmem:[%s3097_s3 + $0x70] sm:$0xff] }
 0x1ef   : > { %1652 = vst [vmem:[%s2902_s11 + $0x38] sm:$0xff] %v1620_v2  ;;  %vm1570_vm10 = vcmp.gt.f32.partialorder %v1538_v7, 0.0  ;;  %v1602_v8 = vmul.f32 0.01, %v1538_v7 }
 0x1f0   : > { %vm1554_vm11 = vcmp.gt.f32.partialorder %v1522_v38, 0.0  ;;  %v1586_v20 = vmul.f32 0.01, %v1522_v38 }
 0x1f1   : > { %v1634_v43 = vsel %vm1570_vm10, %v1538_v7, %v1602_v8 }
 0x1f2   : > { %1666 = vst [vmem:[%s2902_s11 + $0xa8] sm:$0xff] %v1634_v43  ;;  %v1618_v10 = vsel %vm1554_vm11, %v1522_v38, %v1586_v20  ;;  %v1497_v20 = vld [vmem:[%s3097_s3 + $0x60] sm:$0xff] }
 0x1f3   : > { %1650 = vst [vmem:[%s2902_s11 + $0x28] sm:$0xff] %v1618_v10  ;;  %v1516_v10 = vld [vmem:[%s3097_s3 + $0xf8] sm:$0xff] }
 0x223   : > { %v1906_v15 = vpop.f32.mrb[8].mxu1 }
 0x224   : > { %v1479_v44 = vmul.f32 %v1906_v15, %v2866_v11  ;;  %v1415_v42 = vpop.f32.mrb[9].mxu1  ;;  %v1890_v58 = vpop.f32.mrb[8].mxu0 }
 0x225   : > { %v1477_v55 = vmul.f32 %v2866_v11, %v1415_v42  ;;  %v1907_v14 = vpop.f32.mrb[10].mxu1  ;;  %v1463_v3 = vmul.f32 %v1890_v58, %v2866_v11  ;;  %v1351_v26 = vpop.f32.mrb[9].mxu0 }
 0x226   : > { %v1543_v61 = vadd.f32 %v1511_v56, %v1479_v44  ;;  %v1480_v31 = vmul.f32 %v1907_v14, %v2866_v11  ;;  %v1418_v63 = vpop.f32.mrb[11].mxu1  ;;  %v1461_v28 = vmul.f32 %v2866_v11, %v1351_v26  ;;  %v1891_v9 = vpop.f32.mrb[10].mxu0 }
 0x227   : > { %v1541_v45 = vadd.f32 %v1509_v49, %v1477_v55  ;;  %v1478_v54 = vmul.f32 %v2866_v11, %v1418_v63  ;;  %v1527_v36 = vadd.f32 %v1495_v22, %v1463_v3  ;;  %v1464_v21 = vmul.f32 %v1891_v9, %v2866_v11  ;;  %v1354_v13 = vpop.f32.mrb[11].mxu0  ;;  %v1500_v49 = vld [vmem:[%s3097_s3 + $0x78] sm:$0xff] }
 0x228   : > { %vm1575_vm12 = vcmp.gt.f32.partialorder %v1543_v61, 0.0  ;;  %v1607_v4 = vmul.f32 0.01, %v1543_v61  ;;  %v1525_v17 = vadd.f32 %v1493_v5, %v1461_v28  ;;  %v1544_v51 = vadd.f32 %v1512_v41, %v1480_v31  ;;  %v1514_v28 = vld [vmem:[%s3097_s3 + $0xe8] sm:$0xff] }
 0x229   : > { %vm1573_vm13 = vcmp.gt.f32.partialorder %v1541_v45, 0.0  ;;  %v1605_v25 = vmul.f32 0.01, %v1541_v45  ;;  %vm1559_vm14 = vcmp.gt.f32.partialorder %v1527_v36, 0.0  ;;  %v1591_v57 = vmul.f32 0.01, %v1527_v36 }
 0x22a   : > { %v1639_v37 = vsel %vm1575_vm12, %v1543_v61, %v1607_v4  ;;  %v1528_v33 = vadd.f32 %v1496_v16, %v1464_v21  ;;  %vm1557_vm15 = vcmp.gt.f32.partialorder %v1525_v17, 0.0  ;;  %v1589_v24 = vmul.f32 0.01, %v1525_v17  ;;  %v1498_v4 = vld [vmem:[%s3097_s3 + $0x68] sm:$0xff] }
 0x22b   : > { %1671 = vst [vmem:[%s2902_s11 + $0xd0] sm:$0xff] %v1639_v37  ;;  %v1637_v30 = vsel %vm1573_vm13, %v1541_v45, %v1605_v25  ;;  %vm1576_vm0 = vcmp.gt.f32.partialorder %v1544_v51, 0.0  ;;  %v1623_v39 = vsel %vm1559_vm14, %v1527_v36, %v1591_v57  ;;  %v1608_v59 = vmul.f32 0.01, %v1544_v51 }
 0x22c   : > { %1669 = vst [vmem:[%s2902_s11 + $0xc0] sm:$0xff] %v1637_v30  ;;  %vm1560_vm1 = vcmp.gt.f32.partialorder %v1528_v33, 0.0  ;;  %v1592_v1 = vmul.f32 0.01, %v1528_v33  ;;  %1655 = vst [vmem:[%s2902_s11 + $0x50] sm:$0xff] %v1623_v39  ;;  %v1621_v62 = vsel %vm1557_vm15, %v1525_v17, %v1589_v24  ;;  %v1462_v27 = vmul.f32 %v2866_v11, %v1354_v13 }
 0x22d   : > { %v1542_v18 = vadd.f32 %v1510_v48, %v1478_v54  ;;  %1653 = vst [vmem:[%s2902_s11 + $0x40] sm:$0xff] %v1621_v62  ;;  %v1640_v19 = vsel %vm1576_vm0, %v1544_v51, %v1608_v59 }
 0x22e   : > { %v1624_v46 = vsel %vm1560_vm1, %v1528_v33, %v1592_v1  ;;  %1672 = vst [vmem:[%s2902_s11 + $0xd8] sm:$0xff] %v1640_v19  ;;  %v1526_v12 = vadd.f32 %v1494_v32, %v1462_v27 }
 0x22f   : > { %1656 = vst [vmem:[%s2902_s11 + $0x58] sm:$0xff] %v1624_v46  ;;  %vm1574_vm2 = vcmp.gt.f32.partialorder %v1542_v18, 0.0  ;;  %v1606_v35 = vmul.f32 0.01, %v1542_v18 }
 0x230   : > { %vm1558_vm3 = vcmp.gt.f32.partialorder %v1526_v12, 0.0  ;;  %v1590_v29 = vmul.f32 0.01, %v1526_v12 }
 0x231   : > { %v1638_v60 = vsel %vm1574_vm2, %v1542_v18, %v1606_v35 }
 0x232   : > { %1670 = vst [vmem:[%s2902_s11 + $0xc8] sm:$0xff] %v1638_v60  ;;  %v1622_v40 = vsel %vm1558_vm3, %v1526_v12, %v1590_v29 }
 0x233   : > { %1654 = vst [vmem:[%s2902_s11 + $0x48] sm:$0xff] %v1622_v40 }
 0x25f   : > { %v1910_v0 = vpop.f32.mrb[12].mxu1 }
 0x260   : > { %v1483_v23 = vmul.f32 %v1910_v0, %v2866_v11  ;;  %v1431_v53 = vpop.f32.mrb[13].mxu1  ;;  %v1894_v52 = vpop.f32.mrb[12].mxu0 }
 0x261   : > { %v1481_v7 = vmul.f32 %v2866_v11, %v1431_v53  ;;  %v1911_v2 = vpop.f32.mrb[14].mxu1  ;;  %v1467_v47 = vmul.f32 %v1894_v52, %v2866_v11  ;;  %v1367_v8 = vpop.f32.mrb[13].mxu0 }
 0x262   : > { %v1547_v38 = vadd.f32 %v1515_v6, %v1483_v23  ;;  %v1484_v43 = vmul.f32 %v1911_v2, %v2866_v11  ;;  %v1434_v15 = vpop.f32.mrb[15].mxu1  ;;  %v1465_v56 = vmul.f32 %v2866_v11, %v1367_v8  ;;  %v1895_v42 = vpop.f32.mrb[14].mxu0 }
 0x263   : > { %v1545_v44 = vadd.f32 %v1513_v34, %v1481_v7  ;;  %v1482_v58 = vmul.f32 %v2866_v11, %v1434_v15  ;;  %v1531_v22 = vadd.f32 %v1499_v50, %v1467_v47  ;;  %v1468_v14 = vmul.f32 %v1895_v42, %v2866_v11  ;;  %v1370_v3 = vpop.f32.mrb[15].mxu0 }
 0x264   : > { %vm1579_vm4 = vcmp.gt.f32.partialorder %v1547_v38, 0.0  ;;  %v1611_v55 = vmul.f32 0.01, %v1547_v38  ;;  %v1529_v61 = vadd.f32 %v1497_v20, %v1465_v56  ;;  %v1548_v5 = vadd.f32 %v1516_v10, %v1484_v43 }
 0x265   : > { %vm1577_vm5 = vcmp.gt.f32.partialorder %v1545_v44, 0.0  ;;  %v1609_v26 = vmul.f32 0.01, %v1545_v44  ;;  %vm1563_vm6 = vcmp.gt.f32.partialorder %v1531_v22, 0.0  ;;  %v1595_v31 = vmul.f32 0.01, %v1531_v22 }
 0x266   : > { %v1643_v41 = vsel %vm1579_vm4, %v1547_v38, %v1611_v55  ;;  %v1532_v63 = vadd.f32 %v1500_v49, %v1468_v14  ;;  %vm1561_vm7 = vcmp.gt.f32.partialorder %v1529_v61, 0.0  ;;  %v1593_v45 = vmul.f32 0.01, %v1529_v61 }
 0x267   : > { %1675 = vst [vmem:[%s2902_s11 + $0xf0] sm:$0xff] %v1643_v41  ;;  %v1641_v9 = vsel %vm1577_vm5, %v1545_v44, %v1609_v26  ;;  %vm1580_vm8 = vcmp.gt.f32.partialorder %v1548_v5, 0.0  ;;  %v1627_v16 = vsel %vm1563_vm6, %v1531_v22, %v1595_v31  ;;  %v1612_v36 = vmul.f32 0.01, %v1548_v5 }
 0x268   : > { %1673 = vst [vmem:[%s2902_s11 + $0xe0] sm:$0xff] %v1641_v9  ;;  %vm1564_vm9 = vcmp.gt.f32.partialorder %v1532_v63, 0.0  ;;  %v1596_v54 = vmul.f32 0.01, %v1532_v63  ;;  %1659 = vst [vmem:[%s2902_s11 + $0x70] sm:$0xff] %v1627_v16  ;;  %v1625_v21 = vsel %vm1561_vm7, %v1529_v61, %v1593_v45  ;;  %v1466_v13 = vmul.f32 %v2866_v11, %v1370_v3 }
 0x269   : > { %v1546_v17 = vadd.f32 %v1514_v28, %v1482_v58  ;;  %1657 = vst [vmem:[%s2902_s11 + $0x60] sm:$0xff] %v1625_v21  ;;  %v1644_v51 = vsel %vm1580_vm8, %v1548_v5, %v1612_v36 }
 0x26a   : > { %v1628_v25 = vsel %vm1564_vm9, %v1532_v63, %v1596_v54  ;;  %1676 = vst [vmem:[%s2902_s11 + $0xf8] sm:$0xff] %v1644_v51  ;;  %v1530_v57 = vadd.f32 %v1498_v4, %v1466_v13 }
 0x26b   : > { %1660 = vst [vmem:[%s2902_s11 + $0x78] sm:$0xff] %v1628_v25  ;;  %vm1578_vm10 = vcmp.gt.f32.partialorder %v1546_v17, 0.0  ;;  %v1610_v37 = vmul.f32 0.01, %v1546_v17 }
 0x26c   : > { %vm1562_vm11 = vcmp.gt.f32.partialorder %v1530_v57, 0.0  ;;  %v1594_v33 = vmul.f32 0.01, %v1530_v57 }
 0x26d   : > { %v1642_v48 = vsel %vm1578_vm10, %v1546_v17, %v1610_v37 }
 0x26e   : > { %1674 = vst [vmem:[%s2902_s11 + $0xe8] sm:$0xff] %v1642_v48  ;;  %v1626_v11 = vsel %vm1562_vm11, %v1530_v57, %v1594_v33 }
 0x26f   : > { %1658 = vst [vmem:[%s2902_s11 + $0x68] sm:$0xff] %v1626_v11 }
 0x270   : > { %2038 = shalt.err (!%p2035_p5)
}
 0x271   : > { %s2039_s8 = scalar_lea.hbm %s3039_s14, 4096  ;;  %s2043_s30 = scalar_lea.hbm %s3098_s4, 8192 }
 0x272   : > { %p2040_p6 = scmp.ne.s32.totalorder %s3039_s14, %s2039_s8  ;;  %p2044_p10 = scmp.lt.u32.totalorder %s3039_s14, %s3098_s4 }
 0x273   : > { %p2045_p11 = scmp.lt.u32.totalorder %s2043_s30, %s2039_s8  ;;  %p2047_p13 = scmp.lt.u32.totalorder %s2039_s8, %s3039_s14 }
 0x274   : > { %p2041_p7 = pnand %p2040_p6, %p2180_p4 }
 0x275   : > { %p2046_p12 = por %p2045_p11, %p2044_p10 }
 0x276   : > { %p2042_p9 = pneg %p2041_p7 }
 0x277   : > { %p2048_p0 = por %p2047_p13, %p2046_p12 }
 0x279   : > { %p2049_p1 = pnand %p2048_p0, %p2042_p9 }
 0x27b   : > { %2052 = shalt.err (!%p2049_p1)
}
 0x27c   : > { %s2114_s7 = smov 128  }
 0x27d   : > { %1921 = dma.vmem_to_hbm [thread:$0]  (%p2180_p4), %s3042_s10, 4096, %s3039_s14, %s3047_s18, %s2114_s7, %s2114_s7, %s2106_s9  }
 0x27e PF: > { %p1927_p2 = scmp.ge.s32.totalorder %s2103_s20, 2  ;;  %s1708_s12 = sand.u32 1, %s2083_s15  }
 0x27f   : > { %s1709_s13 = scalar_lea.sflag [#allocation3], %s1708_s12 }
 0x280   : > { %p1924_p3 = pnand %p1927_p2, %p2187_p8 }
 0x282   : > { %2078 = dma.done.wait (!%p1924_p3), %s1709_s13, 4096  }
 0x283   : > { %2080 = vsyncadd (!%p1924_p3), %s1709_s13, 4294963200  ;;  %s17_s20 = sadd.s32 1, %s2103_s20   ;;  %s3101_s15 = smov %s2087_s16 }
 0x284   : > { %p14_p5 = scmp.ge.s32.totalorder %s17_s20, 4   ;;  %s3102_s16 = smov %s2091_s17 }
 0x285   : > { %s3103_s17 = smov %s2193_s28  ;;  %s3104_s18 = smov %s2099_s19 }
 0x286   : > { %s3105_s19 = smov %s3107_s23  ;;  %16 = sbr.rel (!%p14_p5) target bundleno = 4 (0x4), region = 75 }
 0x28d   :  { %1714 = vsyncpa [#allocation3], 1 }
 0x28e   :  { %1716 = vsyncpa [#allocation3 + $0x1], 1 }

// kernel: tpu_custom_call.1
= control target key start
LH: loop header
LB: loop body
LE: loop exit
PB: predicated region body
PF: predicated region fallthrough
CT: control target
= control target key end

     0   :  { %9 = vsyncpa [#allocation3], 0  ;;  %s3092_s0 = inlined_call_operand.vmem [shape: bf16[2,18,18,4], index: 0, kind: input, shape index: {}]   ;;  %s3093_s1 = inlined_call_operand.vmem [shape: bf16[36,128], index: 1, kind: input, shape index: {}]   ;;  %s3094_s2 = inlined_call_operand.vmem [shape: f32[1,128], index: 2, kind: input, shape index: {}]   ;;  %s3095_s3 = inlined_call_operand.vmem [shape: f32[256,128], index: 3, kind: input, shape index: {}]   ;;  %s3096_s4 = inlined_call_operand.hbm [shape: f32[2,256,128], index: 4, kind: output, shape index: {}]  }
   0x1   :  { %11 = vsyncpa [#allocation3 + $0x1], 0  ;;  %s2138_s15 = smov 0   ;;  %s2140_s16 = smov 0  }
   0x2   :  { %s2142_s17 = smov 0   ;;  %s2144_s18 = smov 0  }
   0x3   :  { %s2146_s19 = smov 0   ;;  %s2148_s20 = smov 0  }
   0x4 LB: > { %s1783_s21 = sadd.s32 4294967295, %s2101_s20   ;;  %s1784_s22 = sadd.s32 4294967294, %s2101_s20   ;;  %s2101_s20 = sphi %s2148_s20, %s17_s20   ;;  %s2097_s19 = sphi %s2146_s19, %s3103_s19   ;;  %s2093_s18 = sphi %s2144_s18, %s3102_s18   ;;  %s2089_s17 = sphi %s2142_s17, %s3101_s17   ;;  %s2085_s16 = sphi %s2140_s16, %s3100_s16   ;;  %s2081_s15 = sphi %s2138_s15, %s3099_s15  }
   0x5   : > { %s29_s23 = sadd.s32 1, %s2097_s19  ;;  %s132_s24 = sadd.s32 1, %s2089_s17 }
   0x6   : > { %p31_p0 = scmp.ge.s32.totalorder %s29_s23, 2  ;;  %p142_p1 = scmp.ne.s32.totalorder %s2089_s17, %s2085_s16 }
   0x7   : > { %p143_p2 = scmp.eq.s32.totalorder %s1783_s21, 1  ;;  %p148_p3 = scmp.ne.s32.totalorder %s2085_s16, %s2081_s15 }
   0x8   : > { %s3105_s23 = smov (%p31_p0, %s29_s23), 0  ;;  %p149_p5 = scmp.eq.s32.totalorder %s1784_s22, 1 }
   0x9   : > { %p2178_p4 = por %p143_p2, %p142_p1  ;;  %s127_s26 = ssub.s32 %s2097_s19, %s3105_s23 }
   0xa   : > { %p1788_p6 = scmp.ge.s32.totalorder %s2101_s20, 1  ;;  %p130_p7 = scmp.eq.s32.totalorder %s127_s26, 0 }
   0xb   : > { %p2185_p8 = por %p149_p5, %p148_p3  ;;  %p190_p9 = scmp.lt.s32.totalorder %s2101_s20, 3 }
   0xc   : > { %s2191_s28 = scalar_select %p130_p7, %s2089_s17, %s132_s24  }
   0xd   : > { %p191_p10 = pnand %p1788_p6, %p190_p9 }
   0xe   : > { %p221_p11 = scmp.lt.s32.totalorder (!%p191_p10), %s2093_s18, 1  ;;  %vm645_vm0 = vcmask (!%p191_p10), 1046528   ;;  %s2103_s8 = smov (!%p191_p10), 12   ;;  %vm420_vm1 = vsmask.f32 (!%p191_p10), 7424  ;;  %vm1281_vm2 = vcmask (!%p191_p10), 1041408  }
   0xf   : > { %194 = sbr.rel (%p191_p10) target bundleno = 638 (0x27e), region = 36  ;;  %s2104_s9 = smov (!%p191_p10), 8   ;;  %vm964_vm3 = vcmask (!%p191_p10), 31744   ;;  %vm997_vm4 = vcmask (!%p191_p10), 64512   ;;  %vm1063_vm5 = vcmask (!%p191_p10), 130048   ;;  %vm1030_vm6 = vcmask (!%p191_p10), 97280  }
  0x10   : > { %s2105_s10 = smov (!%p191_p10), 4   ;;  %s2106_s11 = smov (!%p191_p10), 16   ;;  %vm1096_vm7 = vcmask (!%p191_p10), 162816   ;;  %vm1129_vm8 = vcmask (!%p191_p10), 195584   ;;  %vm1162_vm9 = vcmask (!%p191_p10), 228352   ;;  %vm1195_vm10 = vcmask (!%p191_p10), 261120  }
  0x11   : > { %s2107_s12 = smov (!%p191_p10), 20   ;;  %s2108_s13 = smov (!%p191_p10), 24   ;;  %vm1248_vm11 = vcmask (!%p191_p10), 293888  }
  0x12   : > { %s2109_s26 = smov (!%p191_p10), 28   ;;  %s2110_s5 = smov (!%p191_p10), 32  }
  0x13   : > { %s2111_s22 = smov (!%p191_p10), [#allocation2]  }
  0x14   : > { %s2027_s24 = sshll.u32 (!%p191_p10), %s2111_s22, 4  ;;  %s2028_s24 = int_to_ptr.vmem [resolvable:$false] %s2027_s24 }
  0x16   : > { %s222_s29 = scalar_select %p221_p11, %s2093_s18, 1 }
  0x18   : > { %s1918_s30 = smul.u32 216, %s222_s29 }
  0x1a   : > { %s2198_s7 = scalar_lea.vmem %s3092_s0, %s1918_s30 }
  0x1b   : > { %v2201_v0 = vld [vmem:[%s2198_s7 + $0x6c] sm:$0xff]   ;;  %v2211_v2 = vld [vmem:[%s2198_s7 + $0x60] sm:$0xff]   ;;  %v1986_v3 = vld [vmem:[%s2198_s7 + $0x68] ss:$0 sps:$4 sm:$0x11]  }
  0x1c   : > { %v2204_v1 = vld [vmem:[%s2198_s7 + $0xc] sm:$0xff]   ;;  %747 = vrot.lane.b32.xlu1 %v2201_v0, %s2103_s8  ;;  %v2215_v4 = vld [vmem:[%s2198_s7] sm:$0xff]   ;;  %v673_v5 = vrot.slane %v2201_v0, 1  ;;  %v670_v6 = vrot.slane %v2211_v2, 1  ;;  %v671_v7 = vrot.slane %v1986_v3, 1  ;;  %v530_v26 = vshrl.u32 %v2201_v0, 16 }
  0x1d   : > { %731 = vrot.lane.b32.xlu0 %v2204_v1, %s2103_s8  ;;  %v1988_v8 = vld [vmem:[%s2198_s7 + $0x8] ss:$0 sps:$4 sm:$0x11]   ;;  %v649_v9 = vrot.slane %v2204_v1, 1  ;;  %v646_v10 = vrot.slane %v2215_v4, 1  ;;  %v434_v16 = vshrl.u32 %v2204_v1, 16 }
  0x1e   : > { %v1989_v11 = vld [vmem:[%s2198_s7 + $0x74] ss:$0 sps:$4 sm:$0x11]   ;;  %v2224_v12 = vsel %vm645_vm0, %v670_v6, %v671_v7  ;;  %v647_v13 = vrot.slane %v1988_v8, 1  ;;  %v436_v17 = vshll.u32 %v2204_v1, 16  ;;  %v422_v18 = vshrl.u32 %v2215_v4, 16 }
  0x1f   : > { %v1990_v14 = vld [vmem:[%s2198_s7 + $0x14] ss:$0 sps:$4 sm:$0x11]   ;;  %v674_v15 = vrot.slane %v1989_v11, 1  ;;  %v424_v22 = vshll.u32 %v2215_v4, 16  ;;  %v429_v25 = vshll.u32 %v1988_v8, 16 }
  0x20   : > { %710 = vrot.lane.b32.xlu1 %v2224_v12, %s2104_s9  ;;  %v648_v19 = vsel %vm645_vm0, %v646_v10, %v647_v13  ;;  %v650_v20 = vrot.slane %v1990_v14, 1  ;;  %v441_v21 = vshll.u32 %v1990_v14, 16  ;;  %v438_v24 = vrot.slane %v436_v17, 1  ;;  %v2246_v39 = vld [vmem:[%s2198_s7 + $0x78] sm:$0xff]   ;;  %v2294_v10 = vld [vmem:[%s2198_s7 + $0x84] sm:$0xff]  }
  0x21   : > { %694 = vrot.lane.b32.xlu0 %v648_v19, %s2104_s9  ;;  %v2236_v23 = vsel %vm645_vm0, %v673_v5, %v674_v15  ;;  %v426_v29 = vrot.slane %v424_v22, 1  ;;  %v532_v30 = vshll.u32 %v2201_v0, 16  ;;  %v431_v32 = vrot.slane %v429_v25, 1  ;;  %v2252_v46 = vld [vmem:[%s2198_s7 + $0x18] sm:$0xff]   ;;  %v2304_v14 = vld [vmem:[%s2198_s7 + $0x24] sm:$0xff]  }
  0x22   : > { %v651_v27 = vsel %vm645_vm0, %v649_v9, %v650_v20  ;;  %v443_v28 = vrot.slane %v441_v21, 1  ;;  %v439_v31 = vor.u32 %v438_v24, %v434_v16  ;;  %v537_v33 = vshll.u32 %v1989_v11, 16  ;;  %v1993_v47 = vld [vmem:[%s2198_s7 + $0x80] ss:$0 sps:$4 sm:$0x11]  }
  0x23   : > { %v518_v34 = vshrl.u32 %v2211_v2, 16  ;;  %v427_v35 = vor.u32 %v426_v29, %v422_v18  ;;  %v534_v36 = vrot.slane %v532_v30, 1  ;;  %v520_v37 = vshll.u32 %v2211_v2, 16  ;;  %v1994_v52 = vld [vmem:[%s2198_s7 + $0x20] ss:$0 sps:$4 sm:$0x11]  }
  0x24   : > { %712 = vrot.lane.b32.xlu1 %v2236_v23, %s2104_s9  ;;  %v525_v38 = vshll.u32 %v1986_v3, 16  ;;  %v444_v40 = vsel %vm420_vm1, %v439_v31, %v443_v28  ;;  %v539_v41 = vrot.slane %v537_v33, 1  ;;  %v544_v50 = vshll.u32 %v2246_v39, 16  ;;  %v1997_v15 = vld [vmem:[%s2198_s7 + $0x8c] ss:$0 sps:$4 sm:$0x11]  }
  0x25   : > { %696 = vrot.lane.b32.xlu0 %v651_v27, %s2104_s9  ;;  %v432_v42 = vsel %vm420_vm1, %v427_v35, %v431_v32  ;;  %v535_v43 = vor.u32 %v534_v36, %v530_v26  ;;  %v522_v44 = vrot.slane %v520_v37, 1  ;;  %v448_v53 = vshll.u32 %v2252_v46, 16  ;;  %v1998_v18 = vld [vmem:[%s2198_s7 + $0x2c] ss:$0 sps:$4 sm:$0x11]   ;;  %v2011_v22 = vld [vmem:[%s3093_s1] sm:$0xff]  }
  0x26   : > { %v527_v45 = vrot.slane %v525_v38, 1  ;;  %v542_v54 = vshrl.u32 %v2246_v39, 16  ;;  %v546_v55 = vrot.slane %v544_v50, 1  ;;  %v549_v56 = vshll.u32 %v1993_v47, 16  ;;  %1872 = vmatprep.subr.bf16.mxu0 %v2011_v22  ;;  %1910 = vmatprep.subr.bf16.mxu1 %v2011_v22 }
  0x27   : > { %v2257_v48 = vsel %vm420_vm1, %v535_v43, %v539_v41  ;;  %v523_v49 = vor.u32 %v522_v44, %v518_v34  ;;  %v446_v57 = vshrl.u32 %v2252_v46, 16  ;;  %v450_v58 = vrot.slane %v448_v53, 1  ;;  %1873 = vmatpush3.bf16.msra.mxu0 %v2011_v22  ;;  %1913 = vmatpush3.bf16.msra.mxu1 %v2011_v22  ;;  %v2015_v32 = vld [vmem:[%s3093_s1 + $0x10] ss:$0 sps:$4 sm:$0x33]  }
  0x28   : > { %615 = vrot.lane.b32.xlu1 %v444_v40, %s2105_s10  ;;  %v453_v59 = vshll.u32 %v1994_v52, 16  ;;  %v547_v60 = vor.u32 %v546_v55, %v542_v54  ;;  %v551_v61 = vrot.slane %v549_v56, 1  ;;  %v676_v6 = vrot.slane %v2246_v39, 1  ;;  %v2360_v43 = vld [vmem:[%s2198_s7 + $0x90] sm:$0xff]  }
  0x29   : > { %613 = vrot.lane.b32.xlu0 %v432_v42, %s2105_s10  ;;  %v2262_v51 = vsel %vm420_vm1, %v523_v49, %v527_v45  ;;  %v451_v62 = vor.u32 %v450_v58, %v446_v57  ;;  %v677_v7 = vrot.slane %v1993_v47, 1  ;;  %v652_v8 = vrot.slane %v2252_v46, 1  ;;  %v2365_v44 = vld [vmem:[%s2198_s7 + $0x30] sm:$0xff]   ;;  %v2001_v45 = vld [vmem:[%s2198_s7 + $0x98] ss:$0 sps:$4 sm:$0x11]  }
  0x2a   : > { %v455_v63 = vrot.slane %v453_v59, 1  ;;  %v2279_v3 = vsel %vm420_vm1, %v547_v60, %v551_v61  ;;  %v653_v9 = vrot.slane %v1994_v52, 1  ;;  %v556_v16 = vshll.u32 %v2294_v10, 16  ;;  %v2002_v49 = vld [vmem:[%s2198_s7 + $0x38] ss:$0 sps:$4 sm:$0x11]  }
  0x2b   : > { %v2297_v11 = vsel %vm645_vm0, %v676_v6, %v677_v7  ;;  %v554_v17 = vshrl.u32 %v2294_v10, 16  ;;  %v561_v19 = vshll.u32 %v1997_v15, 16  ;;  %v460_v20 = vshll.u32 %v2304_v14, 16 }
  0x2c   : > { %631 = vrot.lane.b32.xlu1 %v2257_v48, %s2105_s10  ;;  %v2283_v5 = vsel %vm420_vm1, %v451_v62, %v455_v63  ;;  %v2301_v13 = vsel %vm645_vm0, %v652_v8, %v653_v9  ;;  %v558_v21 = vrot.slane %v556_v16, 1  ;;  %v458_v24 = vshrl.u32 %v2304_v14, 16  ;;  %v2394_v9 = vld [vmem:[%s2198_s7 + $0x9c] sm:$0xff]  }
  0x2d   : > { %629 = vrot.lane.b32.xlu0 %v2262_v51, %s2105_s10  ;;  %v462_v25 = vrot.slane %v460_v20, 1  ;;  %v465_v26 = vshll.u32 %v1998_v18, 16  ;;  %v563_v29 = vrot.slane %v561_v19, 1  ;;  %v1283_v34 = vsel %vm1281_vm2, %v2015_v32, 0 }
  0x2e   : > { %v559_v28 = vor.u32 %v558_v21, %v554_v17  ;;  %v679_v36 = vrot.slane %v2294_v10, 1  ;;  %v680_v37 = vrot.slane %v1997_v15, 1  ;;  %v655_v38 = vrot.slane %v2304_v14, 1  ;;  %v2005_v15 = vld [vmem:[%s2198_s7 + $0xa4] ss:$0 sps:$4 sm:$0x11]  }
  0x2f   : > { %v463_v30 = vor.u32 %v462_v25, %v458_v24  ;;  %v467_v31 = vrot.slane %v465_v26, 1  ;;  %v568_v47 = vshll.u32 %v2360_v43, 16  ;;  %v472_v50 = vshll.u32 %v2365_v44, 16  ;;  %v2006_v17 = vld [vmem:[%s2198_s7 + $0x44] ss:$0 sps:$4 sm:$0x11]  }
  0x30   : > { %749 = vrot.lane.b32.xlu1 %v2246_v39, %s2103_s8  ;;  %v564_v33 = vsel %vm420_vm1, %v559_v28, %v563_v29  ;;  %v681_v41 = vsel %vm645_vm0, %v679_v36, %v680_v37  ;;  %v566_v52 = vshrl.u32 %v2360_v43, 16  ;;  %v573_v54 = vshll.u32 %v2001_v45, 16 }
  0x31   : > { %733 = vrot.lane.b32.xlu0 %v2252_v46, %s2103_s8  ;;  %v468_v35 = vsel %vm420_vm1, %v463_v30, %v467_v31  ;;  %v570_v53 = vrot.slane %v568_v47, 1  ;;  %v470_v55 = vshrl.u32 %v2365_v44, 16  ;;  %v474_v56 = vrot.slane %v472_v50, 1 }
  0x32   : > { %v477_v57 = vshll.u32 %v2002_v49, 16  ;;  %v575_v59 = vrot.slane %v573_v54, 1  ;;  %v658_v6 = vrot.slane %v2365_v44, 1  ;;  %v659_v7 = vrot.slane %v2002_v49, 1 }
  0x33   : > { %v571_v58 = vor.u32 %v570_v53, %v566_v52  ;;  %v475_v60 = vor.u32 %v474_v56, %v470_v55  ;;  %v580_v16 = vshll.u32 %v2394_v9, 16  ;;  %v578_v19 = vshrl.u32 %v2394_v9, 16  ;;  %v2460_v56 = vld [vmem:[%s2198_s7 + $0xa8] sm:$0xff]  }
  0x34   : > { %794 = vrot.lane.b32.xlu1 %v2257_v48, %s2106_s11  ;;  %v479_v61 = vrot.slane %v477_v57, 1  ;;  %v585_v21 = vshll.u32 %v2005_v15, 16  ;;  %v489_v25 = vshll.u32 %v2006_v17, 16  ;;  %v685_v36 = vrot.slane %v2394_v9, 1 }
  0x35   : > { %778 = vrot.lane.b32.xlu0 %v444_v40, %s2106_s11  ;;  %v656_v40 = vrot.slane %v1998_v18, 1  ;;  %v576_v62 = vsel %vm420_vm1, %v571_v58, %v575_v59  ;;  %v582_v20 = vrot.slane %v580_v16, 1  ;;  %v686_v37 = vrot.slane %v2005_v15, 1  ;;  %v2466_v58 = vld [vmem:[%s2198_s7 + $0x48] sm:$0xff]  }
  0x36   : > { %v480_v63 = vsel %vm420_vm1, %v475_v60, %v479_v61  ;;  %v491_v29 = vrot.slane %v489_v25, 1  ;;  %v2009_v60 = vld [vmem:[%s2198_s7 + $0xb0] ss:$0 sps:$4 sm:$0x11]   ;;  %v592_v61 = vshll.u32 %v2460_v56, 16  ;;  %v494_v15 = vshrl.u32 %v2466_v58, 16 }
  0x37   : > { %v657_v42 = vsel %vm645_vm0, %v655_v38, %v656_v40  ;;  %v583_v26 = vor.u32 %v582_v20, %v578_v19 }
  0x38   : > { %796 = vrot.lane.b32.xlu1 %v2279_v3, %s2106_s11 }
  0x39   : > { %780 = vrot.lane.b32.xlu0 %v2283_v5, %s2106_s11 }
  0x3c   : > { %829 = vrot.lane.b32.xlu1 %v2236_v23, %s2107_s12 }
  0x3d   : > { %813 = vrot.lane.b32.xlu0 %v651_v27, %s2107_s12  ;;  %v2012_v27 = vld [vmem:[%s3093_s1 + $0x8] sm:$0xff]  }
  0x3e   : > { %1874 = vmatprep.subr.bf16.mxu0 %v2012_v27  ;;  %1911 = vmatprep.subr.bf16.mxu1 %v2012_v27 }
  0x3f   : > { %1875 = vmatpush3.bf16.msra.mxu0 %v2012_v27  ;;  %1914 = vmatpush3.bf16.msra.mxu1 %v2012_v27  ;;  %v587_v27 = vrot.slane %v585_v21, 1 }
  0x40   : > { %831 = vrot.lane.b32.xlu1 %v2297_v11, %s2107_s12  ;;  %1916 = vmatprep.subr.msk.bf16.mxu0 %vm1281_vm2, %v2015_v32 }
  0x41   : > { %815 = vrot.lane.b32.xlu0 %v2301_v13, %s2107_s12  ;;  %1917 = vmatprep.subr.msk.bf16.mxu1 %vm1281_vm2, %v2015_v32  ;;  %v588_v31 = vsel %vm420_vm1, %v583_v26, %v587_v27 }
  0x43   : > { %1877 = vmatpush3.bf16.msra.mxu0 %v1283_v34  ;;  %1915 = vmatpush3.bf16.msra.mxu1 %v1283_v34 }
  0x44   : > { %866 = vrot.lane.b32.xlu1 %v2246_v39, %s2108_s13 }
  0x45   : > { %850 = vrot.lane.b32.xlu0 %v2252_v46, %s2108_s13 }
  0x48   : > { %868 = vrot.lane.b32.xlu1 %v2294_v10, %s2108_s13 }
  0x49   : > { %852 = vrot.lane.b32.xlu0 %v2304_v14, %s2108_s13 }
  0x4c   : > { %913 = vrot.lane.b32.xlu1 %v2279_v3, %s2109_s26 }
  0x4d   : > { %897 = vrot.lane.b32.xlu0 %v2283_v5, %s2109_s26 }
  0x50   : > { %915 = vrot.lane.b32.xlu1 %v564_v33, %s2109_s26 }
  0x51   : > { %899 = vrot.lane.b32.xlu0 %v468_v35, %s2109_s26 }
  0x54   : > { %948 = vrot.lane.b32.xlu1 %v2297_v11, %s2110_s5 }
  0x55   : > { %932 = vrot.lane.b32.xlu0 %v2301_v13, %s2110_s5 }
  0x58   : > { %633 = vrot.lane.b32.xlu1 %v2279_v3, %s2105_s10  ;;  %v682_v3 = vrot.slane %v2360_v43, 1 }
  0x59   : > { %617 = vrot.lane.b32.xlu0 %v2283_v5, %s2105_s10  ;;  %v683_v5 = vrot.slane %v2001_v45, 1  ;;  %v687_v45 = vsel %vm645_vm0, %v685_v36, %v686_v37  ;;  %v688_v36 = vrot.slane %v2460_v56, 1  ;;  %v689_v37 = vrot.slane %v2009_v60, 1 }
  0x5b   : > { %v684_v8 = vsel %vm645_vm0, %v682_v3, %v683_v5  ;;  %v496_v3 = vshll.u32 %v2466_v58, 16 }
  0x5c   : > { %950 = vrot.lane.b32.xlu1 %v681_v41, %s2110_s5 }
  0x5d   : > { %934 = vrot.lane.b32.xlu0 %v657_v42, %s2110_s5  ;;  %v498_v16 = vrot.slane %v496_v3, 1  ;;  %v2522_v3 = vld [vmem:[%s2198_s7 + $0xb4] sm:$0xff]  }
  0x60   : > { %635 = vrot.lane.b32.xlu1 %v564_v33, %s2105_s10 }
  0x61   : > { %619 = vrot.lane.b32.xlu0 %v468_v35, %s2105_s10 }
  0x64   : > { %714 = vrot.lane.b32.xlu1 %v2297_v11, %s2104_s9  ;;  %v660_v11 = vsel %vm645_vm0, %v658_v6, %v659_v7  ;;  %v590_v6 = vshrl.u32 %v2460_v56, 16  ;;  %v594_v7 = vrot.slane %v592_v61, 1 }
  0x65   : > { %698 = vrot.lane.b32.xlu0 %v2301_v13, %s2104_s9  ;;  %v2399_v13 = vld [vmem:[%s2198_s7 + $0x3c] sm:$0xff]  }
  0x66   : > { %v484_v18 = vshll.u32 %v2399_v13, 16  ;;  %v482_v22 = vshrl.u32 %v2399_v13, 16  ;;  %v661_v40 = vrot.slane %v2399_v13, 1  ;;  %v595_v19 = vor.u32 %v594_v7, %v590_v6 }
  0x68   : > { %716 = vrot.lane.b32.xlu1 %v681_v41, %s2104_s9  ;;  %v486_v24 = vrot.slane %v484_v18, 1 }
  0x69   : > { %700 = vrot.lane.b32.xlu0 %v657_v42, %s2104_s9 }
  0x6a   : > { %v487_v28 = vor.u32 %v486_v24, %v482_v22  ;;  %v499_v22 = vor.u32 %v498_v16, %v494_v15 }
  0x6c   : > { %751 = vrot.lane.b32.xlu1 %v2294_v10, %s2103_s8 }
  0x6d   : > { %735 = vrot.lane.b32.xlu0 %v2304_v14, %s2103_s8 }
  0x70   : > { %753 = vrot.lane.b32.xlu1 %v2360_v43, %s2103_s8 }
  0x71   : > { %737 = vrot.lane.b32.xlu0 %v2365_v44, %s2103_s8 }
  0x74   : > { %798 = vrot.lane.b32.xlu1 %v564_v33, %s2106_s11  ;;  %v492_v33 = vsel %vm420_vm1, %v487_v28, %v491_v29 }
  0x75   : > { %782 = vrot.lane.b32.xlu0 %v468_v35, %s2106_s11 }
  0x78   : > { %800 = vrot.lane.b32.xlu1 %v576_v62, %s2106_s11 }
  0x79   : > { %784 = vrot.lane.b32.xlu0 %v480_v63, %s2106_s11 }
  0x7c   : > { %833 = vrot.lane.b32.xlu1 %v681_v41, %s2107_s12  ;;  %v662_v41 = vrot.slane %v2006_v17, 1 }
  0x7d   : > { %817 = vrot.lane.b32.xlu0 %v657_v42, %s2107_s12 }
  0x7e   : > { %v2445_v49 = vsel %vm645_vm0, %v661_v40, %v662_v41 }
  0x80   : > { %835 = vrot.lane.b32.xlu1 %v684_v8, %s2107_s12 }
  0x81   : > { %819 = vrot.lane.b32.xlu0 %v660_v11, %s2107_s12 }
  0x84   : > { %870 = vrot.lane.b32.xlu1 %v2360_v43, %s2108_s13 }
  0x85   : > { %854 = vrot.lane.b32.xlu0 %v2365_v44, %s2108_s13 }
  0x88   : > { %872 = vrot.lane.b32.xlu1 %v2394_v9, %s2108_s13 }
  0x89   : > { %856 = vrot.lane.b32.xlu0 %v2399_v13, %s2108_s13 }
  0x8c   : > { %917 = vrot.lane.b32.xlu1 %v576_v62, %s2109_s26 }
  0x8d   : > { %901 = vrot.lane.b32.xlu0 %v480_v63, %s2109_s26 }
  0x8e   : > { %v2418_v30 = vpop.permute.xlu1 %747 }
  0x8f   : > { %v2422_v32 = vpop.permute.xlu0 %731 }
  0x90   : > { %919 = vrot.lane.b32.xlu1 %v588_v31, %s2109_s26 }
  0x91   : > { %903 = vrot.lane.b32.xlu0 %v492_v33, %s2109_s26 }
  0x92   : > { %v2427_v34 = vpop.permute.xlu1 %710 }
  0x93   : > { %v2429_v35 = vpop.permute.xlu0 %694 }
  0x94   : > { %952 = vrot.lane.b32.xlu1 %v684_v8, %s2110_s5 }
  0x95   : > { %936 = vrot.lane.b32.xlu0 %v660_v11, %s2110_s5 }
  0x96   : > { %v2434_v38 = vpop.permute.xlu1 %712 }
  0x97   : > { %v2437_v42 = vpop.permute.xlu0 %696 }
  0x98   : > { %637 = vrot.lane.b32.xlu1 %v576_v62, %s2105_s10 }
  0x99   : > { %621 = vrot.lane.b32.xlu0 %v480_v63, %s2105_s10  ;;  %v2010_v63 = vld [vmem:[%s2198_s7 + $0x50] ss:$0 sps:$4 sm:$0x11]  }
  0x9a   : > { %v2442_v47 = vpop.permute.xlu1 %615  ;;  %v501_v17 = vshll.u32 %v2010_v63, 16  ;;  %v665_v40 = vrot.slane %v2010_v63, 1 }
  0x9b   : > { %v614_v50 = vpop.permute.xlu0 %613 }
  0x9c   : > { %954 = vrot.lane.b32.xlu1 %v687_v45, %s2110_s5  ;;  %v503_v24 = vrot.slane %v501_v17, 1  ;;  %v966_v6 = vsel %vm964_vm3, %v2215_v4, %v614_v50 }
  0x9d   : > { %938 = vrot.lane.b32.xlu0 %v2445_v49, %s2110_s5  ;;  %v999_v4 = vsel %vm997_vm4, %v966_v6, %v2429_v35  ;;  %v2551_v35 = vld [vmem:[%s2198_s7 + $0x5c] ss:$0 sps:$4 sm:$0x11]  }
  0x9e   : > { %v2450_v52 = vpop.permute.xlu1 %631  ;;  %v2503_v28 = vsel %vm420_vm1, %v499_v22, %v503_v24  ;;  %v602_v22 = vshrl.u32 %v2522_v3, 16 }
  0x9f   : > { %v630_v53 = vpop.permute.xlu0 %629 }
  0xa0   : > { %639 = vrot.lane.b32.xlu1 %v588_v31, %s2105_s10  ;;  %v982_v41 = vsel %vm964_vm3, %v2211_v2, %v630_v53 }
  0xa1   : > { %623 = vrot.lane.b32.xlu0 %v492_v33, %s2105_s10  ;;  %v1015_v53 = vsel %vm997_vm4, %v982_v41, %v2427_v34  ;;  %v604_v34 = vshll.u32 %v2522_v3, 16 }
  0xa2   : > { %v2454_v54 = vpop.permute.xlu1 %749  ;;  %v1048_v50 = vsel %vm1030_vm6, %v1015_v53, %v2418_v30  ;;  %v513_v53 = vshll.u32 %v2551_v35, 16 }
  0xa3   : > { %v2456_v55 = vpop.permute.xlu0 %733 }
  0xa4   : > { %718 = vrot.lane.b32.xlu1 %v684_v8, %s2104_s9  ;;  %v597_v8 = vshll.u32 %v2009_v60, 16  ;;  %v2519_v60 = vsel %vm645_vm0, %v688_v36, %v689_v37  ;;  %v606_v36 = vrot.slane %v604_v34, 1 }
  0xa5   : > { %702 = vrot.lane.b32.xlu0 %v660_v11, %s2104_s9 }
  0xa6   : > { %v2463_v57 = vpop.permute.xlu1 %794  ;;  %v599_v20 = vrot.slane %v597_v8, 1 }
  0xa7   : > { %v2468_v59 = vpop.permute.xlu0 %778  ;;  %v1081_v16 = vsel %vm1063_vm5, %v1048_v50, %v2463_v57 }
  0xa8   : > { %720 = vrot.lane.b32.xlu1 %v687_v45, %s2104_s9  ;;  %v2499_v26 = vsel %vm420_vm1, %v595_v19, %v599_v20  ;;  %v1032_v19 = vsel %vm1030_vm6, %v999_v4, %v2422_v32  ;;  %v984_v32 = vsel %vm964_vm3, %v2201_v0, %v2450_v52  ;;  %v968_v0 = vsel %vm964_vm3, %v2204_v1, %v2442_v47 }
  0xa9   : > { %704 = vrot.lane.b32.xlu0 %v2445_v49, %s2104_s9  ;;  %v1065_v57 = vsel %vm1063_vm5, %v1032_v19, %v2468_v59  ;;  %v607_v4 = vor.u32 %v606_v36, %v602_v22  ;;  %v1001_v47 = vsel %vm997_vm4, %v968_v0, %v2437_v42 }
  0xaa   : > { %v2475_v62 = vpop.permute.xlu1 %796 }
  0xab   : > { %v2479_v5 = vpop.permute.xlu0 %780 }
  0xac   : > { %755 = vrot.lane.b32.xlu1 %v2394_v9, %s2103_s8 }
  0xad   : > { %739 = vrot.lane.b32.xlu0 %v2399_v13, %s2103_s8 }
  0xae   : > { %v830_v11 = vpop.permute.xlu1 %829 }
  0xaf   : > { %v2487_v18 = vpop.permute.xlu0 %813  ;;  %v1114_v20 = vsel %vm1096_vm7, %v1081_v16, %v830_v11  ;;  %v515_v16 = vrot.slane %v513_v53, 1  ;;  %v2018_v53 = vld [vmem:[%s2198_s7 + $0xc0] sm:$0xff]  }
  0xb0   : > { %757 = vrot.lane.b32.xlu1 %v2460_v56, %s2103_s8  ;;  %v1098_v11 = vsel %vm1096_vm7, %v1065_v57, %v2487_v18 }
  0xb1   : > { %741 = vrot.lane.b32.xlu0 %v2466_v58, %s2103_s8 }
  0xb2   : > { %v2493_v21 = vpop.permute.xlu1 %831 }
  0xb3   : > { %v2495_v25 = vpop.permute.xlu0 %815 }
  0xb4   : > { %802 = vrot.lane.b32.xlu1 %v588_v31, %s2106_s11 }
  0xb5   : > { %786 = vrot.lane.b32.xlu0 %v492_v33, %s2106_s11  ;;  %v664_v33 = vrot.slane %v2466_v58, 1 }
  0xb6   : > { %v867_v27 = vpop.permute.xlu1 %866 }
  0xb7   : > { %v851_v29 = vpop.permute.xlu0 %850  ;;  %v2531_v7 = vsel %vm645_vm0, %v664_v33, %v665_v40  ;;  %v1147_v24 = vsel %vm1129_vm8, %v1114_v20, %v867_v27 }
  0xb8   : > { %804 = vrot.lane.b32.xlu1 %v2499_v26, %s2106_s11  ;;  %v1131_v27 = vsel %vm1129_vm8, %v1098_v11, %v851_v29  ;;  %v1017_v29 = vsel %vm997_vm4, %v984_v32, %v2434_v38 }
  0xb9   : > { %788 = vrot.lane.b32.xlu0 %v2503_v28, %s2106_s11  ;;  %v1050_v50 = vsel %vm1030_vm6, %v1017_v29, %v2454_v54  ;;  %v769_v29 = vshll.u32 %v2018_v53, 16 }
  0xba   : > { %v2510_v31 = vpop.permute.xlu1 %868  ;;  %v1083_v38 = vsel %vm1063_vm5, %v1050_v50, %v2475_v62 }
  0xbb   : > { %v2515_v61 = vpop.permute.xlu0 %852  ;;  %v1116_v54 = vsel %vm1096_vm7, %v1083_v38, %v2493_v21 }
  0xbc   : > { %837 = vrot.lane.b32.xlu1 %v687_v45, %s2107_s12  ;;  %v2534_v45 = vld [vmem:[%s2198_s7 + $0x54] sm:$0xff]   ;;  %v1149_v42 = vsel %vm1129_vm8, %v1116_v54, %v2510_v31 }
  0xbd   : > { %821 = vrot.lane.b32.xlu0 %v2445_v49, %s2107_s12  ;;  %v2541_v49 = vld [vmem:[%s2198_s7 + $0xbc] ss:$0 sps:$4 sm:$0x11]   ;;  %v508_v17 = vshll.u32 %v2534_v45, 16  ;;  %v506_v59 = vshrl.u32 %v2534_v45, 16  ;;  %v667_v11 = vrot.slane %v2534_v45, 1 }
  0xbe   : > { %v914_v63 = vpop.permute.xlu1 %913  ;;  %v609_v37 = vshll.u32 %v2541_v49, 16 }
  0xbf   : > { %v898_v8 = vpop.permute.xlu0 %897  ;;  %v1180_v33 = vsel %vm1162_vm9, %v1147_v24, %v914_v63  ;;  %v510_v6 = vrot.slane %v508_v17, 1  ;;  %v1034_v17 = vsel %vm1030_vm6, %v1001_v47, %v2456_v55 }
  0xc0   : > { %839 = vrot.lane.b32.xlu1 %v2519_v60, %s2107_s12  ;;  %v1164_v52 = vsel %vm1162_vm9, %v1131_v27, %v898_v8  ;;  %v611_v34 = vrot.slane %v609_v37, 1  ;;  %v1067_v20 = vsel %vm1063_vm5, %v1034_v17, %v2479_v5  ;;  %v692_v37 = vrot.slane %v2541_v49, 1 }
  0xc1   : > { %823 = vrot.lane.b32.xlu0 %v2531_v7, %s2107_s12  ;;  %v511_v8 = vor.u32 %v510_v6, %v506_v59  ;;  %v1100_v22 = vsel %vm1096_vm7, %v1067_v20, %v2495_v25 }
  0xc2   : > { %v916_v15 = vpop.permute.xlu1 %915  ;;  %v612_v62 = vsel %vm420_vm1, %v607_v4, %v611_v34  ;;  %v1133_v57 = vsel %vm1129_vm8, %v1100_v22, %v2515_v61  ;;  %v771_v34 = vrot.slane %v769_v29, 1  ;;  %v810_v22 = vrot.slane %v2018_v53, 1 }
  0xc3   : > { %v900_v30 = vpop.permute.xlu0 %899  ;;  %v1182_v55 = vsel %vm1162_vm9, %v1149_v42, %v916_v15  ;;  %v516_v5 = vsel %vm420_vm1, %v511_v8, %v515_v16 }
  0xc4   : > { %874 = vrot.lane.b32.xlu1 %v2460_v56, %s2108_s13  ;;  %v1166_v31 = vsel %vm1162_vm9, %v1133_v57, %v900_v30  ;;  %v691_v30 = vrot.slane %v2522_v3, 1 }
  0xc5   : > { %858 = vrot.lane.b32.xlu0 %v2466_v58, %s2108_s13 }
  0xc6   : > { %v949_v40 = vpop.permute.xlu1 %948  ;;  %v693_v59 = vsel %vm645_vm0, %v691_v30, %v692_v37  ;;  %v2701_v30 = vld [vmem:[%s2198_s7 + $0xd4] ss:$0 sps:$4 sm:$0x11]  }
  0xc7   : > { %v1213_v41 = vsel %vm1195_vm10, %v1180_v33, %v949_v40  ;;  %v933_v18 = vpop.permute.xlu0 %932  ;;  %v668_v33 = vrot.slane %v2551_v35, 1 }
  0xc8   : > { %876 = vrot.lane.b32.xlu1 %v2522_v3, %s2108_s13  ;;  %1894 = vmatprep.mubr.msk.bf16.mxu1 %vm1248_vm11, %v1213_v41  ;;  %v1197_v63 = vsel %vm1195_vm10, %v1164_v52, %v933_v18  ;;  %v2019_v18 = vld [vmem:[%s2198_s7 + $0xc8] ss:$0 sps:$4 sm:$0x11]  }
  0xc9   : > { %860 = vrot.lane.b32.xlu0 %v2534_v45, %s2108_s13  ;;  %1878 = vmatprep.mubr.msk.bf16.mxu0 %vm1248_vm11, %v1197_v63  ;;  %v669_v27 = vsel %vm645_vm0, %v667_v11, %v668_v33  ;;  %v774_v50 = vshll.u32 %v2019_v18, 16 }
  0xca   : > { %v2591_v1 = vpop.permute.xlu1 %633 }
  0xcb   : > { %v2601_v19 = vpop.permute.xlu0 %617  ;;  %v776_v8 = vrot.slane %v774_v50, 1 }
  0xcc   : > { %921 = vrot.lane.b32.xlu1 %v2499_v26, %s2109_s26  ;;  %v970_v11 = vsel %vm964_vm3, %v2252_v46, %v2601_v19 }
  0xcd   : > { %905 = vrot.lane.b32.xlu0 %v2503_v28, %s2109_s26 }
  0xce   : > { %v951_v21 = vpop.permute.xlu1 %950 }
  0xcf   : > { %v1215_v24 = vsel %vm1195_vm10, %v1182_v55, %v951_v21  ;;  %v935_v36 = vpop.permute.xlu0 %934  ;;  %v811_v55 = vrot.slane %v2019_v18, 1 }
  0xd0   : > { %923 = vrot.lane.b32.xlu1 %v612_v62, %s2109_s26  ;;  %1895 = vmatmul.mubr.msk.bf16.vlgmr.msra.gmra.mrb[0].mxu1 %vm1248_vm11, %v1215_v24  ;;  %v1199_v25 = vsel %vm1195_vm10, %v1166_v31, %v935_v36  ;;  %v2691_v24 = vld [vmem:[%s2198_s7 + $0xcc] sm:$0xff]   ;;  %v986_v31 = vsel %vm964_vm3, %v2246_v39, %v2591_v1 }
  0xd1   : > { %907 = vrot.lane.b32.xlu0 %v516_v5, %s2109_s26  ;;  %1879 = vmatmul.mubr.msk.bf16.vlgmr.msra.gmra.mrb[0].mxu0 %vm1248_vm11, %v1199_v25  ;;  %v888_v37 = vshll.u32 %v2691_v24, 16  ;;  %v886_v46 = vshrl.u32 %v2691_v24, 16 }
  0xd2   : > { %v2625_v15 = vpop.permute.xlu1 %635 }
  0xd3   : > { %v2627_v61 = vpop.permute.xlu0 %619  ;;  %v890_v29 = vrot.slane %v888_v37, 1 }
  0xd4   : > { %956 = vrot.lane.b32.xlu1 %v2519_v60, %s2110_s5 }
  0xd5   : > { %940 = vrot.lane.b32.xlu0 %v2531_v7, %s2110_s5 }
  0xd6   : > { %v715_v32 = vpop.permute.xlu1 %714 }
  0xd7   : > { %v2637_v40 = vpop.permute.xlu0 %698  ;;  %v1019_v25 = vsel %vm997_vm4, %v986_v31, %v715_v32 }
  0xd8   : > { %641 = vrot.lane.b32.xlu1 %v2499_v26, %s2105_s10  ;;  %v1003_v1 = vsel %vm997_vm4, %v970_v11, %v2637_v40 }
  0xd9   : > { %625 = vrot.lane.b32.xlu0 %v2503_v28, %s2105_s10 }
  0xda   : > { %v2644_v49 = vpop.permute.xlu1 %716 }
  0xdb   : > { %v2647_v41 = vpop.permute.xlu0 %700 }
  0xdc   : > { %958 = vrot.lane.b32.xlu1 %v693_v59, %s2110_s5 }
  0xdd   : > { %942 = vrot.lane.b32.xlu0 %v669_v27, %s2110_s5 }
  0xde   : > { %v752_v35 = vpop.permute.xlu1 %751 }
  0xdf   : > { %v736_v6 = vpop.permute.xlu0 %735  ;;  %v1052_v33 = vsel %vm1030_vm6, %v1019_v25, %v752_v35  ;;  %v930_v25 = vrot.slane %v2701_v30, 1 }
  0xe0   : > { %643 = vrot.lane.b32.xlu1 %v612_v62, %s2105_s10  ;;  %v1036_v32 = vsel %vm1030_vm6, %v1003_v1, %v736_v6 }
  0xe1   : > { %627 = vrot.lane.b32.xlu0 %v516_v5, %s2105_s10 }
  0xe2   : > { %v2653_v26 = vpop.permute.xlu1 %753 }
  0xe3   : > { %v2655_v28 = vpop.permute.xlu0 %737 }
  0xe4   : > { %722 = vrot.lane.b32.xlu1 %v2519_v60, %s2104_s9  ;;  %v767_v60 = vshrl.u32 %v2018_v53, 16 }
  0xe5   : > { %706 = vrot.lane.b32.xlu0 %v2531_v7, %s2104_s9 }
  0xe6   : > { %v799_v0 = vpop.permute.xlu1 %798  ;;  %v772_v38 = vor.u32 %v771_v34, %v767_v60  ;;  %v893_v60 = vshll.u32 %v2701_v30, 16 }
  0xe7   : > { %v783_v52 = vpop.permute.xlu0 %782 }
  0xe8   : > { %724 = vrot.lane.b32.xlu1 %v693_v59, %s2104_s9  ;;  %v777_v54 = vsel %vm420_vm1, %v772_v38, %v776_v8  ;;  %v1069_v19 = vsel %vm1063_vm5, %v1036_v32, %v783_v52  ;;  %v988_v52 = vsel %vm964_vm3, %v2294_v10, %v2625_v15  ;;  %v891_v38 = vor.u32 %v890_v29, %v886_v46  ;;  %v2022_v15 = vld [vmem:[%s2198_s7 + $0x6c] sm:$0xff]   ;;  %s1852_s7 = sshll.u32 %s2093_s18, 12 }
  0xe9   : > { %708 = vrot.lane.b32.xlu0 %v669_v27, %s2104_s9  ;;  %v895_v8 = vrot.slane %v893_v60, 1 }
  0xea   : > { %v2665_v63 = vpop.permute.xlu1 %800 }
  0xeb   : > { %v2667_v4 = vpop.permute.xlu0 %784  ;;  %v896_v31 = vsel %vm420_vm1, %v891_v38, %v895_v8 }
  0xec   : > { %759 = vrot.lane.b32.xlu1 %v2522_v3, %s2103_s8 }
  0xed   : > { %743 = vrot.lane.b32.xlu0 %v2534_v45, %s2103_s8 }
  0xee   : > { %v834_v7 = vpop.permute.xlu1 %833 }
  0xef   : > { %v818_v47 = vpop.permute.xlu0 %817 }
  0xf0   : > { %761 = vrot.lane.b32.xlu1 %v2018_v53, %s2103_s8  ;;  %v1102_v40 = vsel %vm1096_vm7, %v1069_v19, %v818_v47 }
  0xf1   : > { %745 = vrot.lane.b32.xlu0 %v2211_v2, %s2103_s8  ;;  %s218_s8 = sand.u32 1, %s2085_s16  }
  0xf2   : > { %v2676_v16 = vpop.permute.xlu1 %835  ;;  %s2876_s14 = sshll.u32 %s218_s8, 8  ;;  %s3045_s18 = scalar_lea.sflag [#allocation3], %s218_s8 }
  0xf3   : > { %v2678_v17 = vpop.permute.xlu0 %819 }
  0xf4   : > { %806 = vrot.lane.b32.xlu1 %v612_v62, %s2106_s11  ;;  %v2688_v62 = vsel %vm645_vm0, %v810_v22, %v811_v55 }
  0xf5   : > { %790 = vrot.lane.b32.xlu0 %v516_v5, %s2106_s11 }
  0xf6   : > { %v871_v20 = vpop.permute.xlu1 %870 }
  0xf7   : > { %v855_v42 = vpop.permute.xlu0 %854 }
  0xf8   : > { %808 = vrot.lane.b32.xlu1 %v777_v54, %s2106_s11 }
  0xf9   : > { %792 = vrot.lane.b32.xlu0 %v2262_v51, %s2106_s11  ;;  %s2900_s11 = scalar_lea.vmem [#allocation2], %s2876_s14  ;;  %s3037_s14 = scalar_lea.hbm %s3096_s4, %s1852_s7 }
  0xfa   : > { %v873_v21 = vpop.permute.xlu1 %872  ;;  %s1693_s10 = sshll.u32 %s2900_s11, 4  ;;  %s3040_s10 = int_to_ptr.vmem [resolvable:$true] %s1693_s10 }
  0xfb   : > { %v857_v57 = vpop.permute.xlu0 %856  ;;  %s2023_s21 = scalar_lea.vmem %s3040_s10, 4096  ;;  %p2030_p1 = scmp.lt.s32.totalorder %s3040_s10, %s2028_s24 }
  0xfc   : > { %841 = vrot.lane.b32.xlu1 %v693_v59, %s2107_s12  ;;  %v1085_v59 = vsel %vm1063_vm5, %v1052_v33, %v799_v0  ;;  %p2024_p12 = scmp.ne.s32.totalorder %s3040_s10, %s2023_s21 }
  0xfd   : > { %825 = vrot.lane.b32.xlu0 %v669_v27, %s2107_s12  ;;  %v1118_v27 = vsel %vm1096_vm7, %v1085_v59, %v834_v7 }
  0xfe   : > { %v918_v5 = vpop.permute.xlu1 %917  ;;  %v1151_v35 = vsel %vm1129_vm8, %v1118_v27, %v871_v20  ;;  %v972_v20 = vsel %vm964_vm3, %v2304_v14, %v2627_v61  ;;  %p2025_p13 = pnand %p2024_p12, %p2178_p4 }
  0xff   : > { %v902_v36 = vpop.permute.xlu0 %901  ;;  %v1184_v0 = vsel %vm1162_vm9, %v1151_v35, %v918_v5 }
 0x100   : > { %843 = vrot.lane.b32.xlu1 %v2688_v62, %s2107_s12  ;;  %p2026_p0 = pneg %p2025_p13 }
 0x101   : > { %827 = vrot.lane.b32.xlu0 %v2224_v12, %s2107_s12 }
 0x102   : > { %v920_v39 = vpop.permute.xlu1 %919 }
 0x103   : > { %v904_v18 = vpop.permute.xlu0 %903 }
 0x104   : > { %878 = vrot.lane.b32.xlu1 %v2018_v53, %s2108_s13  ;;  %v1135_v53 = vsel %vm1129_vm8, %v1102_v40, %v855_v42 }
 0x105   : > { %862 = vrot.lane.b32.xlu0 %v2211_v2, %s2108_s13  ;;  %v1168_v50 = vsel %vm1162_vm9, %v1135_v53, %v902_v36  ;;  %v1021_v2 = vsel %vm997_vm4, %v988_v52, %v2644_v49  ;;  %v1005_v49 = vsel %vm997_vm4, %v972_v20, %v2647_v41 }
 0x106   : > { %v953_v6 = vpop.permute.xlu1 %952  ;;  %v1054_v10 = vsel %vm1030_vm6, %v1021_v2, %v2653_v26  ;;  %v1038_v55 = vsel %vm1030_vm6, %v1005_v49, %v2655_v28 }
 0x107   : > { %v1217_v34 = vsel %vm1195_vm10, %v1184_v0, %v953_v6  ;;  %v937_v7 = vpop.permute.xlu0 %936  ;;  %v1087_v22 = vsel %vm1063_vm5, %v1054_v10, %v2665_v63  ;;  %v1071_v26 = vsel %vm1063_vm5, %v1038_v55, %v2667_v4 }
 0x108   : > { %880 = vrot.lane.b32.xlu1 %v2691_v24, %s2108_s13  ;;  %1898 = vmatprep.mubr.msk.bf16.mxu1 %vm1248_vm11, %v1217_v34  ;;  %v1201_v47 = vsel %vm1195_vm10, %v1168_v50, %v937_v7  ;;  %v1120_v14 = vsel %vm1096_vm7, %v1087_v22, %v2676_v16  ;;  %v1104_v41 = vsel %vm1096_vm7, %v1071_v26, %v2678_v17  ;;  %v929_v17 = vrot.slane %v2691_v24, 1 }
 0x109   : > { %864 = vrot.lane.b32.xlu0 %v2022_v15, %s2108_s13  ;;  %1882 = vmatprep.mubr.msk.bf16.mxu0 %vm1248_vm11, %v1201_v47  ;;  %v1153_v5 = vsel %vm1129_vm8, %v1120_v14, %v873_v21  ;;  %v1137_v16 = vsel %vm1129_vm8, %v1104_v41, %v857_v57 }
 0x10a   : > { %v638_v42 = vpop.permute.xlu1 %637  ;;  %v1186_v63 = vsel %vm1162_vm9, %v1153_v5, %v920_v39  ;;  %v1170_v36 = vsel %vm1162_vm9, %v1137_v16, %v904_v18  ;;  %v931_v37 = vsel %vm645_vm0, %v929_v17, %v930_v25 }
 0x10b   : > { %v622_v61 = vpop.permute.xlu0 %621 }
 0x10c   : > { %925 = vrot.lane.b32.xlu1 %v777_v54, %s2109_s26  ;;  %v974_v52 = vsel %vm964_vm3, %v2365_v44, %v622_v61 }
 0x10d   : > { %909 = vrot.lane.b32.xlu0 %v2262_v51, %s2109_s26 }
 0x10e   : > { %v955_v28 = vpop.permute.xlu1 %954 }
 0x10f   : > { %v1219_v54 = vsel %vm1195_vm10, %v1186_v63, %v955_v28  ;;  %v939_v4 = vpop.permute.xlu0 %938 }
 0x110   : > { %927 = vrot.lane.b32.xlu1 %v896_v31, %s2109_s26  ;;  %1899 = vmatmul.mubr.msk.bf16.gmra.mrb[4].mxu1 %vm1248_vm11, %v1219_v54  ;;  %v1203_v21 = vsel %vm1195_vm10, %v1170_v36, %v939_v4 }
 0x111   : > { %911 = vrot.lane.b32.xlu0 %v2257_v48, %s2109_s26  ;;  %1883 = vmatmul.mubr.msk.bf16.gmra.mrb[4].mxu0 %vm1248_vm11, %v1203_v21  ;;  %s2029_s26 = scalar_lea.vmem %s2028_s24, 8192 }
 0x112   : > { %v640_v51 = vpop.permute.xlu1 %639  ;;  %p2031_p2 = scmp.lt.s32.totalorder %s2029_s26, %s2023_s21 }
 0x113   : > { %v624_v57 = vpop.permute.xlu0 %623  ;;  %v992_v55 = vsel %vm964_vm3, %v2394_v9, %v640_v51 }
 0x114   : > { %960 = vrot.lane.b32.xlu1 %v2688_v62, %s2110_s5  ;;  %v976_v31 = vsel %vm964_vm3, %v2399_v13, %v624_v57  ;;  %p2032_p3 = por %p2031_p2, %p2030_p1 }
 0x115   : > { %944 = vrot.lane.b32.xlu0 %v2224_v12, %s2110_s5 }
 0x116   : > { %v719_v11 = vpop.permute.xlu1 %718  ;;  %p2033_p5 = pnand %p2032_p3, %p2026_p0 }
 0x117   : > { %v703_v33 = vpop.permute.xlu0 %702 }
 0x118   : > { %962 = vrot.lane.b32.xlu1 %v931_v37, %s2110_s5  ;;  %v1007_v2 = vsel %vm997_vm4, %v974_v52, %v703_v33 }
 0x119   : > { %946 = vrot.lane.b32.xlu0 %v2236_v23, %s2110_s5  ;;  %v990_v23 = vsel %vm964_vm3, %v2360_v43, %v638_v42 }
 0x11a   : > { %v721_v48 = vpop.permute.xlu1 %720  ;;  %v1023_v34 = vsel %vm997_vm4, %v990_v23, %v719_v11 }
 0x11b   : > { %v705_v24 = vpop.permute.xlu0 %704  ;;  %v1025_v26 = vsel %vm997_vm4, %v992_v55, %v721_v48 }
 0x11c   : > { %v1009_v28 = vsel %vm997_vm4, %v976_v31, %v705_v24 }
 0x11e   : > { %v756_v30 = vpop.permute.xlu1 %755 }
 0x11f   : > { %v740_v39 = vpop.permute.xlu0 %739  ;;  %v1056_v50 = vsel %vm1030_vm6, %v1023_v34, %v756_v30 }
 0x120   : > { %v1040_v38 = vsel %vm1030_vm6, %v1007_v2, %v740_v39 }
 0x122   : > { %v758_v1 = vpop.permute.xlu1 %757 }
 0x123   : > { %v742_v59 = vpop.permute.xlu0 %741  ;;  %v1058_v41 = vsel %vm1030_vm6, %v1025_v26, %v758_v1 }
 0x124   : > { %v1042_v16 = vsel %vm1030_vm6, %v1009_v28, %v742_v59 }
 0x126   : > { %v803_v32 = vpop.permute.xlu1 %802 }
 0x127   : > { %v787_v62 = vpop.permute.xlu0 %786  ;;  %v1089_v47 = vsel %vm1063_vm5, %v1056_v50, %v803_v32 }
 0x128   : > { %v1073_v43 = vsel %vm1063_vm5, %v1040_v38, %v787_v62 }
 0x12a   : > { %v805_v27 = vpop.permute.xlu1 %804 }
 0x12b   : > { %v789_v18 = vpop.permute.xlu0 %788  ;;  %v1091_v9 = vsel %vm1063_vm5, %v1058_v41, %v805_v27 }
 0x12c   : > { %v1075_v4 = vsel %vm1063_vm5, %v1042_v16, %v789_v18 }
 0x12e   : > { %v838_v46 = vpop.permute.xlu1 %837 }
 0x12f   : > { %v822_v19 = vpop.permute.xlu0 %821  ;;  %v1122_v8 = vsel %vm1096_vm7, %v1089_v47, %v838_v46 }
 0x130   : > { %v1106_v15 = vsel %vm1096_vm7, %v1073_v43, %v822_v19 }
 0x132   : > { %v840_v12 = vpop.permute.xlu1 %839 }
 0x133   : > { %v824_v35 = vpop.permute.xlu0 %823  ;;  %v1124_v54 = vsel %vm1096_vm7, %v1091_v9, %v840_v12 }
 0x134   : > { %v1108_v13 = vsel %vm1096_vm7, %v1075_v4, %v824_v35 }
 0x136   : > { %v875_v29 = vpop.permute.xlu1 %874 }
 0x137   : > { %v859_v60 = vpop.permute.xlu0 %858  ;;  %v1155_v10 = vsel %vm1129_vm8, %v1122_v8, %v875_v29 }
 0x138   : > { %v1139_v49 = vsel %vm1129_vm8, %v1106_v15, %v859_v60 }
 0x13a   : > { %v877_v40 = vpop.permute.xlu1 %876 }
 0x13b   : > { %v861_v0 = vpop.permute.xlu0 %860  ;;  %v1157_v21 = vsel %vm1129_vm8, %v1124_v54, %v877_v40 }
 0x13c   : > { %v1141_v51 = vsel %vm1129_vm8, %v1108_v13, %v861_v0 }
 0x13e   : > { %v922_v6 = vpop.permute.xlu1 %921 }
 0x13f   : > { %v906_v53 = vpop.permute.xlu0 %905  ;;  %v1188_v44 = vsel %vm1162_vm9, %v1155_v10, %v922_v6 }
 0x140   : > { %v1172_v14 = vsel %vm1162_vm9, %v1139_v49, %v906_v53 }
 0x142   : > { %v924_v7 = vpop.permute.xlu1 %923 }
 0x143   : > { %v908_v20 = vpop.permute.xlu0 %907  ;;  %v1190_v17 = vsel %vm1162_vm9, %v1157_v21, %v924_v7 }
 0x144   : > { %v1174_v37 = vsel %vm1162_vm9, %v1141_v51, %v908_v20 }
 0x146   : > { %v957_v42 = vpop.permute.xlu1 %956 }
 0x147   : > { %v1221_v22 = vsel %vm1195_vm10, %v1188_v44, %v957_v42  ;;  %v941_v61 = vpop.permute.xlu0 %940 }
 0x148   : > { %1902 = vmatprep.mubr.msk.bf16.mxu1 %vm1248_vm11, %v1221_v22  ;;  %v1205_v5 = vsel %vm1195_vm10, %v1172_v14, %v941_v61 }
 0x149   : > { %1886 = vmatprep.mubr.msk.bf16.mxu0 %vm1248_vm11, %v1205_v5 }
 0x14a   : > { %v642_v63 = vpop.permute.xlu1 %641 }
 0x14b   : > { %v626_v36 = vpop.permute.xlu0 %625  ;;  %v994_v50 = vsel %vm964_vm3, %v2460_v56, %v642_v63 }
 0x14c   : > { %v978_v47 = vsel %vm964_vm3, %v2466_v58, %v626_v36 }
 0x14e   : > { %v959_v25 = vpop.permute.xlu1 %958 }
 0x14f   : > { %v1223_v57 = vsel %vm1195_vm10, %v1190_v17, %v959_v25  ;;  %v943_v11 = vpop.permute.xlu0 %942 }
 0x150   : > { %1903 = vmatmul.mubr.msk.bf16.gmra.mrb[8].mxu1 %vm1248_vm11, %v1223_v57  ;;  %v1207_v33 = vsel %vm1195_vm10, %v1174_v37, %v943_v11  ;;  %v2864_v11 = vld [vmem:[%s3094_s2] ss:$0 sm:$0xff] }
 0x151   : > { %1887 = vmatmul.mubr.msk.bf16.gmra.mrb[8].mxu0 %vm1248_vm11, %v1207_v33 }
 0x152   : > { %v644_v48 = vpop.permute.xlu1 %643 }
 0x153   : > { %v628_v24 = vpop.permute.xlu0 %627  ;;  %v996_v10 = vsel %vm964_vm3, %v2522_v3, %v644_v48  ;;  %v1503_v48 = vld [vmem:[%s3095_s3 + $0x90] sm:$0xff] }
 0x154   : > { %v980_v22 = vsel %vm964_vm3, %v2534_v45, %v628_v24 }
 0x156   : > { %v723_v30 = vpop.permute.xlu1 %722 }
 0x157   : > { %v707_v39 = vpop.permute.xlu0 %706  ;;  %v1027_v2 = vsel %vm997_vm4, %v994_v50, %v723_v30 }
 0x158   : > { %v1011_v20 = vsel %vm997_vm4, %v978_v47, %v707_v39  ;;  %v1501_v39 = vld [vmem:[%s3095_s3 + $0x80] sm:$0xff] }
 0x15a   : > { %v725_v1 = vpop.permute.xlu1 %724 }
 0x15b   : > { %v709_v59 = vpop.permute.xlu0 %708  ;;  %v1029_v42 = vsel %vm997_vm4, %v996_v10, %v725_v1 }
 0x15c   : > { %v1013_v26 = vsel %vm997_vm4, %v980_v22, %v709_v59  ;;  %v1487_v59 = vld [vmem:[%s3095_s3 + $0x10] sm:$0xff] }
 0x15e   : > { %v760_v32 = vpop.permute.xlu1 %759 }
 0x15f   : > { %v744_v62 = vpop.permute.xlu0 %743  ;;  %v1060_v38 = vsel %vm1030_vm6, %v1027_v2, %v760_v32 }
 0x160   : > { %v1044_v15 = vsel %vm1030_vm6, %v1011_v20, %v744_v62 }
 0x162   : > { %v762_v27 = vpop.permute.xlu1 %761 }
 0x163   : > { %v746_v18 = vpop.permute.xlu0 %745  ;;  %v1062_v55 = vsel %vm1030_vm6, %v1029_v42, %v762_v27 }
 0x164   : > { %v1046_v63 = vsel %vm1030_vm6, %v1013_v26, %v746_v18 }
 0x166   : > { %v807_v46 = vpop.permute.xlu1 %806 }
 0x167   : > { %v791_v19 = vpop.permute.xlu0 %790  ;;  %v1093_v43 = vsel %vm1063_vm5, %v1060_v38, %v807_v46 }
 0x168   : > { %v1077_v49 = vsel %vm1063_vm5, %v1044_v15, %v791_v19  ;;  %v1485_v19 = vld [vmem:[%s3095_s3] sm:$0xff] }
 0x16a   : > { %v809_v12 = vpop.permute.xlu1 %808 }
 0x16b   : > { %v793_v35 = vpop.permute.xlu0 %792  ;;  %v1095_v5 = vsel %vm1063_vm5, %v1062_v55, %v809_v12 }
 0x16c   : > { %v1079_v16 = vsel %vm1063_vm5, %v1046_v63, %v793_v35  ;;  %v1504_v35 = vld [vmem:[%s3095_s3 + $0x98] sm:$0xff] }
 0x16e   : > { %v842_v29 = vpop.permute.xlu1 %841 }
 0x16f   : > { %v826_v60 = vpop.permute.xlu0 %825  ;;  %v1126_v56 = vsel %vm1096_vm7, %v1093_v43, %v842_v29  ;;  %v1502_v43 = vld [vmem:[%s3095_s3 + $0x88] sm:$0xff] }
 0x170   : > { %v1110_v14 = vsel %vm1096_vm7, %v1077_v49, %v826_v60  ;;  %v1486_v49 = vld [vmem:[%s3095_s3 + $0x8] sm:$0xff] }
 0x172   : > { %v844_v40 = vpop.permute.xlu1 %843 }
 0x173   : > { %v828_v0 = vpop.permute.xlu0 %827  ;;  %v1128_v28 = vsel %vm1096_vm7, %v1095_v5, %v844_v40 }
 0x174   : > { %v1112_v4 = vsel %vm1096_vm7, %v1079_v16, %v828_v0  ;;  %v1505_v16 = vld [vmem:[%s3095_s3 + $0xa0] sm:$0xff] }
 0x176   : > { %v879_v6 = vpop.permute.xlu1 %878 }
 0x177   : > { %v863_v23 = vpop.permute.xlu0 %862  ;;  %v1159_v58 = vsel %vm1129_vm8, %v1126_v56, %v879_v6  ;;  %v1488_v6 = vld [vmem:[%s3095_s3 + $0x18] sm:$0xff] }
 0x178   : > { %v1143_v31 = vsel %vm1129_vm8, %v1110_v14, %v863_v23 }
 0x17a   : > { %v881_v53 = vpop.permute.xlu1 %880 }
 0x17b   : > { %v865_v34 = vpop.permute.xlu0 %864  ;;  %v1161_v54 = vsel %vm1129_vm8, %v1128_v28, %v881_v53  ;;  %v1507_v28 = vld [vmem:[%s3095_s3 + $0xb0] sm:$0xff] }
 0x17c   : > { %v1145_v17 = vsel %vm1129_vm8, %v1112_v4, %v865_v34 }
 0x17e   : > { %v926_v52 = vpop.permute.xlu1 %925 }
 0x17f   : > { %v910_v7 = vpop.permute.xlu0 %909  ;;  %v1192_v3 = vsel %vm1162_vm9, %v1159_v58, %v926_v52 }
 0x180   : > { %v1176_v45 = vsel %vm1162_vm9, %v1143_v31, %v910_v7 }
 0x182   : > { %v928_v8 = vpop.permute.xlu1 %927 }
 0x183   : > { %v912_v44 = vpop.permute.xlu0 %911  ;;  %v1194_v21 = vsel %vm1162_vm9, %v1161_v54, %v928_v8 }
 0x184   : > { %v1178_v51 = vsel %vm1162_vm9, %v1145_v17, %v912_v44 }
 0x186   : > { %v961_v61 = vpop.permute.xlu1 %960 }
 0x187   : > { %v1225_v41 = vsel %vm1195_vm10, %v1192_v3, %v961_v61  ;;  %v945_v9 = vpop.permute.xlu0 %944 }
 0x188   : > { %1906 = vmatprep.mubr.msk.bf16.mxu1 %vm1248_vm11, %v1225_v41  ;;  %v1209_v36 = vsel %vm1195_vm10, %v1176_v45, %v945_v9 }
 0x189   : > { %1890 = vmatprep.mubr.msk.bf16.mxu0 %vm1248_vm11, %v1209_v36  ;;  %v1491_v36 = vld [vmem:[%s3095_s3 + $0x30] sm:$0xff] }
 0x18a   : > { %v963_v13 = vpop.permute.xlu1 %962 }
 0x18b   : > { %v1227_v25 = vsel %vm1195_vm10, %v1194_v21, %v963_v13  ;;  %v947_v57 = vpop.permute.xlu0 %946 }
 0x18c   : > { %1907 = vmatmul.mubr.msk.bf16.gmra.mrb[12].mxu1 %vm1248_vm11, %v1227_v25  ;;  %v1211_v37 = vsel %vm1195_vm10, %v1178_v51, %v947_v57  ;;  %v1489_v51 = vld [vmem:[%s3095_s3 + $0x20] sm:$0xff] }
 0x18d   : > { %1891 = vmatmul.mubr.msk.bf16.gmra.mrb[12].mxu0 %vm1248_vm11, %v1211_v37  ;;  %v1508_v37 = vld [vmem:[%s3095_s3 + $0xb8] sm:$0xff] }
 0x1a3   : > { %v1896_v33 = vpop.f32.mrb[0].mxu1 }
 0x1a4   : > { %v1471_v24 = vmul.f32 %v1896_v33, %v2864_v11  ;;  %v1383_v30 = vpop.f32.mrb[1].mxu1  ;;  %v1880_v1 = vpop.f32.mrb[0].mxu0 }
 0x1a5   : > { %v1469_v32 = vmul.f32 %v2864_v11, %v1383_v30  ;;  %v1897_v62 = vpop.f32.mrb[2].mxu1  ;;  %v1455_v27 = vmul.f32 %v1880_v1, %v2864_v11  ;;  %v1319_v46 = vpop.f32.mrb[1].mxu0 }
 0x1a6   : > { %v1535_v18 = vadd.f32 %v1503_v48, %v1471_v24  ;;  %v1472_v12 = vmul.f32 %v1897_v62, %v2864_v11  ;;  %v1386_v29 = vpop.f32.mrb[3].mxu1  ;;  %v1453_v60 = vmul.f32 %v2864_v11, %v1319_v46  ;;  %v1881_v0 = vpop.f32.mrb[2].mxu0 }
 0x1a7   : > { %v1533_v40 = vadd.f32 %v1501_v39, %v1469_v32  ;;  %v1470_v23 = vmul.f32 %v2864_v11, %v1386_v29  ;;  %v1519_v53 = vadd.f32 %v1487_v59, %v1455_v27  ;;  %v1456_v52 = vmul.f32 %v1881_v0, %v2864_v11  ;;  %v1322_v50 = vpop.f32.mrb[3].mxu0  ;;  %v1492_v39 = vld [vmem:[%s3095_s3 + $0x38] sm:$0xff] }
 0x1a8   : > { %vm1567_vm12 = vcmp.gt.f32.partialorder %v1535_v18, 0.0  ;;  %v1599_v34 = vmul.f32 0.01, %v1535_v18  ;;  %v1517_v7 = vadd.f32 %v1485_v19, %v1453_v60  ;;  %v1536_v47 = vadd.f32 %v1504_v35, %v1472_v12  ;;  %v1506_v60 = vld [vmem:[%s3095_s3 + $0xa8] sm:$0xff] }
 0x1a9   : > { %vm1565_vm13 = vcmp.gt.f32.partialorder %v1533_v40, 0.0  ;;  %v1597_v2 = vmul.f32 0.01, %v1533_v40  ;;  %vm1551_vm14 = vcmp.gt.f32.partialorder %v1519_v53, 0.0  ;;  %v1583_v38 = vmul.f32 0.01, %v1519_v53 }
 0x1aa   : > { %v1631_v8 = vsel %vm1567_vm12, %v1535_v18, %v1599_v34  ;;  %v1520_v20 = vadd.f32 %v1488_v6, %v1456_v52  ;;  %vm1549_vm15 = vcmp.gt.f32.partialorder %v1517_v7, 0.0  ;;  %v1581_v10 = vmul.f32 0.01, %v1517_v7  ;;  %v1490_v34 = vld [vmem:[%s3095_s3 + $0x28] sm:$0xff] }
 0x1ab   : > { %1663 = vst [vmem:[%s2900_s11 + $0x90] sm:$0xff] %v1631_v8  ;;  %v1629_v15 = vsel %vm1565_vm13, %v1533_v40, %v1597_v2  ;;  %vm1568_vm0 = vcmp.gt.f32.partialorder %v1536_v47, 0.0  ;;  %v1615_v56 = vsel %vm1551_vm14, %v1519_v53, %v1583_v38  ;;  %v1600_v42 = vmul.f32 0.01, %v1536_v47 }
 0x1ac   : > { %1661 = vst [vmem:[%s2900_s11 + $0x80] sm:$0xff] %v1629_v15  ;;  %vm1552_vm1 = vcmp.gt.f32.partialorder %v1520_v20, 0.0  ;;  %v1584_v44 = vmul.f32 0.01, %v1520_v20  ;;  %1647 = vst [vmem:[%s2900_s11 + $0x10] sm:$0xff] %v1615_v56  ;;  %v1613_v58 = vsel %vm1549_vm15, %v1517_v7, %v1581_v10  ;;  %v1454_v22 = vmul.f32 %v2864_v11, %v1322_v50  ;;  %v1511_v56 = vld [vmem:[%s3095_s3 + $0xd0] sm:$0xff] }
 0x1ad   : > { %v1534_v55 = vadd.f32 %v1502_v43, %v1470_v23  ;;  %1645 = vst [vmem:[%s2900_s11] sm:$0xff] %v1613_v58  ;;  %v1632_v3 = vsel %vm1568_vm0, %v1536_v47, %v1600_v42 }
 0x1ae   : > { %v1616_v14 = vsel %vm1552_vm1, %v1520_v20, %v1584_v44  ;;  %1664 = vst [vmem:[%s2900_s11 + $0x98] sm:$0xff] %v1632_v3  ;;  %v1518_v61 = vadd.f32 %v1486_v49, %v1454_v22  ;;  %v1509_v49 = vld [vmem:[%s3095_s3 + $0xc0] sm:$0xff]  ;;  %v1495_v22 = vld [vmem:[%s3095_s3 + $0x50] sm:$0xff] }
 0x1af   : > { %1648 = vst [vmem:[%s2900_s11 + $0x18] sm:$0xff] %v1616_v14  ;;  %vm1566_vm2 = vcmp.gt.f32.partialorder %v1534_v55, 0.0  ;;  %v1598_v26 = vmul.f32 0.01, %v1534_v55 }
 0x1b0   : > { %vm1550_vm3 = vcmp.gt.f32.partialorder %v1518_v61, 0.0  ;;  %v1582_v5 = vmul.f32 0.01, %v1518_v61 }
 0x1b1   : > { %v1630_v31 = vsel %vm1566_vm2, %v1534_v55, %v1598_v26 }
 0x1b2   : > { %1662 = vst [vmem:[%s2900_s11 + $0x88] sm:$0xff] %v1630_v31  ;;  %v1614_v41 = vsel %vm1550_vm3, %v1518_v61, %v1582_v5  ;;  %v1493_v5 = vld [vmem:[%s3095_s3 + $0x40] sm:$0xff] }
 0x1b3   : > { %1646 = vst [vmem:[%s2900_s11 + $0x8] sm:$0xff] %v1614_v41  ;;  %v1512_v41 = vld [vmem:[%s3095_s3 + $0xd8] sm:$0xff] }
 0x1e3   : > { %v1900_v63 = vpop.f32.mrb[4].mxu1 }
 0x1e4   : > { %v1475_v45 = vmul.f32 %v1900_v63, %v2864_v11  ;;  %v1399_v9 = vpop.f32.mrb[5].mxu1  ;;  %v1884_v54 = vpop.f32.mrb[4].mxu0 }
 0x1e5   : > { %v1473_v4 = vmul.f32 %v2864_v11, %v1399_v9  ;;  %v1901_v21 = vpop.f32.mrb[6].mxu1  ;;  %v1459_v13 = vmul.f32 %v1884_v54, %v2864_v11  ;;  %v1335_v25 = vpop.f32.mrb[5].mxu0 }
 0x1e6   : > { %v1539_v17 = vadd.f32 %v1507_v28, %v1475_v45  ;;  %v1476_v57 = vmul.f32 %v1901_v21, %v2864_v11  ;;  %v1402_v33 = vpop.f32.mrb[7].mxu1  ;;  %v1457_v48 = vmul.f32 %v2864_v11, %v1335_v25  ;;  %v1885_v30 = vpop.f32.mrb[6].mxu0 }
 0x1e7   : > { %v1537_v24 = vadd.f32 %v1505_v16, %v1473_v4  ;;  %v1474_v1 = vmul.f32 %v2864_v11, %v1402_v33  ;;  %v1523_v59 = vadd.f32 %v1491_v36, %v1459_v13  ;;  %v1460_v62 = vmul.f32 %v1885_v30, %v2864_v11  ;;  %v1338_v27 = vpop.f32.mrb[7].mxu0  ;;  %v1496_v16 = vld [vmem:[%s3095_s3 + $0x58] sm:$0xff] }
 0x1e8   : > { %vm1571_vm4 = vcmp.gt.f32.partialorder %v1539_v17, 0.0  ;;  %v1603_v32 = vmul.f32 0.01, %v1539_v17  ;;  %v1521_v18 = vadd.f32 %v1489_v51, %v1457_v48  ;;  %v1540_v19 = vadd.f32 %v1508_v37, %v1476_v57  ;;  %v1510_v48 = vld [vmem:[%s3095_s3 + $0xc8] sm:$0xff] }
 0x1e9   : > { %vm1569_vm5 = vcmp.gt.f32.partialorder %v1537_v24, 0.0  ;;  %v1601_v46 = vmul.f32 0.01, %v1537_v24  ;;  %vm1555_vm6 = vcmp.gt.f32.partialorder %v1523_v59, 0.0  ;;  %v1587_v12 = vmul.f32 0.01, %v1523_v59 }
 0x1ea   : > { %v1635_v35 = vsel %vm1571_vm4, %v1539_v17, %v1603_v32  ;;  %v1524_v29 = vadd.f32 %v1492_v39, %v1460_v62  ;;  %vm1553_vm7 = vcmp.gt.f32.partialorder %v1521_v18, 0.0  ;;  %v1585_v40 = vmul.f32 0.01, %v1521_v18  ;;  %v1494_v32 = vld [vmem:[%s3095_s3 + $0x48] sm:$0xff] }
 0x1eb   : > { %1667 = vst [vmem:[%s2900_s11 + $0xb0] sm:$0xff] %v1635_v35  ;;  %v1633_v0 = vsel %vm1569_vm5, %v1537_v24, %v1601_v46  ;;  %vm1572_vm8 = vcmp.gt.f32.partialorder %v1540_v19, 0.0  ;;  %v1619_v6 = vsel %vm1555_vm6, %v1523_v59, %v1587_v12  ;;  %v1604_v53 = vmul.f32 0.01, %v1540_v19 }
 0x1ec   : > { %1665 = vst [vmem:[%s2900_s11 + $0xa0] sm:$0xff] %v1633_v0  ;;  %vm1556_vm9 = vcmp.gt.f32.partialorder %v1524_v29, 0.0  ;;  %v1588_v23 = vmul.f32 0.01, %v1524_v29  ;;  %1651 = vst [vmem:[%s2900_s11 + $0x30] sm:$0xff] %v1619_v6  ;;  %v1617_v52 = vsel %vm1553_vm7, %v1521_v18, %v1585_v40  ;;  %v1458_v50 = vmul.f32 %v2864_v11, %v1338_v27  ;;  %v1515_v6 = vld [vmem:[%s3095_s3 + $0xf0] sm:$0xff] }
 0x1ed   : > { %v1538_v7 = vadd.f32 %v1506_v60, %v1474_v1  ;;  %1649 = vst [vmem:[%s2900_s11 + $0x20] sm:$0xff] %v1617_v52  ;;  %v1636_v47 = vsel %vm1572_vm8, %v1540_v19, %v1604_v53 }
 0x1ee   : > { %v1620_v2 = vsel %vm1556_vm9, %v1524_v29, %v1588_v23  ;;  %1668 = vst [vmem:[%s2900_s11 + $0xb8] sm:$0xff] %v1636_v47  ;;  %v1522_v38 = vadd.f32 %v1490_v34, %v1458_v50  ;;  %v1513_v34 = vld [vmem:[%s3095_s3 + $0xe0] sm:$0xff]  ;;  %v1499_v50 = vld [vmem:[%s3095_s3 + $0x70] sm:$0xff] }
 0x1ef   : > { %1652 = vst [vmem:[%s2900_s11 + $0x38] sm:$0xff] %v1620_v2  ;;  %vm1570_vm10 = vcmp.gt.f32.partialorder %v1538_v7, 0.0  ;;  %v1602_v8 = vmul.f32 0.01, %v1538_v7 }
 0x1f0   : > { %vm1554_vm11 = vcmp.gt.f32.partialorder %v1522_v38, 0.0  ;;  %v1586_v20 = vmul.f32 0.01, %v1522_v38 }
 0x1f1   : > { %v1634_v43 = vsel %vm1570_vm10, %v1538_v7, %v1602_v8 }
 0x1f2   : > { %1666 = vst [vmem:[%s2900_s11 + $0xa8] sm:$0xff] %v1634_v43  ;;  %v1618_v10 = vsel %vm1554_vm11, %v1522_v38, %v1586_v20  ;;  %v1497_v20 = vld [vmem:[%s3095_s3 + $0x60] sm:$0xff] }
 0x1f3   : > { %1650 = vst [vmem:[%s2900_s11 + $0x28] sm:$0xff] %v1618_v10  ;;  %v1516_v10 = vld [vmem:[%s3095_s3 + $0xf8] sm:$0xff] }
 0x223   : > { %v1904_v15 = vpop.f32.mrb[8].mxu1 }
 0x224   : > { %v1479_v44 = vmul.f32 %v1904_v15, %v2864_v11  ;;  %v1415_v42 = vpop.f32.mrb[9].mxu1  ;;  %v1888_v58 = vpop.f32.mrb[8].mxu0 }
 0x225   : > { %v1477_v55 = vmul.f32 %v2864_v11, %v1415_v42  ;;  %v1905_v14 = vpop.f32.mrb[10].mxu1  ;;  %v1463_v3 = vmul.f32 %v1888_v58, %v2864_v11  ;;  %v1351_v26 = vpop.f32.mrb[9].mxu0 }
 0x226   : > { %v1543_v61 = vadd.f32 %v1511_v56, %v1479_v44  ;;  %v1480_v31 = vmul.f32 %v1905_v14, %v2864_v11  ;;  %v1418_v63 = vpop.f32.mrb[11].mxu1  ;;  %v1461_v28 = vmul.f32 %v2864_v11, %v1351_v26  ;;  %v1889_v9 = vpop.f32.mrb[10].mxu0 }
 0x227   : > { %v1541_v45 = vadd.f32 %v1509_v49, %v1477_v55  ;;  %v1478_v54 = vmul.f32 %v2864_v11, %v1418_v63  ;;  %v1527_v36 = vadd.f32 %v1495_v22, %v1463_v3  ;;  %v1464_v21 = vmul.f32 %v1889_v9, %v2864_v11  ;;  %v1354_v13 = vpop.f32.mrb[11].mxu0  ;;  %v1500_v49 = vld [vmem:[%s3095_s3 + $0x78] sm:$0xff] }
 0x228   : > { %vm1575_vm12 = vcmp.gt.f32.partialorder %v1543_v61, 0.0  ;;  %v1607_v4 = vmul.f32 0.01, %v1543_v61  ;;  %v1525_v17 = vadd.f32 %v1493_v5, %v1461_v28  ;;  %v1544_v51 = vadd.f32 %v1512_v41, %v1480_v31  ;;  %v1514_v28 = vld [vmem:[%s3095_s3 + $0xe8] sm:$0xff] }
 0x229   : > { %vm1573_vm13 = vcmp.gt.f32.partialorder %v1541_v45, 0.0  ;;  %v1605_v25 = vmul.f32 0.01, %v1541_v45  ;;  %vm1559_vm14 = vcmp.gt.f32.partialorder %v1527_v36, 0.0  ;;  %v1591_v57 = vmul.f32 0.01, %v1527_v36 }
 0x22a   : > { %v1639_v37 = vsel %vm1575_vm12, %v1543_v61, %v1607_v4  ;;  %v1528_v33 = vadd.f32 %v1496_v16, %v1464_v21  ;;  %vm1557_vm15 = vcmp.gt.f32.partialorder %v1525_v17, 0.0  ;;  %v1589_v24 = vmul.f32 0.01, %v1525_v17  ;;  %v1498_v4 = vld [vmem:[%s3095_s3 + $0x68] sm:$0xff] }
 0x22b   : > { %1671 = vst [vmem:[%s2900_s11 + $0xd0] sm:$0xff] %v1639_v37  ;;  %v1637_v30 = vsel %vm1573_vm13, %v1541_v45, %v1605_v25  ;;  %vm1576_vm0 = vcmp.gt.f32.partialorder %v1544_v51, 0.0  ;;  %v1623_v39 = vsel %vm1559_vm14, %v1527_v36, %v1591_v57  ;;  %v1608_v59 = vmul.f32 0.01, %v1544_v51 }
 0x22c   : > { %1669 = vst [vmem:[%s2900_s11 + $0xc0] sm:$0xff] %v1637_v30  ;;  %vm1560_vm1 = vcmp.gt.f32.partialorder %v1528_v33, 0.0  ;;  %v1592_v1 = vmul.f32 0.01, %v1528_v33  ;;  %1655 = vst [vmem:[%s2900_s11 + $0x50] sm:$0xff] %v1623_v39  ;;  %v1621_v62 = vsel %vm1557_vm15, %v1525_v17, %v1589_v24  ;;  %v1462_v27 = vmul.f32 %v2864_v11, %v1354_v13 }
 0x22d   : > { %v1542_v18 = vadd.f32 %v1510_v48, %v1478_v54  ;;  %1653 = vst [vmem:[%s2900_s11 + $0x40] sm:$0xff] %v1621_v62  ;;  %v1640_v19 = vsel %vm1576_vm0, %v1544_v51, %v1608_v59 }
 0x22e   : > { %v1624_v46 = vsel %vm1560_vm1, %v1528_v33, %v1592_v1  ;;  %1672 = vst [vmem:[%s2900_s11 + $0xd8] sm:$0xff] %v1640_v19  ;;  %v1526_v12 = vadd.f32 %v1494_v32, %v1462_v27 }
 0x22f   : > { %1656 = vst [vmem:[%s2900_s11 + $0x58] sm:$0xff] %v1624_v46  ;;  %vm1574_vm2 = vcmp.gt.f32.partialorder %v1542_v18, 0.0  ;;  %v1606_v35 = vmul.f32 0.01, %v1542_v18 }
 0x230   : > { %vm1558_vm3 = vcmp.gt.f32.partialorder %v1526_v12, 0.0  ;;  %v1590_v29 = vmul.f32 0.01, %v1526_v12 }
 0x231   : > { %v1638_v60 = vsel %vm1574_vm2, %v1542_v18, %v1606_v35 }
 0x232   : > { %1670 = vst [vmem:[%s2900_s11 + $0xc8] sm:$0xff] %v1638_v60  ;;  %v1622_v40 = vsel %vm1558_vm3, %v1526_v12, %v1590_v29 }
 0x233   : > { %1654 = vst [vmem:[%s2900_s11 + $0x48] sm:$0xff] %v1622_v40 }
 0x25f   : > { %v1908_v0 = vpop.f32.mrb[12].mxu1 }
 0x260   : > { %v1483_v23 = vmul.f32 %v1908_v0, %v2864_v11  ;;  %v1431_v53 = vpop.f32.mrb[13].mxu1  ;;  %v1892_v52 = vpop.f32.mrb[12].mxu0 }
 0x261   : > { %v1481_v7 = vmul.f32 %v2864_v11, %v1431_v53  ;;  %v1909_v2 = vpop.f32.mrb[14].mxu1  ;;  %v1467_v47 = vmul.f32 %v1892_v52, %v2864_v11  ;;  %v1367_v8 = vpop.f32.mrb[13].mxu0 }
 0x262   : > { %v1547_v38 = vadd.f32 %v1515_v6, %v1483_v23  ;;  %v1484_v43 = vmul.f32 %v1909_v2, %v2864_v11  ;;  %v1434_v15 = vpop.f32.mrb[15].mxu1  ;;  %v1465_v56 = vmul.f32 %v2864_v11, %v1367_v8  ;;  %v1893_v42 = vpop.f32.mrb[14].mxu0 }
 0x263   : > { %v1545_v44 = vadd.f32 %v1513_v34, %v1481_v7  ;;  %v1482_v58 = vmul.f32 %v2864_v11, %v1434_v15  ;;  %v1531_v22 = vadd.f32 %v1499_v50, %v1467_v47  ;;  %v1468_v14 = vmul.f32 %v1893_v42, %v2864_v11  ;;  %v1370_v3 = vpop.f32.mrb[15].mxu0 }
 0x264   : > { %vm1579_vm4 = vcmp.gt.f32.partialorder %v1547_v38, 0.0  ;;  %v1611_v55 = vmul.f32 0.01, %v1547_v38  ;;  %v1529_v61 = vadd.f32 %v1497_v20, %v1465_v56  ;;  %v1548_v5 = vadd.f32 %v1516_v10, %v1484_v43 }
 0x265   : > { %vm1577_vm5 = vcmp.gt.f32.partialorder %v1545_v44, 0.0  ;;  %v1609_v26 = vmul.f32 0.01, %v1545_v44  ;;  %vm1563_vm6 = vcmp.gt.f32.partialorder %v1531_v22, 0.0  ;;  %v1595_v31 = vmul.f32 0.01, %v1531_v22 }
 0x266   : > { %v1643_v41 = vsel %vm1579_vm4, %v1547_v38, %v1611_v55  ;;  %v1532_v63 = vadd.f32 %v1500_v49, %v1468_v14  ;;  %vm1561_vm7 = vcmp.gt.f32.partialorder %v1529_v61, 0.0  ;;  %v1593_v45 = vmul.f32 0.01, %v1529_v61 }
 0x267   : > { %1675 = vst [vmem:[%s2900_s11 + $0xf0] sm:$0xff] %v1643_v41  ;;  %v1641_v9 = vsel %vm1577_vm5, %v1545_v44, %v1609_v26  ;;  %vm1580_vm8 = vcmp.gt.f32.partialorder %v1548_v5, 0.0  ;;  %v1627_v16 = vsel %vm1563_vm6, %v1531_v22, %v1595_v31  ;;  %v1612_v36 = vmul.f32 0.01, %v1548_v5 }
 0x268   : > { %1673 = vst [vmem:[%s2900_s11 + $0xe0] sm:$0xff] %v1641_v9  ;;  %vm1564_vm9 = vcmp.gt.f32.partialorder %v1532_v63, 0.0  ;;  %v1596_v54 = vmul.f32 0.01, %v1532_v63  ;;  %1659 = vst [vmem:[%s2900_s11 + $0x70] sm:$0xff] %v1627_v16  ;;  %v1625_v21 = vsel %vm1561_vm7, %v1529_v61, %v1593_v45  ;;  %v1466_v13 = vmul.f32 %v2864_v11, %v1370_v3 }
 0x269   : > { %v1546_v17 = vadd.f32 %v1514_v28, %v1482_v58  ;;  %1657 = vst [vmem:[%s2900_s11 + $0x60] sm:$0xff] %v1625_v21  ;;  %v1644_v51 = vsel %vm1580_vm8, %v1548_v5, %v1612_v36 }
 0x26a   : > { %v1628_v25 = vsel %vm1564_vm9, %v1532_v63, %v1596_v54  ;;  %1676 = vst [vmem:[%s2900_s11 + $0xf8] sm:$0xff] %v1644_v51  ;;  %v1530_v57 = vadd.f32 %v1498_v4, %v1466_v13 }
 0x26b   : > { %1660 = vst [vmem:[%s2900_s11 + $0x78] sm:$0xff] %v1628_v25  ;;  %vm1578_vm10 = vcmp.gt.f32.partialorder %v1546_v17, 0.0  ;;  %v1610_v37 = vmul.f32 0.01, %v1546_v17 }
 0x26c   : > { %vm1562_vm11 = vcmp.gt.f32.partialorder %v1530_v57, 0.0  ;;  %v1594_v33 = vmul.f32 0.01, %v1530_v57 }
 0x26d   : > { %v1642_v48 = vsel %vm1578_vm10, %v1546_v17, %v1610_v37 }
 0x26e   : > { %1674 = vst [vmem:[%s2900_s11 + $0xe8] sm:$0xff] %v1642_v48  ;;  %v1626_v11 = vsel %vm1562_vm11, %v1530_v57, %v1594_v33 }
 0x26f   : > { %1658 = vst [vmem:[%s2900_s11 + $0x68] sm:$0xff] %v1626_v11 }
 0x270   : > { %2036 = shalt.err (!%p2033_p5)
}
 0x271   : > { %s2037_s8 = scalar_lea.hbm %s3037_s14, 4096  ;;  %s2041_s30 = scalar_lea.hbm %s3096_s4, 8192 }
 0x272   : > { %p2038_p6 = scmp.ne.s32.totalorder %s3037_s14, %s2037_s8  ;;  %p2042_p10 = scmp.lt.u32.totalorder %s3037_s14, %s3096_s4 }
 0x273   : > { %p2043_p11 = scmp.lt.u32.totalorder %s2041_s30, %s2037_s8  ;;  %p2045_p13 = scmp.lt.u32.totalorder %s2037_s8, %s3037_s14 }
 0x274   : > { %p2039_p7 = pnand %p2038_p6, %p2178_p4 }
 0x275   : > { %p2044_p12 = por %p2043_p11, %p2042_p10 }
 0x276   : > { %p2040_p9 = pneg %p2039_p7 }
 0x277   : > { %p2046_p0 = por %p2045_p13, %p2044_p12 }
 0x279   : > { %p2047_p1 = pnand %p2046_p0, %p2040_p9 }
 0x27b   : > { %2050 = shalt.err (!%p2047_p1)
}
 0x27c   : > { %s2112_s7 = smov 128  }
 0x27d   : > { %1919 = dma.vmem_to_hbm [thread:$0]  (%p2178_p4), %s3040_s10, 4096, %s3037_s14, %s3045_s18, %s2112_s7, %s2112_s7, %s2104_s9  }
 0x27e PF: > { %p1925_p2 = scmp.ge.s32.totalorder %s2101_s20, 2  ;;  %s1708_s12 = sand.u32 1, %s2081_s15  }
 0x27f   : > { %s1709_s13 = scalar_lea.sflag [#allocation3], %s1708_s12 }
 0x280   : > { %p1922_p3 = pnand %p1925_p2, %p2185_p8 }
 0x282   : > { %2076 = dma.done.wait (!%p1922_p3), %s1709_s13, 4096  }
 0x283   : > { %2078 = vsyncadd (!%p1922_p3), %s1709_s13, 4294963200  ;;  %s17_s20 = sadd.s32 1, %s2101_s20   ;;  %s3099_s15 = smov %s2085_s16 }
 0x284   : > { %p14_p5 = scmp.ge.s32.totalorder %s17_s20, 4   ;;  %s3100_s16 = smov %s2089_s17 }
 0x285   : > { %s3101_s17 = smov %s2191_s28  ;;  %s3102_s18 = smov %s2097_s19 }
 0x286   : > { %s3103_s19 = smov %s3105_s23  ;;  %16 = sbr.rel (!%p14_p5) target bundleno = 4 (0x4), region = 75 }
 0x28d   :  { %1714 = vsyncpa [#allocation3], 1 }
 0x28e   :  { %1716 = vsyncpa [#allocation3 + $0x1], 1 }

</bundles_post_ra>
